<compile_context>
chip_gen: v7x
topology: tpu7x:2x2x1
jax: 0.10.0
libtpu: 0.0.40
codegen_flags: <defaults>
</compile_context>

<pallas_src>
import jax
import jax.numpy as jnp
import numpy as np
from jax import lax
from jax.experimental import pallas as pl
from jax.experimental.pallas import tpu as pltpu


def _down_conv_kernel(x_ref, w1_ref, b1_ref, w2_ref, b2_ref, o_ref):
    # x_ref : (nb, H, W, Cin)        bf16 NHWC block
    # w*_ref: (9*Cin, Cout)          bf16, BN scale folded in, row = (kh*3+kw)*Cin + ci
    # b*_ref: (1, Cout)              f32 folded BN bias
    # o_ref : (nb*Ho2*Wo2, Cout)     f32, conv2 matmul layout (row-major over (n, h, w))
    nb, H, W, cin = x_ref.shape
    hp, wp = H // 2, W // 2

    # ---- MaxPool2d(2): in-VMEM, bf16 (exact) ----
    x = x_ref[...]                                      # (nb, H, W, cin)
    xh = x.reshape(nb, hp, 2, W, cin)                   # split H: major dim, free
    a = jnp.maximum(xh[:, :, 0], xh[:, :, 1])           # (nb, hp, W, cin)
    aw = a.reshape(nb, hp, wp, 2, cin)                  # split W into adjacent pairs
    p = jnp.maximum(aw[:, :, :, 0], aw[:, :, :, 1])     # (nb, hp, wp, cin)

    def conv_bn_relu(feat, w_ref, b_ref):
        # One im2col matmul on the MXU (bf16 operands, f32 accumulator),
        # then folded-BN bias add + ReLU in f32.
        nb_, hi, wi, ci = feat.shape
        ho, wo = hi - 2, wi - 2
        cols = jnp.concatenate(
            [feat[:, dh:dh + ho, dw:dw + wo, :]
             for dh in range(3) for dw in range(3)],
            axis=-1,
        )                                               # (nb, ho, wo, 9*ci)
        cols = cols.reshape(nb_ * ho * wo, 9 * ci).astype(jnp.bfloat16)
        acc = jnp.dot(cols, w_ref[...], preferred_element_type=jnp.float32)
        h2d = jnp.maximum(acc + b_ref[...], 0.0)        # (nb*ho*wo, Cout) f32
        return h2d, (nb_, ho, wo)

    h1_2d, (nb1, ho1, wo1) = conv_bn_relu(p, w1_ref, b1_ref)
    h1 = h1_2d.astype(jnp.bfloat16).reshape(nb1, ho1, wo1, -1)
    h2_2d, _ = conv_bn_relu(h1, w2_ref, b2_ref)
    o_ref[...] = h2_2d                                  # direct store, no relayout


def _largest_divisor_leq(n, cap):
    for c in range(min(n, cap), 0, -1):
        if n % c == 0:
            return c
    return 1


def down_conv(x_nchw, w1_oihw, bn1, w2_oihw, bn2, eps=1e-5, max_images_per_step=8):
    n, cin, h, w = x_nchw.shape
    cmid = w1_oihw.shape[0]
    cout = w2_oihw.shape[0]
    hp, wp = h // 2, w // 2
    ho1, wo1 = hp - 2, wp - 2
    ho2, wo2 = ho1 - 2, wo1 - 2

    # Single host-side relayout: NCHW -> NHWC, cast to bf16 (halves DMA bytes).
    x_nhwc = jnp.transpose(x_nchw, (0, 2, 3, 1)).astype(jnp.bfloat16)

    # Fold BatchNorm (inference form, running stats) into scale/bias.
    # TODO(synk): training-mode BatchNorm (per-batch statistics) would need an
    # extra cross-batch reduction pass; inference-mode semantics are used here.
    def fold(bn):
        gamma, beta, mean, var = bn
        scale = gamma / jnp.sqrt(var + eps)
        bias = beta - mean * scale
        return scale, bias

    s1, b1 = fold(bn1)
    s2, b2 = fold(bn2)

    # OIHW conv weights -> (9*Cin, Cout) im2col tap matrix with BN scale folded in.
    def pack_w(w_oihw, scale):
        co, ci = w_oihw.shape[0], w_oihw.shape[1]
        wm = jnp.transpose(w_oihw, (2, 3, 1, 0)).reshape(9 * ci, co)
        return (wm * scale[None, :]).astype(jnp.bfloat16)

    w1_mat = pack_w(w1_oihw, s1)
    w2_mat = pack_w(w2_oihw, s2)
    b1 = b1.reshape(1, cmid).astype(jnp.float32)
    b2 = b2.reshape(1, cout).astype(jnp.float32)

    n_blk = _largest_divisor_leq(n, max_images_per_step)
    grid = (n // n_blk,)
    rows_per_blk = n_blk * ho2 * wo2

    # TODO(synk): for production UNet sizes (C up to 512, H/W up to 512) add an
    # H-band grid axis with a 2-row halo and set vmem_limit_bytes so a block fits
    # v7x's 64 MiB VMEM; whole-image blocks are used here only for the small demo.
    out = pl.pallas_call(
        _down_conv_kernel,
        out_shape=jax.ShapeDtypeStruct((n * ho2 * wo2, cout), jnp.float32),
        grid_spec=pltpu.PrefetchScalarGridSpec(
            num_scalar_prefetch=0,
            grid=grid,
            in_specs=[
                pl.BlockSpec((n_blk, h, w, cin), lambda i: (i, 0, 0, 0)),
                pl.BlockSpec((9 * cin, cmid), lambda i: (0, 0)),
                pl.BlockSpec((1, cmid), lambda i: (0, 0)),
                pl.BlockSpec((9 * cmid, cout), lambda i: (0, 0)),
                pl.BlockSpec((1, cout), lambda i: (0, 0)),
            ],
            out_specs=pl.BlockSpec((rows_per_blk, cout), lambda i: (i, 0)),
        ),
        compiler_params=pltpu.CompilerParams(dimension_semantics=("parallel",)),
    )(x_nhwc, w1_mat, b1, w2_mat, b2)

    out = out.reshape(n, ho2, wo2, cout)
    return jnp.transpose(out, (0, 3, 1, 2))  # back to PyTorch NCHW


def reference(x, w1, bn1, w2, bn2, eps=1e-5):
    """Plain-JAX f32 reference of the same forward pass (NCHW)."""
    p = lax.reduce_window(x, -jnp.inf, lax.max, (1, 1, 2, 2), (1, 1, 2, 2), "VALID")

    def bn_relu(y, bn):
        gamma, beta, mean, var = bn
        s = gamma / jnp.sqrt(var + eps)
        b = beta - mean * s
        return jnp.maximum(y * s[None, :, None, None] + b[None, :, None, None], 0.0)

    dn = ("NCHW", "OIHW", "NCHW")
    y = lax.conv_general_dilated(p, w1, (1, 1), "VALID", dimension_numbers=dn)
    y = bn_relu(y, bn1)
    y = lax.conv_general_dilated(y, w2, (1, 1), "VALID", dimension_numbers=dn)
    y = bn_relu(y, bn2)
    return y


if __name__ == "__main__":
    N, Cin, H, W = 2, 4, 16, 16
    Cout = 8  # mid_channels == out_channels in DoubleConv

    key = jax.random.PRNGKey(0)
    ks = jax.random.split(key, 10)
    x = jax.random.normal(ks[0], (N, Cin, H, W), jnp.float32)
    w1 = jax.random.normal(ks[1], (Cout, Cin, 3, 3), jnp.float32) * 0.2
    w2 = jax.random.normal(ks[2], (Cout, Cout, 3, 3), jnp.float32) * 0.2
    # BatchNorm params: (gamma, beta, running_mean, running_var)
    bn1 = (
        jax.random.uniform(ks[3], (Cout,), jnp.float32, 0.5, 1.5),
        jax.random.normal(ks[4], (Cout,), jnp.float32) * 0.1,
        jax.random.normal(ks[5], (Cout,), jnp.float32) * 0.1,
        jax.random.uniform(ks[6], (Cout,), jnp.float32, 0.5, 1.5),
    )
    bn2 = (
        jax.random.uniform(ks[7], (Cout,), jnp.float32, 0.5, 1.5),
        jax.random.normal(ks[8], (Cout,), jnp.float32) * 0.1,
        jax.random.normal(ks[9], (Cout,), jnp.float32) * 0.1,
        jnp.ones((Cout,), jnp.float32),
    )

    out = jax.block_until_ready(down_conv(x, w1, bn1, w2, bn2))
    assert out.shape == (N, Cout, H // 2 - 4, W // 2 - 4), out.shape

    ref = reference(x, w1, bn1, w2, bn2)
    # bf16 matmul operands (f32 accumulation) -> loosened tolerance vs. f32 reference.
    np.testing.assert_allclose(np.asarray(out), np.asarray(ref), rtol=5e-2, atol=5e-2)
    print("KERNEL_OK")
</pallas_src>

<mosaic_0001>
module attributes {stable_mosaic.version = 11 : i64} {
  func.func @_down_conv_kernel(%arg0: i32, %arg1: memref<2x16x16x4xbf16, #tpu.memory_space<vmem>>, %arg2: memref<36x8xbf16, #tpu.memory_space<vmem>>, %arg3: memref<1x8xf32, #tpu.memory_space<vmem>>, %arg4: memref<72x8xbf16, #tpu.memory_space<vmem>>, %arg5: memref<1x8xf32, #tpu.memory_space<vmem>>, %arg6: memref<32x8xf32, #tpu.memory_space<vmem>>) attributes {dimension_semantics = [#tpu.dimension_semantics<parallel>], iteration_bounds = array<i64: 1>, scalar_prefetch = 0 : i64, scratch_operands = 0 : i64, tpu.core_type = #tpu.core_type<tc>, window_params = [{transform_indices = @transform_0, window_bounds = array<i64: 2, 16, 16, 4>}, {pipeline_mode = #tpu.pipeline_mode<synchronous>, transform_indices = @transform_1, window_bounds = array<i64: 36, 8>}, {pipeline_mode = #tpu.pipeline_mode<synchronous>, transform_indices = @transform_2, window_bounds = array<i64: 1, 8>}, {pipeline_mode = #tpu.pipeline_mode<synchronous>, transform_indices = @transform_3, window_bounds = array<i64: 72, 8>}, {pipeline_mode = #tpu.pipeline_mode<synchronous>, transform_indices = @transform_4, window_bounds = array<i64: 1, 8>}, {transform_indices = @transform_5, window_bounds = array<i64: 32, 8>}]} {
    %c0 = arith.constant 0 : index
    %c0_0 = arith.constant 0 : index
    %c0_1 = arith.constant 0 : index
    %c0_2 = arith.constant 0 : index
    %0 = vector.load %arg1[%c0, %c0_0, %c0_1, %c0_2] : memref<2x16x16x4xbf16, #tpu.memory_space<vmem>>, vector<2x16x16x4xbf16>
    %1 = vector.shape_cast %0 : vector<2x16x16x4xbf16> to vector<2x8x2x16x4xbf16>
    %2 = vector.extract_strided_slice %1 {offsets = [0, 0, 0, 0, 0], sizes = [2, 8, 1, 16, 4], strides = [1, 1, 1, 1, 1]} : vector<2x8x2x16x4xbf16> to vector<2x8x1x16x4xbf16>
    %3 = vector.shape_cast %2 : vector<2x8x1x16x4xbf16> to vector<2x8x16x4xbf16>
    %4 = vector.extract_strided_slice %1 {offsets = [0, 0, 1, 0, 0], sizes = [2, 8, 1, 16, 4], strides = [1, 1, 1, 1, 1]} : vector<2x8x2x16x4xbf16> to vector<2x8x1x16x4xbf16>
    %5 = vector.shape_cast %4 : vector<2x8x1x16x4xbf16> to vector<2x8x16x4xbf16>
    %6 = arith.maximumf %3, %5 : vector<2x8x16x4xbf16>
    %7 = vector.shape_cast %6 : vector<2x8x16x4xbf16> to vector<2x8x8x2x4xbf16>
    %8 = vector.extract_strided_slice %7 {offsets = [0, 0, 0, 0, 0], sizes = [2, 8, 8, 1, 4], strides = [1, 1, 1, 1, 1]} : vector<2x8x8x2x4xbf16> to vector<2x8x8x1x4xbf16>
    %9 = vector.shape_cast %8 : vector<2x8x8x1x4xbf16> to vector<2x8x8x4xbf16>
    %10 = vector.extract_strided_slice %7 {offsets = [0, 0, 0, 1, 0], sizes = [2, 8, 8, 1, 4], strides = [1, 1, 1, 1, 1]} : vector<2x8x8x2x4xbf16> to vector<2x8x8x1x4xbf16>
    %11 = vector.shape_cast %10 : vector<2x8x8x1x4xbf16> to vector<2x8x8x4xbf16>
    %12 = arith.maximumf %9, %11 : vector<2x8x8x4xbf16>
    %13 = vector.extract_strided_slice %12 {offsets = [0, 0, 0, 0], sizes = [2, 6, 6, 4], strides = [1, 1, 1, 1]} : vector<2x8x8x4xbf16> to vector<2x6x6x4xbf16>
    %14 = vector.extract_strided_slice %12 {offsets = [0, 0, 1, 0], sizes = [2, 6, 6, 4], strides = [1, 1, 1, 1]} : vector<2x8x8x4xbf16> to vector<2x6x6x4xbf16>
    %15 = vector.extract_strided_slice %12 {offsets = [0, 0, 2, 0], sizes = [2, 6, 6, 4], strides = [1, 1, 1, 1]} : vector<2x8x8x4xbf16> to vector<2x6x6x4xbf16>
    %16 = vector.extract_strided_slice %12 {offsets = [0, 1, 0, 0], sizes = [2, 6, 6, 4], strides = [1, 1, 1, 1]} : vector<2x8x8x4xbf16> to vector<2x6x6x4xbf16>
    %17 = vector.extract_strided_slice %12 {offsets = [0, 1, 1, 0], sizes = [2, 6, 6, 4], strides = [1, 1, 1, 1]} : vector<2x8x8x4xbf16> to vector<2x6x6x4xbf16>
    %18 = vector.extract_strided_slice %12 {offsets = [0, 1, 2, 0], sizes = [2, 6, 6, 4], strides = [1, 1, 1, 1]} : vector<2x8x8x4xbf16> to vector<2x6x6x4xbf16>
    %19 = vector.extract_strided_slice %12 {offsets = [0, 2, 0, 0], sizes = [2, 6, 6, 4], strides = [1, 1, 1, 1]} : vector<2x8x8x4xbf16> to vector<2x6x6x4xbf16>
    %20 = vector.extract_strided_slice %12 {offsets = [0, 2, 1, 0], sizes = [2, 6, 6, 4], strides = [1, 1, 1, 1]} : vector<2x8x8x4xbf16> to vector<2x6x6x4xbf16>
    %21 = vector.extract_strided_slice %12 {offsets = [0, 2, 2, 0], sizes = [2, 6, 6, 4], strides = [1, 1, 1, 1]} : vector<2x8x8x4xbf16> to vector<2x6x6x4xbf16>
    %22 = tpu.concatenate %13, %14, %15, %16, %17, %18, %19, %20, %21 in 3 : vector<2x6x6x4xbf16>, vector<2x6x6x4xbf16>, vector<2x6x6x4xbf16>, vector<2x6x6x4xbf16>, vector<2x6x6x4xbf16>, vector<2x6x6x4xbf16>, vector<2x6x6x4xbf16>, vector<2x6x6x4xbf16>, vector<2x6x6x4xbf16> -> vector<2x6x6x36xbf16>
    %23 = vector.shape_cast %22 : vector<2x6x6x36xbf16> to vector<72x36xbf16>
    %c0_3 = arith.constant 0 : index
    %c0_4 = arith.constant 0 : index
    %24 = vector.load %arg2[%c0_3, %c0_4] : memref<36x8xbf16, #tpu.memory_space<vmem>>, vector<36x8xbf16>
    %cst = arith.constant dense<0.000000e+00> : vector<72x8xf32>
    %25 = tpu.matmul %23, %24, %cst {dimension_numbers = #tpu.dot_dimension_numbers<[1], [0], [0], [1], [0, 0, 1, 1], [], []>} : vector<72x36xbf16>, vector<36x8xbf16>, vector<72x8xf32> -> vector<72x8xf32>
    %c0_5 = arith.constant 0 : index
    %c0_6 = arith.constant 0 : index
    %26 = vector.load %arg3[%c0_5, %c0_6] : memref<1x8xf32, #tpu.memory_space<vmem>>, vector<1x8xf32>
    %27 = vector.broadcast %26 : vector<1x8xf32> to vector<72x8xf32>
    %28 = arith.addf %25, %27 : vector<72x8xf32>
    %cst_7 = arith.constant 0.000000e+00 : f32
    %29 = vector.broadcast %cst_7 : f32 to vector<72x8xf32>
    %30 = arith.maximumf %28, %29 : vector<72x8xf32>
    %31 = arith.truncf %30 : vector<72x8xf32> to vector<72x8xbf16>
    %32 = vector.shape_cast %31 : vector<72x8xbf16> to vector<2x6x6x8xbf16>
    %33 = vector.extract_strided_slice %32 {offsets = [0, 0, 0, 0], sizes = [2, 4, 4, 8], strides = [1, 1, 1, 1]} : vector<2x6x6x8xbf16> to vector<2x4x4x8xbf16>
    %34 = vector.extract_strided_slice %32 {offsets = [0, 0, 1, 0], sizes = [2, 4, 4, 8], strides = [1, 1, 1, 1]} : vector<2x6x6x8xbf16> to vector<2x4x4x8xbf16>
    %35 = vector.extract_strided_slice %32 {offsets = [0, 0, 2, 0], sizes = [2, 4, 4, 8], strides = [1, 1, 1, 1]} : vector<2x6x6x8xbf16> to vector<2x4x4x8xbf16>
    %36 = vector.extract_strided_slice %32 {offsets = [0, 1, 0, 0], sizes = [2, 4, 4, 8], strides = [1, 1, 1, 1]} : vector<2x6x6x8xbf16> to vector<2x4x4x8xbf16>
    %37 = vector.extract_strided_slice %32 {offsets = [0, 1, 1, 0], sizes = [2, 4, 4, 8], strides = [1, 1, 1, 1]} : vector<2x6x6x8xbf16> to vector<2x4x4x8xbf16>
    %38 = vector.extract_strided_slice %32 {offsets = [0, 1, 2, 0], sizes = [2, 4, 4, 8], strides = [1, 1, 1, 1]} : vector<2x6x6x8xbf16> to vector<2x4x4x8xbf16>
    %39 = vector.extract_strided_slice %32 {offsets = [0, 2, 0, 0], sizes = [2, 4, 4, 8], strides = [1, 1, 1, 1]} : vector<2x6x6x8xbf16> to vector<2x4x4x8xbf16>
    %40 = vector.extract_strided_slice %32 {offsets = [0, 2, 1, 0], sizes = [2, 4, 4, 8], strides = [1, 1, 1, 1]} : vector<2x6x6x8xbf16> to vector<2x4x4x8xbf16>
    %41 = vector.extract_strided_slice %32 {offsets = [0, 2, 2, 0], sizes = [2, 4, 4, 8], strides = [1, 1, 1, 1]} : vector<2x6x6x8xbf16> to vector<2x4x4x8xbf16>
    %42 = tpu.concatenate %33, %34, %35, %36, %37, %38, %39, %40, %41 in 3 : vector<2x4x4x8xbf16>, vector<2x4x4x8xbf16>, vector<2x4x4x8xbf16>, vector<2x4x4x8xbf16>, vector<2x4x4x8xbf16>, vector<2x4x4x8xbf16>, vector<2x4x4x8xbf16>, vector<2x4x4x8xbf16>, vector<2x4x4x8xbf16> -> vector<2x4x4x72xbf16>
    %43 = vector.shape_cast %42 : vector<2x4x4x72xbf16> to vector<32x72xbf16>
    %c0_8 = arith.constant 0 : index
    %c0_9 = arith.constant 0 : index
    %44 = vector.load %arg4[%c0_8, %c0_9] : memref<72x8xbf16, #tpu.memory_space<vmem>>, vector<72x8xbf16>
    %cst_10 = arith.constant dense<0.000000e+00> : vector<32x8xf32>
    %45 = tpu.matmul %43, %44, %cst_10 {dimension_numbers = #tpu.dot_dimension_numbers<[1], [0], [0], [1], [0, 0, 1, 1], [], []>} : vector<32x72xbf16>, vector<72x8xbf16>, vector<32x8xf32> -> vector<32x8xf32>
    %c0_11 = arith.constant 0 : index
    %c0_12 = arith.constant 0 : index
    %46 = vector.load %arg5[%c0_11, %c0_12] : memref<1x8xf32, #tpu.memory_space<vmem>>, vector<1x8xf32>
    %47 = vector.broadcast %46 : vector<1x8xf32> to vector<32x8xf32>
    %48 = arith.addf %45, %47 : vector<32x8xf32>
    %cst_13 = arith.constant 0.000000e+00 : f32
    %49 = vector.broadcast %cst_13 : f32 to vector<32x8xf32>
    %50 = arith.maximumf %48, %49 : vector<32x8xf32>
    %c0_14 = arith.constant 0 : index
    %c0_15 = arith.constant 0 : index
    %51 = vector.load %arg6[%c0_14, %c0_15] : memref<32x8xf32, #tpu.memory_space<vmem>>, vector<32x8xf32>
    tpu.vector_store %arg6[%c0_14, %c0_15], %50 {strides = array<i32>} : memref<32x8xf32, #tpu.memory_space<vmem>>, vector<32x8xf32>,
    return
  }
  func.func @transform_0(%arg0: i32) -> (i32, i32, i32, i32) {
    %c0_i32 = arith.constant 0 : i32
    %c0_i32_0 = arith.constant 0 : i32
    %c0_i32_1 = arith.constant 0 : i32
    %c0_i32_2 = arith.constant 0 : i32
    return %arg0, %c0_i32, %c0_i32_0, %c0_i32_1 : i32, i32, i32, i32
  }
  func.func @transform_1(%arg0: i32) -> (i32, i32) {
    %c0_i32 = arith.constant 0 : i32
    %c0_i32_0 = arith.constant 0 : i32
    %c0_i32_1 = arith.constant 0 : i32
    return %c0_i32, %c0_i32_0 : i32, i32
  }
  func.func @transform_2(%arg0: i32) -> (i32, i32) {
    %c0_i32 = arith.constant 0 : i32
    %c0_i32_0 = arith.constant 0 : i32
    %c0_i32_1 = arith.constant 0 : i32
    return %c0_i32, %c0_i32_0 : i32, i32
  }
  func.func @transform_3(%arg0: i32) -> (i32, i32) {
    %c0_i32 = arith.constant 0 : i32
    %c0_i32_0 = arith.constant 0 : i32
    %c0_i32_1 = arith.constant 0 : i32
    return %c0_i32, %c0_i32_0 : i32, i32
  }
  func.func @transform_4(%arg0: i32) -> (i32, i32) {
    %c0_i32 = arith.constant 0 : i32
    %c0_i32_0 = arith.constant 0 : i32
    %c0_i32_1 = arith.constant 0 : i32
    return %c0_i32, %c0_i32_0 : i32, i32
  }
  func.func @transform_5(%arg0: i32) -> (i32, i32) {
    %c0_i32 = arith.constant 0 : i32
    %c0_i32_0 = arith.constant 0 : i32
    return %arg0, %c0_i32 : i32, i32
  }
}

</mosaic_0001>

<bundles_post_ra>
// kernel: tpu_custom_call.1
= control target key start
LH: loop header
LB: loop body
LE: loop exit
PB: predicated region body
PF: predicated region fallthrough
CT: control target
= control target key end

     0   :  { %v152_v0 = vlaneseq  ;;  %v7076_v4 = vmov 1966171168   ;;  %vm3094_vm0 = vcmask 1041409   ;;  %vm3097_vm1 = vcmask 1042434   ;;  %s7077_s25 = smov 12   ;;  %s7078_s26 = smov 24   ;;  %s9389_s0 = inlined_call_operand.vmem [shape: bf16[2,16,16,4], index: 0, kind: input, shape index: {}]   ;;  %s9390_s1 = inlined_call_operand.vmem [shape: bf16[36,8], index: 1, kind: input, shape index: {}]   ;;  %s9391_s2 = inlined_call_operand.vmem [shape: f32[1,8], index: 2, kind: input, shape index: {}]   ;;  %s9392_s3 = inlined_call_operand.vmem [shape: bf16[72,8], index: 3, kind: input, shape index: {}]   ;;  %s9393_s4 = inlined_call_operand.vmem [shape: f32[1,8], index: 4, kind: input, shape index: {}]   ;;  %s9394_s5 = inlined_call_operand.vmem [shape: f32[32,8], index: 5, kind: output, shape index: {}]  }
   0x1   :  { %v29_v1 = vld [vmem:[%s9389_s0 + $0x20] sm:$0xf]  ;;  %v30_v2 = vld [vmem:[%s9389_s0 + $0x24] sm:$0xf]  ;;  %v31_v3 = vld [vmem:[%s9389_s0 + $0x28] sm:$0xf]  ;;  %v150_v5 = vunpack.c.l.s4 %v7076_v4 }
   0x2   :  { %v32_v6 = vld [vmem:[%s9389_s0 + $0x2c] sm:$0xf]  ;;  %v7134_v7 = vshrl.u32 %v152_v0, 7  ;;  %v89_v8 = vmax.bf16 %v31_v3, %v29_v1  ;;  %v25_v11 = vld [vmem:[%s9389_s0 + $0x10] sm:$0xf]  ;;  %vm3100_vm2 = vcmask 1043459  }
   0x3   :  { %v90_v9 = vmax.bf16 %v32_v6, %v30_v2  ;;  %v151_v10 = vunpack.c.0.s8 %v150_v5  ;;  %v26_v12 = vld [vmem:[%s9389_s0 + $0x14] sm:$0xf]  ;;  %v27_v13 = vld [vmem:[%s9389_s0 + $0x18] sm:$0xf]  ;;  %v28_v14 = vld [vmem:[%s9389_s0 + $0x1c] sm:$0xf] }
   0x4   :  { %9403 = vst [vmem:[#allocation2_spill] sm:$0xff] %v7134_v7  ;;  %v33_v15 = vld [vmem:[%s9389_s0 + $0x30] sm:$0xf]  ;;  %v87_v17 = vmax.bf16 %v27_v13, %v25_v11  ;;  %v88_v18 = vmax.bf16 %v28_v14, %v26_v12  ;;  %v34_v19 = vld [vmem:[%s9389_s0 + $0x34] sm:$0xf]  ;;  %vm3103_vm3 = vcmask 1044484  }
   0x5   :  { %v7152_v16 = vsub.s32 %v151_v10, %v7134_v7  ;;  %v35_v20 = vld [vmem:[%s9389_s0 + $0x38] sm:$0xf]  ;;  %v36_v21 = vld [vmem:[%s9389_s0 + $0x3c] sm:$0xf]  ;;  %v7166_v24 = vld [vmem:[%s9389_s0 + $0x40] sm:$0xf] }
   0x6   :  { %v91_v22 = vmax.bf16 %v35_v20, %v33_v15  ;;  %v92_v23 = vmax.bf16 %v36_v21, %v34_v19  ;;  %v7171_v25 = vld [vmem:[%s9389_s0 + $0x44] sm:$0xf]  ;;  %v7176_v26 = vld [vmem:[%s9389_s0 + $0x48] sm:$0xf]  ;;  %v7185_v31 = vld [vmem:[%s9389_s0 + $0x4c] sm:$0xf] }
   0x7   :  { %v251_v27 = vrot.slane %v89_v8, %v7152_v16  ;;  %v275_v28 = vrot.slane %v90_v9, %v7152_v16  ;;  %v203_v29 = vrot.slane %v87_v17, %v7152_v16  ;;  %v227_v30 = vrot.slane %v88_v18, %v7152_v16  ;;  %s7079_s10 = smov 4   ;;  %s7080_s11 = smov 16  }
   0x8   :  { %v7188_v32 = vrot.slane %v91_v22, %v7152_v16  ;;  %v7191_v33 = vrot.slane %v92_v23, %v7152_v16  ;;  %v93_v34 = vmax.bf16 %v7176_v26, %v7166_v24  ;;  %v94_v35 = vmax.bf16 %v7185_v31, %v7171_v25  ;;  %s7081_s12 = smov 8   ;;  %s7082_s6 = smov 20  }
   0x9   :  { %v252_v36 = vcombine.high %v251_v27, %v251_v27  ;;  %v259_v37 = vrot.slane %v251_v27, %v7152_v16  ;;  %v276_v38 = vcombine.high %v275_v28, %v275_v28  ;;  %v7199_v39 = vrot.slane %v275_v28, %v7152_v16  ;;  %s7083_s7 = smov 28   ;;  %s7084_s8 = smov 32  }
   0xa   :  { %v204_v40 = vcombine.high %v203_v29, %v203_v29  ;;  %v211_v41 = vrot.slane %v203_v29, %v7152_v16  ;;  %v228_v42 = vcombine.high %v227_v30, %v227_v30  ;;  %v7203_v43 = vrot.slane %v227_v30, %v7152_v16 }
   0xb   :  { %v266_v44 = vrot.slane %v252_v36, %v7152_v16  ;;  %v267_v45 = vcombine.high %v259_v37, %v259_v37  ;;  %v7207_v46 = vrot.slane %v276_v38, %v7152_v16  ;;  %v1126_v47 = vshrl.u32 %v259_v37, 16 }
   0xc   :  { %v1146_v48 = vshrl.u32 %v7199_v39, 16  ;;  %v218_v49 = vrot.slane %v204_v40, %v7152_v16  ;;  %v219_v50 = vcombine.high %v211_v41, %v211_v41  ;;  %v7212_v51 = vrot.slane %v228_v42, %v7152_v16 }
   0xd   :  { %v268_v52 = vcombine.high %v266_v44, %v266_v44  ;;  %v1131_v53 = vshrl.u32 %v266_v44, 16  ;;  %v1136_v54 = vshrl.u32 %v267_v45, 16  ;;  %v1151_v55 = vshrl.u32 %v7207_v46, 16 }
   0xe   :  { %v1829_v56 = vmax.bf16 %v1126_v47, %v259_v37  ;;  %v1833_v57 = vmax.bf16 %v1146_v48, %v7199_v39  ;;  %v220_v58 = vcombine.high %v218_v49, %v218_v49  ;;  %v1086_v59 = vshrl.u32 %v211_v41, 16 }
   0xf   :  { %v1141_v60 = vshrl.u32 %v268_v52, 16  ;;  %v1830_v61 = vmax.bf16 %v1131_v53, %v266_v44  ;;  %v1831_v62 = vmax.bf16 %v1136_v54, %v267_v45  ;;  %v1834_v63 = vmax.bf16 %v1151_v55, %v7207_v46 }
  0x10   :  { %v2187_v0 = vrot.slane %v1829_v56, %v7152_v16  ;;  %v2243_v1 = vrot.slane %v1833_v57, %v7152_v16  ;;  %v1091_v2 = vshrl.u32 %v218_v49, 16  ;;  %v1096_v3 = vshrl.u32 %v219_v50, 16 }
  0x11   :  { %v1832_v4 = vmax.bf16 %v1141_v60, %v268_v52  ;;  %v2201_v5 = vrot.slane %v1830_v61, %v7152_v16  ;;  %v2215_v6 = vrot.slane %v1831_v62, %v7152_v16  ;;  %v2257_v8 = vrot.slane %v1834_v63, %v7152_v16 }
  0x12   :  { %v2194_v9 = vrot.slane %v2187_v0, %v7152_v16  ;;  %v2250_v10 = vrot.slane %v2243_v1, %v7152_v16  ;;  %vm3106_vm4 = vcmask 1045509   ;;  %v1101_v11 = vshrl.u32 %v220_v58, 16 }
  0x13   :  { %v1106_v12 = vshrl.u32 %v7203_v43, 16  ;;  %v7226_v13 = vrot.slane %v2201_v5, %v7152_v16  ;;  %v2222_v14 = vrot.slane %v2215_v6, %v7152_v16  ;;  %v2229_v15 = vrot.slane %v1832_v4, %v7152_v16 }
  0x14   :  { %v2264_v17 = vrot.slane %v2257_v8, %v7152_v16  ;;  %v3033_v18 = vunpack.c.l.b16 %v2194_v9  ;;  %v7231_v19 = vunpack.c.l.b16 %v2250_v10  ;;  %v1111_v20 = vshrl.u32 %v7212_v51, 16 }
  0x15   :  { %v1821_v21 = vmax.bf16 %v1086_v59, %v211_v41  ;;  %v2236_v22 = vrot.slane %v2229_v15, %v7152_v16  ;;  %v3034_v23 = vunpack.c.l.b16 %v7226_v13  ;;  %v7236_v27 = vunpack.c.l.b16 %v2222_v14 }
  0x16   :  { %v7238_v28 = vunpack.c.l.b16 %v2264_v17  ;;  %v3124_v29 = vrot.slane %v7231_v19, 4  ;;  %v1822_v30 = vmax.bf16 %v1091_v2, %v218_v49  ;;  %v1823_v36 = vmax.bf16 %v1096_v3, %v219_v50 }
  0x17   :  { %v1824_v37 = vmax.bf16 %v1101_v11, %v220_v58  ;;  %v7241_v38 = vunpack.c.l.b16 %v2236_v22  ;;  %v3118_v40 = vrot.slane %v3034_v23, 7  ;;  %v3120_v41 = vrot.slane %v7236_v27, 6 }
  0x18   :  { %v3126_v42 = vrot.slane %v7238_v28, 3  ;;  %v1825_v44 = vmax.bf16 %v1106_v12, %v7203_v43  ;;  %v1826_v45 = vmax.bf16 %v1111_v20, %v7212_v51  ;;  %v2103_v47 = vrot.slane %v1821_v21, %v7152_v16 }
  0x19   :  { %v2117_v48 = vrot.slane %v1822_v30, %v7152_v16  ;;  %v3119_v49 = vsel %vm3094_vm0, %v3118_v40, %v3033_v18  ;;  %v3122_v50 = vrot.slane %v7241_v38, 5  ;;  %v2131_v52 = vrot.slane %v1823_v36, %v7152_v16 }
  0x1a   :  { %v2145_v53 = vrot.slane %v1824_v37, %v7152_v16  ;;  %v3121_v54 = vsel %vm3097_vm1, %v3120_v41, %v3119_v49  ;;  %v2110_v55 = vrot.slane %v2103_v47, %v7152_v16  ;;  %v2159_v57 = vrot.slane %v1825_v44, %v7152_v16 }
  0x1b   :  { %v7258_v56 = vrot.slane %v2117_v48, %v7152_v16  ;;  %v3123_v58 = vsel %vm3100_vm2, %v3122_v50, %v3121_v54  ;;  %v2138_v59 = vrot.slane %v2131_v52, %v7152_v16  ;;  %v2173_v61 = vrot.slane %v1826_v45, %v7152_v16 }
  0x1c   :  { %v2152_v60 = vrot.slane %v2145_v53, %v7152_v16  ;;  %v3125_v62 = vsel %vm3103_vm3, %v3124_v29, %v3123_v58  ;;  %v2166_v63 = vrot.slane %v2159_v57, %v7152_v16  ;;  %v3027_v0 = vunpack.c.l.b16 %v2110_v55 }
  0x1d   :  { %v3028_v1 = vunpack.c.l.b16 %v7258_v56  ;;  %v3127_v2 = vsel %vm3106_vm4, %v3126_v42, %v3125_v62  ;;  %v2180_v3 = vrot.slane %v2173_v61, %v7152_v16  ;;  %v7270_v4 = vunpack.c.l.b16 %v2138_v59 }
  0x1e   :  { %v7272_v5 = vunpack.c.l.b16 %v2152_v60  ;;  %v7274_v6 = vpack.c.b16 %v3127_v2, %v3127_v2  ;;  %v7276_v8 = vunpack.c.l.b16 %v2166_v63  ;;  %v300_v10 = vcombine.high %v7188_v32, %v7188_v32 }
  0x1f   :  { %v3108_v9 = vrot.slane %v3028_v1, 7  ;;  %v7282_v11 = vunpack.c.l.b16 %v2180_v3  ;;  %v3110_v12 = vrot.slane %v7270_v4, 6  ;;  %v307_v15 = vrot.slane %v7188_v32, %v7152_v16 }
  0x20   :  { %v3112_v14 = vrot.slane %v7272_v5, 5  ;;  %4142 = vrot.lane.b32.xlu1 %v7274_v6, %s7077_s25  ;;  %v3114_v18 = vrot.slane %v7276_v8, 4  ;;  %v314_v20 = vrot.slane %v300_v10, %v7152_v16  ;;  %v324_v21 = vcombine.high %v7191_v33, %v7191_v33 }
  0x21   :  { %v3109_v17 = vsel %vm3094_vm0, %v3108_v9, %v3027_v0  ;;  %v3116_v29 = vrot.slane %v7282_v11, 3  ;;  %v315_v30 = vcombine.high %v307_v15, %v307_v15  ;;  %v7299_v32 = vrot.slane %v7191_v33, %v7152_v16 }
  0x22   :  { %v3111_v22 = vsel %vm3097_vm1, %v3110_v12, %v3109_v17  ;;  %v316_v37 = vcombine.high %v314_v20, %v314_v20  ;;  %v7303_v40 = vrot.slane %v324_v21, %v7152_v16  ;;  %v1166_v41 = vshrl.u32 %v307_v15, 16 }
  0x23   :  { %v3113_v36 = vsel %vm3100_vm2, %v3112_v14, %v3111_v22  ;;  %v1171_v44 = vshrl.u32 %v314_v20, 16  ;;  %v1176_v45 = vshrl.u32 %v315_v30, 16  ;;  %v1186_v47 = vshrl.u32 %v7299_v32, 16 }
  0x24   :  { %v3115_v42 = vsel %vm3103_vm3, %v3114_v18, %v3113_v36  ;;  %4534 = vrot.lane.b32.xlu1 %v7274_v6, %s7078_s26  ;;  %v1181_v33 = vshrl.u32 %v316_v37, 16  ;;  %v1191_v49 = vshrl.u32 %v7303_v40, 16  ;;  %v1837_v50 = vmax.bf16 %v1166_v41, %v307_v15 }
  0x25   :  { %v3117_v48 = vsel %vm3106_vm4, %v3116_v29, %v3115_v42  ;;  %v1838_v53 = vmax.bf16 %v1171_v44, %v314_v20  ;;  %v1839_v54 = vmax.bf16 %v1176_v45, %v315_v30  ;;  %v1841_v55 = vmax.bf16 %v1186_v47, %v7299_v32 }
  0x26   :  { %v7311_v52 = vpack.c.b16 %v3117_v48, %v3117_v48  ;;  %v1840_v57 = vmax.bf16 %v1181_v33, %v316_v37  ;;  %v1842_v58 = vmax.bf16 %v1191_v49, %v7303_v40  ;;  %v2271_v59 = vrot.slane %v1837_v50, %v7152_v16 }
  0x27   :  { %v347_v60 = vrot.slane %v93_v34, %v7152_v16  ;;  %v2285_v61 = vrot.slane %v1838_v53, %v7152_v16  ;;  %v2299_v62 = vrot.slane %v1839_v54, %v7152_v16  ;;  %v2327_v63 = vrot.slane %v1841_v55, %v7152_v16 }
  0x28   :  { %4140 = vrot.lane.b32.xlu0 %v7311_v52, %s7077_s25  ;;  %v371_v0 = vrot.slane %v94_v35, %v7152_v16  ;;  %v2278_v2 = vrot.slane %v2271_v59, %v7152_v16  ;;  %v2313_v3 = vrot.slane %v1840_v57, %v7152_v16  ;;  %v2341_v24 = vrot.slane %v1842_v58, %v7152_v16 }
  0x29   :  { %v348_v26 = vcombine.high %v347_v60, %v347_v60  ;;  %v7333_v34 = vrot.slane %v2285_v61, %v7152_v16  ;;  %v2306_v9 = vrot.slane %v2299_v62, %v7152_v16  ;;  %v2334_v10 = vrot.slane %v2327_v63, %v7152_v16 }
  0x2a   :  { %v355_v12 = vrot.slane %v347_v60, %v7152_v16  ;;  %v2320_v14 = vrot.slane %v2313_v3, %v7152_v16  ;;  %v2348_v25 = vrot.slane %v2341_v24, %v7152_v16  ;;  %v3039_v31 = vunpack.c.l.b16 %v2278_v2 }
  0x2b   :  { %v362_v35 = vrot.slane %v348_v26, %v7152_v16  ;;  %v3040_v15 = vunpack.c.l.b16 %v7333_v34  ;;  %v7342_v17 = vunpack.c.l.b16 %v2306_v9  ;;  %v7344_v18 = vunpack.c.l.b16 %v2334_v10 }
  0x2c   :  { %v363_v20 = vcombine.high %v355_v12, %v355_v12  ;;  %v7346_v21 = vunpack.c.l.b16 %v2320_v14  ;;  %v7348_v22 = vunpack.c.l.b16 %v2348_v25  ;;  %v372_v30 = vcombine.high %v371_v0, %v371_v0 }
  0x2d   :  { %v364_v29 = vcombine.high %v362_v35, %v362_v35  ;;  %v3128_v36 = vrot.slane %v3040_v15, 7  ;;  %v3130_v37 = vrot.slane %v7342_v17, 6  ;;  %v3134_v41 = vrot.slane %v7344_v18, 4 }
  0x2e   :  { %v7355_v42 = vrot.slane %v371_v0, %v7152_v16  ;;  %v3132_v44 = vrot.slane %v7346_v21, 5  ;;  %v3136_v45 = vrot.slane %v7348_v22, 3  ;;  %v7360_v47 = vrot.slane %v372_v30, %v7152_v16 }
  0x2f   :  { %v1206_v48 = vshrl.u32 %v355_v12, 16  ;;  %v3129_v33 = vsel %vm3094_vm0, %v3128_v36, %v3039_v31  ;;  %v1211_v49 = vshrl.u32 %v362_v35, 16  ;;  %v1216_v50 = vshrl.u32 %v363_v20, 16 }
  0x30   :  { %v1221_v53 = vshrl.u32 %v364_v29, 16  ;;  %v3131_v54 = vsel %vm3097_vm1, %v3130_v37, %v3129_v33  ;;  %v1226_v55 = vshrl.u32 %v7355_v42, 16  ;;  %v1231_v57 = vshrl.u32 %v7360_v47, 16 }
  0x31   :  { %v1845_v58 = vmax.bf16 %v1206_v48, %v355_v12  ;;  %v3133_v59 = vsel %vm3100_vm2, %v3132_v44, %v3131_v54  ;;  %v1846_v60 = vmax.bf16 %v1211_v49, %v362_v35  ;;  %v1847_v61 = vmax.bf16 %v1216_v50, %v363_v20 }
  0x32   :  { %v1848_v62 = vmax.bf16 %v1221_v53, %v364_v29  ;;  %v3135_v63 = vsel %vm3103_vm3, %v3134_v41, %v3133_v59  ;;  %v1849_v0 = vmax.bf16 %v1226_v55, %v7355_v42  ;;  %v1850_v2 = vmax.bf16 %v1231_v57, %v7360_v47  ;;  %v22_v57 = vld [vmem:[%s9389_s0 + $0x4] sm:$0xf] }
  0x33   :  { %v2355_v3 = vrot.slane %v1845_v58, %v7152_v16  ;;  %v3137_v24 = vsel %vm3106_vm4, %v3136_v45, %v3135_v63  ;;  %v2369_v26 = vrot.slane %v1846_v60, %v7152_v16  ;;  %v2383_v9 = vrot.slane %v1847_v61, %v7152_v16  ;;  %v23_v58 = vld [vmem:[%s9389_s0 + $0x8] sm:$0xf] }
  0x34   :  { %v2397_v10 = vrot.slane %v1848_v62, %v7152_v16  ;;  %v7375_v12 = vpack.c.b16 %v3137_v24, %v3137_v24  ;;  %v2411_v25 = vrot.slane %v1849_v0, %v7152_v16  ;;  %v2425_v31 = vrot.slane %v1850_v2, %v7152_v16 }
  0x35   :  { %v2362_v14 = vrot.slane %v2355_v3, %v7152_v16  ;;  %v7381_v35 = vrot.slane %v2369_v26, %v7152_v16  ;;  %v2390_v20 = vrot.slane %v2383_v9, %v7152_v16  ;;  %v291_v30 = vcombine.high %v7199_v39, %v7199_v39  ;;  %v21_v39 = vld [vmem:[%s9389_s0] sm:$0xf] }
  0x36   :  { %v2404_v29 = vrot.slane %v2397_v10, %v7152_v16  ;;  %4144 = vrot.lane.b32.xlu0 %v7375_v12, %s7077_s25  ;;  %v2418_v36 = vrot.slane %v2411_v25, %v7152_v16  ;;  %v2432_v37 = vrot.slane %v2425_v31, %v7152_v16  ;;  %v3442_v44 = vrot.slane %v7236_v27, 7 }
  0x37   :  { %v3045_v41 = vunpack.c.l.b16 %v2362_v14  ;;  %v3046_v45 = vunpack.c.l.b16 %v7381_v35  ;;  %v7393_v48 = vunpack.c.l.b16 %v2390_v20  ;;  %v1156_v49 = vshrl.u32 %v291_v30, 16  ;;  %v43_v35 = vld [vmem:[%s9389_s0 + $0x58] sm:$0xf] }
  0x38   :  { %v7395_v33 = vunpack.c.l.b16 %v2404_v29  ;;  %v7400_v50 = vunpack.c.l.b16 %v2418_v36  ;;  %v7402_v53 = vunpack.c.l.b16 %v2432_v37  ;;  %v3443_v54 = vsel %vm3094_vm0, %v3442_v44, %v3034_v23  ;;  %v24_v23 = vld [vmem:[%s9389_s0 + $0xc] sm:$0xf] }
  0x39   :  { %v3444_v55 = vrot.slane %v7241_v38, 6  ;;  %v3138_v59 = vrot.slane %v3046_v45, 7  ;;  %v3140_v60 = vrot.slane %v7393_v48, 6  ;;  %v1835_v13 = vmax.bf16 %v1156_v49, %v291_v30 }
  0x3a   :  { %v3142_v61 = vrot.slane %v7395_v33, 5  ;;  %v3144_v62 = vrot.slane %v7400_v50, 4  ;;  %v3146_v63 = vrot.slane %v7402_v53, 3  ;;  %4536 = vrot.lane.b32.xlu0 %v7375_v12, %s7078_s26  ;;  %v3446_v2 = vrot.slane %v7231_v19, 5 }
  0x3b   :  { %v3445_v0 = vsel %vm3097_vm1, %v3444_v55, %v3443_v54  ;;  %v3139_v3 = vsel %vm3094_vm0, %v3138_v59, %v3045_v41  ;;  %v3276_v24 = vrot.slane %v1835_v13, %v7152_v16  ;;  %v3448_v26 = vrot.slane %v7238_v28, 4 }
  0x3c   :  { %v85_v9 = vmax.bf16 %v23_v58, %v21_v39  ;;  %v3141_v10 = vsel %vm3097_vm1, %v3140_v60, %v3139_v3  ;;  %v3447_v14 = vsel %vm3100_vm2, %v3446_v2, %v3445_v0  ;;  %v86_v25 = vmax.bf16 %v24_v23, %v22_v57 }
  0x3d   :  { %v243_v31 = vcombine.high %v7203_v43, %v7203_v43  ;;  %v3143_v20 = vsel %vm3100_vm2, %v3142_v61, %v3141_v10  ;;  %v7436_v29 = vrot.slane %v3276_v24, %v7152_v16  ;;  %v3449_v30 = vsel %vm3103_vm3, %v3448_v26, %v3447_v14 }
  0x3e   :  { %v155_v36 = vrot.slane %v85_v9, %v7152_v16  ;;  %v3145_v37 = vsel %vm3103_vm3, %v3144_v62, %v3143_v20  ;;  %v179_v41 = vrot.slane %v86_v25, %v7152_v16  ;;  %v3432_v49 = vrot.slane %v7270_v4, 7 }
  0x3f   :  { %v1116_v44 = vshrl.u32 %v243_v31, 16  ;;  %v3147_v39 = vsel %vm3106_vm4, %v3146_v63, %v3145_v37  ;;  %v3412_v43 = vunpack.c.l.b16 %v7436_v29  ;;  %vm4714_vm5 = vcmask 31744  }
  0x40   :  { %v156_v54 = vcombine.high %v155_v36, %v155_v36  ;;  %v7446_v55 = vrot.slane %v155_v36, %v7152_v16  ;;  %v7448_v57 = vpack.c.b16 %v3147_v39, %v3147_v39  ;;  %v180_v58 = vcombine.high %v179_v41, %v179_v41 }
  0x41   :  { %v187_v59 = vrot.slane %v179_v41, %v7152_v16  ;;  %v1827_v60 = vmax.bf16 %v1116_v44, %v243_v31  ;;  %v3450_v61 = vrot.slane %v3412_v43, 3  ;;  %v3433_v62 = vsel %vm3094_vm0, %v3432_v49, %v3028_v1 }
  0x42   :  { %v170_v13 = vrot.slane %v156_v54, %v7152_v16  ;;  %v171_v23 = vcombine.high %v7446_v55, %v7446_v55  ;;  %4538 = vrot.lane.b32.xlu1 %v7448_v57, %s7078_s26  ;;  %v7462_v63 = vrot.slane %v180_v58, %v7152_v16  ;;  %v3434_v49 = vrot.slane %v7272_v5, 6 }
  0x43   :  { %v195_v0 = vcombine.high %v187_v59, %v187_v59  ;;  %v1066_v2 = vshrl.u32 %v187_v59, 16  ;;  %v3262_v3 = vrot.slane %v1827_v60, %v7152_v16  ;;  %v3451_v24 = vsel %vm3106_vm4, %v3450_v61, %v3449_v30 }
  0x44   :  { %v172_v26 = vcombine.high %v170_v13, %v170_v13  ;;  %v1051_v9 = vshrl.u32 %v170_v13, 16  ;;  %v1056_v10 = vshrl.u32 %v171_v23, 16  ;;  %v7466_v14 = vpack.c.b16 %v3451_v24, %v3451_v24 }
  0x45   :  { %v1071_v56 = vshrl.u32 %v7462_v63, 16  ;;  %v1076_v1 = vshrl.u32 %v195_v0, 16  ;;  %v1817_v25 = vmax.bf16 %v1066_v2, %v187_v59  ;;  %v7470_v37 = vrot.slane %v3262_v3, %v7152_v16 }
  0x46   :  { %v1061_v31 = vshrl.u32 %v172_v26, 16  ;;  %v1814_v20 = vmax.bf16 %v1051_v9, %v170_v13  ;;  %v1815_v36 = vmax.bf16 %v1056_v10, %v171_v23  ;;  %3558 = vrot.lane.b32.xlu1 %v7466_v14, %s7079_s10  ;;  %v3435_v23 = vsel %vm3097_vm1, %v3434_v49, %v3433_v62 }
  0x47   :  { %v1818_v30 = vmax.bf16 %v1071_v56, %v7462_v63  ;;  %v1819_v41 = vmax.bf16 %v1076_v1, %v195_v0  ;;  %v2075_v44 = vrot.slane %v1817_v25, %v7152_v16  ;;  %v3411_v59 = vunpack.c.l.b16 %v7470_v37 }
  0x48   :  { %v1816_v39 = vmax.bf16 %v1061_v31, %v172_v26  ;;  %v2033_v54 = vrot.slane %v1814_v20, %v7152_v16  ;;  %v2047_v58 = vrot.slane %v1815_v36, %v7152_v16  ;;  %v3436_v24 = vrot.slane %v7276_v8, 5 }
  0x49   :  { %v2082_v60 = vrot.slane %v2075_v44, %v7152_v16  ;;  %v2089_v61 = vrot.slane %v1818_v30, %v7152_v16  ;;  %v3248_v13 = vrot.slane %v1819_v41, %v7152_v16  ;;  %v3438_v56 = vrot.slane %v7282_v11, 4 }
  0x4a   :  { %v7485_v0 = vrot.slane %v2033_v54, %v7152_v16  ;;  %v2054_v2 = vrot.slane %v2047_v58, %v7152_v16  ;;  %v2061_v3 = vrot.slane %v1816_v39, %v7152_v16  ;;  %v3437_v31 = vsel %vm3100_vm2, %v3436_v24, %v3435_v23 }
  0x4b   :  { %v2096_v26 = vrot.slane %v2089_v61, %v7152_v16  ;;  %v7491_v9 = vunpack.c.l.b16 %v2082_v60  ;;  %v3255_v10 = vrot.slane %v3248_v13, %v7152_v16  ;;  %v3439_v30 = vsel %vm3103_vm3, %v3438_v56, %v3437_v31 }
  0x4c   :  { %v2068_v1 = vrot.slane %v2061_v3, %v7152_v16  ;;  %v3022_v62 = vunpack.c.l.b16 %v7485_v0  ;;  %v7497_v25 = vunpack.c.l.b16 %v2054_v2  ;;  %v3440_v39 = vrot.slane %v3411_v59, 3 }
  0x4d   :  { %v7500_v20 = vunpack.c.l.b16 %v2096_v26  ;;  %v3410_v36 = vunpack.c.l.b16 %v3255_v10  ;;  %v3426_v49 = vrot.slane %v7491_v9, 5  ;;  %v339_v60 = vcombine.high %v7299_v32, %v7299_v32 }
  0x4e   :  { %v7503_v41 = vunpack.c.l.b16 %v2068_v1  ;;  %v3422_v44 = vrot.slane %v7497_v25, 7  ;;  %v3452_v61 = vrot.slane %v7342_v17, 7  ;;  %v3441_v2 = vsel %vm3106_vm4, %v3440_v39, %v3439_v30 }
  0x4f   :  { %v3428_v54 = vrot.slane %v7500_v20, 4  ;;  %v3430_v58 = vrot.slane %v3410_v36, 3  ;;  %v3454_v3 = vrot.slane %v7346_v21, 6  ;;  %v3543_v24 = vpack.c.b16 %v3441_v2, %v3441_v2 }
  0x50   :  { %v3423_v13 = vsel %vm3094_vm0, %v3422_v44, %v3022_v62  ;;  %v3424_v23 = vrot.slane %v7503_v41, 6  ;;  %v1196_v26 = vshrl.u32 %v339_v60, 16  ;;  %v3453_v10 = vsel %vm3094_vm0, %v3452_v61, %v3040_v15 }
  0x51   :  { %v3456_v32 = vrot.slane %v7344_v18, 5  ;;  %v3455_v1 = vsel %vm3097_vm1, %v3454_v3, %v3453_v10  ;;  %v3458_v31 = vrot.slane %v7348_v22, 4  ;;  %v196_v44 = vcombine.high %v7462_v63, %v7462_v63  ;;  %4218 = vrot.lane.b32.xlu1 %v3543_v24, %s7080_s11 }
  0x52   :  { %v3425_v56 = vsel %vm3097_vm1, %v3424_v23, %v3423_v13  ;;  %v1843_v39 = vmax.bf16 %v1196_v26, %v339_v60  ;;  %v3770_v15 = vrot.slane %v7503_v41, 7  ;;  %v3772_v2 = vrot.slane %v7491_v9, 6 }
  0x53   :  { %v3427_v30 = vsel %vm3100_vm2, %v3426_v49, %v3425_v56  ;;  %v3457_v34 = vsel %vm3100_vm2, %v3456_v32, %v3455_v1  ;;  %v1081_v23 = vshrl.u32 %v196_v44, 16  ;;  %v3774_v60 = vrot.slane %v7500_v20, 5 }
  0x54   :  { %v3429_v61 = vsel %vm3103_vm3, %v3428_v54, %v3427_v30  ;;  %v3459_v13 = vsel %vm3103_vm3, %v3458_v31, %v3457_v34  ;;  %v3290_v63 = vrot.slane %v1843_v39, %v7152_v16  ;;  %v3771_v49 = vsel %vm3094_vm0, %v3770_v15, %v7497_v25 }
  0x55   :  { %v3431_v3 = vsel %vm3106_vm4, %v3430_v58, %v3429_v61  ;;  %v1820_v10 = vmax.bf16 %v1081_v23, %v196_v44  ;;  %v3773_v32 = vsel %vm3097_vm1, %v3772_v2, %v3771_v49  ;;  %v3776_v56 = vrot.slane %v3410_v36, 4 }
  0x56   :  { %v3542_v26 = vpack.c.b16 %v3431_v3, %v3431_v3  ;;  %v3297_v54 = vrot.slane %v3290_v63, %v7152_v16  ;;  %v3775_v1 = vsel %vm3100_vm2, %v3774_v60, %v3773_v32  ;;  %v244_v31 = vcombine.high %v7212_v51, %v7212_v51 }
  0x57   :  { %v3780_v58 = vrot.slane %v7272_v5, 7  ;;  %v3596_v30 = vrot.slane %v1820_v10, %v7152_v16  ;;  %v3777_v39 = vsel %vm3103_vm3, %v3776_v56, %v3775_v1  ;;  %v3782_v44 = vrot.slane %v7276_v8, 6 }
  0x58   :  { %3554 = vrot.lane.b32.xlu0 %v3542_v26, %s7079_s10  ;;  %v3784_v34 = vrot.slane %v7282_v11, 5  ;;  %v3413_v36 = vunpack.c.l.b16 %v3297_v54  ;;  %v1121_v15 = vshrl.u32 %v244_v31, 16  ;;  %v3786_v51 = vrot.slane %v3411_v59, 4 }
  0x59   :  { %v3781_v61 = vsel %vm3094_vm0, %v3780_v58, %v7270_v4  ;;  %v3603_v5 = vrot.slane %v3596_v30, %v7152_v16  ;;  %v292_v2 = vcombine.high %v7207_v46, %v7207_v46  ;;  %v3790_v3 = vrot.slane %v7241_v38, 7 }
  0x5a   :  { %v3783_v23 = vsel %vm3097_vm1, %v3782_v44, %v3781_v61  ;;  %v3460_v8 = vrot.slane %v3413_v36, 3  ;;  %v1828_v63 = vmax.bf16 %v1121_v15, %v244_v31  ;;  %v3792_v49 = vrot.slane %v7231_v19, 6 }
  0x5b   :  { %v3785_v11 = vsel %vm3100_vm2, %v3784_v34, %v3783_v23  ;;  %v3758_v4 = vunpack.c.l.b16 %v3603_v5  ;;  %v1161_v59 = vshrl.u32 %v292_v2, 16  ;;  %v3791_v60 = vsel %vm3094_vm0, %v3790_v3, %v7236_v27 }
  0x5c   :  { %3556 = vrot.lane.b32.xlu0 %v3543_v24, %s7079_s10  ;;  %v3787_v37 = vsel %vm3103_vm3, %v3786_v51, %v3785_v11  ;;  %v3461_v26 = vsel %vm3106_vm4, %v3460_v8, %v3459_v13  ;;  %v3610_v46 = vrot.slane %v1828_v63, %v7152_v16  ;;  %v3793_v38 = vsel %vm3097_vm1, %v3792_v49, %v3791_v60 }
  0x5d   :  { %v3794_v10 = vrot.slane %v7238_v28, 5  ;;  %v7570_v32 = vpack.c.b16 %v3461_v26, %v3461_v26  ;;  %v3778_v19 = vrot.slane %v3758_v4, 3  ;;  %v1836_v56 = vmax.bf16 %v1161_v59, %v292_v2 }
  0x5e   :  { %v3796_v24 = vrot.slane %v3412_v43, 4  ;;  %v3617_v54 = vrot.slane %v3610_v46, %v7152_v16  ;;  %v340_v27 = vcombine.high %v7303_v40, %v7303_v40  ;;  %v3800_v13 = vrot.slane %v7346_v21, 7  ;;  %v41_v46 = vld [vmem:[%s9389_s0 + $0x50] sm:$0xf] }
  0x5f   :  { %v3795_v1 = vsel %vm3100_vm2, %v3794_v10, %v3793_v38  ;;  %4222 = vrot.lane.b32.xlu1 %v7570_v32, %s7080_s11  ;;  %v3779_v28 = vsel %vm3106_vm4, %v3778_v19, %v3777_v39  ;;  %v3624_v29 = vrot.slane %v1836_v56, %v7152_v16  ;;  %v3802_v31 = vrot.slane %v7344_v18, 6  ;;  %v44_v56 = vld [vmem:[%s9389_s0 + $0x5c] sm:$0xf] }
  0x60   :  { %4220 = vrot.lane.b32.xlu0 %v7466_v14, %s7080_s11  ;;  %v3797_v43 = vsel %vm3103_vm3, %v3796_v24, %v3795_v1  ;;  %v3890_v58 = vpack.c.b16 %v3779_v28, %v3779_v28  ;;  %v3759_v30 = vunpack.c.l.b16 %v3617_v54  ;;  %v1201_v44 = vshrl.u32 %v340_v27, 16 }
  0x61   :  { %v3801_v40 = vsel %vm3094_vm0, %v3800_v13, %v7342_v17  ;;  %v3631_v21 = vrot.slane %v3624_v29, %v7152_v16  ;;  %v3804_v15 = vrot.slane %v7348_v22, 5  ;;  %v3806_v61 = vrot.slane %v3413_v36, 4 }
  0x62   :  { %v3803_v34 = vsel %vm3097_vm1, %v3802_v31, %v3801_v40  ;;  %v3788_v39 = vrot.slane %v3759_v30, 3  ;;  %v1844_v51 = vmax.bf16 %v1201_v44, %v340_v27  ;;  %v387_v5 = vcombine.high %v7355_v42, %v7355_v42  ;;  %v7647_v31 = vld [vmem:[%s9389_s0 + $0x64] sm:$0xf] }
  0x63   :  { %v3462_v18 = vrot.slane %v7393_v48, 7  ;;  %3902 = vrot.lane.b32.xlu1 %v3890_v58, %s7081_s12  ;;  %v3760_v23 = vunpack.c.l.b16 %v3631_v21  ;;  %v3805_v17 = vsel %vm3100_vm2, %v3804_v15, %v3803_v34  ;;  %v3464_v2 = vrot.slane %v7395_v33, 6  ;;  %v7652_v58 = vld [vmem:[%s9389_s0 + $0x6c] sm:$0xf] }
  0x64   :  { %v3466_v3 = vrot.slane %v7400_v50, 5  ;;  %v3789_v22 = vsel %vm3106_vm4, %v3788_v39, %v3787_v37  ;;  %v3638_v36 = vrot.slane %v1844_v51, %v7152_v16  ;;  %v3807_v8 = vsel %vm3103_vm3, %v3806_v61, %v3805_v17 }
  0x65   :  { %v1236_v63 = vshrl.u32 %v387_v5, 16  ;;  %v3891_v42 = vpack.c.b16 %v3789_v22, %v3789_v22  ;;  %v3798_v11 = vrot.slane %v3760_v23, 3  ;;  %v3463_v49 = vsel %vm3094_vm0, %v3462_v18, %v3046_v45 }
  0x66   :  { %v3468_v4 = vrot.slane %v7402_v53, 4  ;;  %v3645_v59 = vrot.slane %v3638_v36, %v7152_v16  ;;  %v3465_v26 = vsel %vm3097_vm1, %v3464_v2, %v3463_v49  ;;  %v388_v37 = vcombine.high %v7360_v47, %v7360_v47  ;;  %v42_v47 = vld [vmem:[%s9389_s0 + $0x54] sm:$0xf] }
  0x67   :  { %v1851_v60 = vmax.bf16 %v1236_v63, %v387_v5  ;;  %3904 = vrot.lane.b32.xlu0 %v3891_v42, %s7081_s12  ;;  %v3799_v45 = vsel %vm3106_vm4, %v3798_v11, %v3797_v43  ;;  %v3467_v38 = vsel %vm3100_vm2, %v3466_v3, %v3465_v26  ;;  %v3810_v10 = vrot.slane %v7395_v33, 7  ;;  %v7634_v33 = vld [vmem:[%s9389_s0 + $0x60] sm:$0xf] }
  0x68   :  { %v3812_v19 = vrot.slane %v7400_v50, 6  ;;  %v7627_v24 = vpack.c.b16 %v3799_v45, %v3799_v45  ;;  %v3761_v54 = vunpack.c.l.b16 %v3645_v59  ;;  %v3469_v27 = vsel %vm3103_vm3, %v3468_v4, %v3467_v38  ;;  %v7639_v50 = vld [vmem:[%s9389_s0 + $0x68] sm:$0xf] }
  0x69   :  { %v3304_v1 = vrot.slane %v1851_v60, %v7152_v16  ;;  %v1241_v13 = vshrl.u32 %v388_v37, 16  ;;  %v3811_v28 = vsel %vm3094_vm0, %v3810_v10, %v7393_v48  ;;  %v3814_v29 = vrot.slane %v7402_v53, 5 }
  0x6a   :  { %v95_v43 = vmax.bf16 %v43_v35, %v41_v46  ;;  %3906 = vrot.lane.b32.xlu1 %v7627_v24, %s7081_s12  ;;  %v3808_v30 = vrot.slane %v3761_v54, 3  ;;  %v3813_v48 = vsel %vm3097_vm1, %v3812_v19, %v3811_v28  ;;  %v96_v53 = vmax.bf16 %v44_v56, %v42_v47 }
  0x6b   :  { %v3311_v44 = vrot.slane %v3304_v1, %v7152_v16  ;;  %4296 = vrot.lane.b32.xlu0 %v3891_v42, %s7082_s6  ;;  %v1852_v40 = vmax.bf16 %v1241_v13, %v388_v37  ;;  %v3815_v21 = vsel %vm3100_vm2, %v3814_v29, %v3813_v48  ;;  %v97_v15 = vmax.bf16 %v7639_v50, %v7634_v33 }
  0x6c   :  { %v395_v34 = vrot.slane %v95_v43, %v7152_v16  ;;  %v3809_v61 = vsel %vm3106_vm4, %v3808_v30, %v3807_v8  ;;  %v419_v51 = vrot.slane %v96_v53, %v7152_v16  ;;  %v98_v5 = vmax.bf16 %v7652_v58, %v7647_v31 }
  0x6d   :  { %v3414_v39 = vunpack.c.l.b16 %v3311_v44  ;;  %v7667_v18 = vpack.c.b16 %v3809_v61, %v3809_v61  ;;  %v3652_v23 = vrot.slane %v1852_v40, %v7152_v16  ;;  %vm4751_vm6 = vcmask 64512  }
  0x6e   :  { %v396_v17 = vcombine.high %v395_v34, %v395_v34  ;;  %v403_v2 = vrot.slane %v395_v34, %v7152_v16  ;;  %4298 = vrot.lane.b32.xlu1 %v7627_v24, %s7082_s6  ;;  %v420_v36 = vcombine.high %v419_v51, %v419_v51  ;;  %v427_v8 = vrot.slane %v419_v51, %v7152_v16 }
  0x6f   :  { %v3470_v3 = vrot.slane %v3414_v39, 3  ;;  %v3816_v22 = vrot.slane %v3414_v39, 4  ;;  %4300 = vrot.lane.b32.xlu0 %v7667_v18, %s7082_s6  ;;  %v3659_v63 = vrot.slane %v3652_v23, %v7152_v16  ;;  %v467_v50 = vrot.slane %v98_v5, %v7152_v16 }
  0x70   :  { %v410_v42 = vrot.slane %v396_v17, %v7152_v16  ;;  %v411_v11 = vcombine.high %v403_v2, %v403_v2  ;;  %v1246_v49 = vshrl.u32 %v403_v2, 16  ;;  %v434_v60 = vrot.slane %v420_v36, %v7152_v16 }
  0x71   :  { %v3471_v4 = vsel %vm3106_vm4, %v3470_v3, %v3469_v27  ;;  %v3817_v59 = vsel %vm3103_vm3, %v3816_v22, %v3815_v21  ;;  %v435_v26 = vcombine.high %v427_v8, %v427_v8  ;;  %v3762_v46 = vunpack.c.l.b16 %v3659_v63 }
  0x72   :  { %v7681_v37 = vpack.c.b16 %v3471_v4, %v3471_v4  ;;  %v412_v35 = vcombine.high %v410_v42, %v410_v42  ;;  %v1251_v45 = vshrl.u32 %v410_v42, 16  ;;  %4614 = vrot.lane.b32.xlu1 %v7570_v32, %s7083_s7  ;;  %v1256_v38 = vshrl.u32 %v411_v11, 16 }
  0x73   :  { %v1266_v10 = vshrl.u32 %v427_v8, 16  ;;  %v1271_v19 = vshrl.u32 %v434_v60, 16  ;;  %v1276_v47 = vshrl.u32 %v435_v26, 16  ;;  %4612 = vrot.lane.b32.xlu0 %v7466_v14, %s7083_s7  ;;  %v3818_v56 = vrot.slane %v3762_v46, 3 }
  0x74   :  { %v1261_v54 = vshrl.u32 %v412_v35, 16  ;;  %v1854_v1 = vmax.bf16 %v1251_v45, %v410_v42  ;;  %v436_v27 = vcombine.high %v434_v60, %v434_v60  ;;  %v1855_v13 = vmax.bf16 %v1256_v38, %v411_v11 }
  0x75   :  { %v1857_v28 = vmax.bf16 %v1266_v10, %v427_v8  ;;  %v1858_v29 = vmax.bf16 %v1271_v19, %v434_v60  ;;  %v1859_v43 = vmax.bf16 %v1276_v47, %v435_v26  ;;  %v3819_v30 = vsel %vm3106_vm4, %v3818_v56, %v3817_v59 }
  0x76   :  { %v1856_v44 = vmax.bf16 %v1261_v54, %v412_v35  ;;  %v2453_v48 = vrot.slane %v1854_v1, %v7152_v16  ;;  %v1281_v53 = vshrl.u32 %v436_v27, 16  ;;  %4690 = vrot.lane.b32.xlu1 %v7627_v24, %s7084_s8  ;;  %v7691_v40 = vpack.c.b16 %v3819_v30, %v3819_v30 }
  0x77   :  { %v2467_v14 = vrot.slane %v1855_v13, %v7152_v16  ;;  %v2495_v21 = vrot.slane %v1857_v28, %v7152_v16  ;;  %v2509_v34 = vrot.slane %v1858_v29, %v7152_v16  ;;  %4616 = vrot.lane.b32.xlu0 %v7681_v37, %s7083_s7  ;;  %v3318_v51 = vrot.slane %v1859_v43, %v7152_v16 }
  0x78   :  { %v2460_v61 = vrot.slane %v2453_v48, %v7152_v16  ;;  %v2481_v39 = vrot.slane %v1856_v44, %v7152_v16  ;;  %v1860_v23 = vmax.bf16 %v1281_v53, %v436_v27  ;;  %v1853_v22 = vmax.bf16 %v1246_v49, %v403_v2 }
  0x79   :  { %v2474_v24 = vrot.slane %v2467_v14, %v7152_v16  ;;  %v2502_v17 = vrot.slane %v2495_v21, %v7152_v16  ;;  %v2516_v3 = vrot.slane %v2509_v34, %v7152_v16  ;;  %v3325_v63 = vrot.slane %v3318_v51, %v7152_v16 }
  0x7a   :  { %v2488_v36 = vrot.slane %v2481_v39, %v7152_v16  ;;  %v3052_v8 = vunpack.c.l.b16 %v2460_v61  ;;  %v3666_v42 = vrot.slane %v1860_v23, %v7152_v16  ;;  %4694 = vrot.lane.b32.xlu1 %v7691_v40, %s7084_s8  ;;  %v2439_v60 = vrot.slane %v1853_v22, %v7152_v16  ;;  %v7742_v22 = vld [vmem:[%s9389_s0 + $0x78] sm:$0xf] }
  0x7b   :  { %v3053_v11 = vunpack.c.l.b16 %v2474_v24  ;;  %v3055_v4 = vunpack.c.l.b16 %v2502_v17  ;;  %v3056_v59 = vunpack.c.l.b16 %v2516_v3  ;;  %4692 = vrot.lane.b32.xlu0 %v7667_v18, %s7084_s8  ;;  %v3415_v2 = vunpack.c.l.b16 %v3325_v63  ;;  %v7737_v3 = vld [vmem:[%s9389_s0 + $0x70] sm:$0xf] }
  0x7c   :  { %v3054_v26 = vunpack.c.l.b16 %v2488_v36  ;;  %v3673_v49 = vrot.slane %v3666_v42, %v7152_v16  ;;  %v3148_v46 = vrot.slane %v3052_v8, 7  ;;  %v2446_v28 = vrot.slane %v2439_v60, %v7152_v16 }
  0x7d   :  { %v3472_v35 = vrot.slane %v3053_v11, 7  ;;  %v3476_v45 = vrot.slane %v3055_v4, 5  ;;  %v3478_v38 = vrot.slane %v3056_v59, 4  ;;  %v3822_v10 = vrot.slane %v3055_v4, 6 }
  0x7e   :  { %v3474_v19 = vrot.slane %v3054_v26, 6  ;;  %v3480_v47 = vrot.slane %v3415_v2, 3  ;;  %v3763_v56 = vunpack.c.l.b16 %v3673_v49  ;;  %v3820_v54 = vrot.slane %v3054_v26, 7  ;;  %3562 = vrot.lane.b32.xlu1 %v7681_v37, %s7079_s10 }
  0x7f   :  { %v3473_v1 = vsel %vm3094_vm0, %v3472_v35, %v3052_v8  ;;  %v3824_v27 = vrot.slane %v3056_v59, 5  ;;  %v3826_v13 = vrot.slane %v3415_v2, 4  ;;  %3560 = vrot.lane.b32.xlu0 %v7570_v32, %s7079_s10  ;;  %v3150_v44 = vrot.slane %v3053_v11, 6 }
  0x80   :  { %v3475_v29 = vsel %vm3097_vm1, %v3474_v19, %v3473_v1  ;;  %v3821_v43 = vsel %vm3094_vm0, %v3820_v54, %v3053_v11  ;;  %v3828_v30 = vrot.slane %v3763_v56, 3  ;;  %v3051_v14 = vunpack.c.l.b16 %v2446_v28 }
  0x81   :  { %v3477_v48 = vsel %vm3100_vm2, %v3476_v45, %v3475_v29  ;;  %v3823_v53 = vsel %vm3097_vm1, %v3822_v10, %v3821_v43  ;;  %v3152_v21 = vrot.slane %v3054_v26, 5  ;;  %v3154_v39 = vrot.slane %v3055_v4, 4 }
  0x82   :  { %v3479_v34 = vsel %vm3103_vm3, %v3478_v38, %v3477_v48  ;;  %v3825_v61 = vsel %vm3100_vm2, %v3824_v27, %v3823_v53  ;;  %v3156_v51 = vrot.slane %v3056_v59, 3  ;;  %3910 = vrot.lane.b32.xlu1 %v7691_v40, %s7081_s12  ;;  %v3149_v24 = vsel %vm3094_vm0, %v3148_v46, %v3051_v14 }
  0x83   :  { %v3481_v32 = vsel %vm3106_vm4, %v3480_v47, %v3479_v34  ;;  %v3827_v23 = vsel %vm3103_vm3, %v3826_v13, %v3825_v61  ;;  %v443_v17 = vrot.slane %v97_v15, %v7152_v16  ;;  %3908 = vrot.lane.b32.xlu0 %v7667_v18, %s7081_s12  ;;  %v3151_v33 = vsel %vm3097_vm1, %v3150_v44, %v3149_v24  ;;  %v52_v24 = vld [vmem:[%s9389_s0 + $0x7c] sm:$0xf] }
  0x84   :  { %v7746_v36 = vpack.c.b16 %v3481_v32, %v3481_v32  ;;  %v3829_v8 = vsel %vm3106_vm4, %v3828_v30, %v3827_v23  ;;  %v3153_v63 = vsel %vm3100_vm2, %v3152_v21, %v3151_v33  ;;  %v468_v4 = vcombine.high %v467_v50, %v467_v50  ;;  %v50_v23 = vld [vmem:[%s9389_s0 + $0x74] sm:$0xf] }
  0x85   :  { %v7754_v15 = vpack.c.b16 %v3829_v8, %v3829_v8  ;;  %v444_v42 = vcombine.high %v443_v17, %v443_v17  ;;  %v451_v11 = vrot.slane %v443_v17, %v7152_v16  ;;  %v3155_v18 = vsel %vm3103_vm3, %v3154_v39, %v3153_v63 }
  0x86   :  { %v475_v59 = vrot.slane %v467_v50, %v7152_v16  ;;  %v99_v60 = vmax.bf16 %v7742_v22, %v7737_v3  ;;  %4146 = vrot.lane.b32.xlu1 %v7448_v57, %s7077_s25  ;;  %v3157_v31 = vsel %vm3106_vm4, %v3156_v51, %v3155_v18  ;;  %v482_v49 = vrot.slane %v468_v4, %v7152_v16 }
  0x87   :  { %v458_v58 = vrot.slane %v444_v42, %v7152_v16  ;;  %v459_v5 = vcombine.high %v451_v11, %v451_v11  ;;  %v1286_v26 = vshrl.u32 %v451_v11, 16  ;;  %3564 = vrot.lane.b32.xlu0 %v7746_v36, %s7079_s10  ;;  %v7768_v2 = vpack.c.b16 %v3157_v31, %v3157_v31 }
  0x88   :  { %v1306_v46 = vshrl.u32 %v475_v59, 16  ;;  %v483_v35 = vcombine.high %v475_v59, %v475_v59  ;;  %v1311_v47 = vshrl.u32 %v482_v49, 16  ;;  %v484_v1 = vcombine.high %v482_v49, %v482_v49 }
  0x89   :  { %v460_v45 = vcombine.high %v458_v58, %v458_v58  ;;  %v1291_v38 = vshrl.u32 %v458_v58, 16  ;;  %v1296_v10 = vshrl.u32 %v459_v5, 16  ;;  %v1861_v19 = vmax.bf16 %v1286_v26, %v451_v11 }
  0x8a   :  { %v1865_v56 = vmax.bf16 %v1306_v46, %v475_v59  ;;  %v1316_v54 = vshrl.u32 %v483_v35, 16  ;;  %3912 = vrot.lane.b32.xlu1 %v7754_v15, %s7081_s12  ;;  %v1866_v43 = vmax.bf16 %v1311_v47, %v482_v49  ;;  %v1321_v48 = vshrl.u32 %v484_v1, 16 }
  0x8b   :  { %v1301_v27 = vshrl.u32 %v460_v45, 16  ;;  %v1862_v13 = vmax.bf16 %v1291_v38, %v458_v58  ;;  %v1863_v28 = vmax.bf16 %v1296_v10, %v459_v5  ;;  %v3944_v29 = vrot.slane %v1861_v19, %v7152_v16  ;;  %4148 = vrot.lane.b32.xlu0 %v7768_v2, %s7077_s25 }
  0x8c   :  { %v4000_v30 = vrot.slane %v1865_v56, %v7152_v16  ;;  %v1867_v44 = vmax.bf16 %v1316_v54, %v483_v35  ;;  %v4014_v39 = vrot.slane %v1866_v43, %v7152_v16  ;;  %v1868_v32 = vmax.bf16 %v1321_v48, %v484_v1 }
  0x8d   :  { %v1864_v53 = vmax.bf16 %v1301_v27, %v460_v45  ;;  %v3951_v14 = vrot.slane %v3944_v29, %v7152_v16  ;;  %v3958_v21 = vrot.slane %v1862_v13, %v7152_v16  ;;  %v3972_v34 = vrot.slane %v1863_v28, %v7152_v16 }
  0x8e   :  { %v4007_v61 = vrot.slane %v4000_v30, %v7152_v16  ;;  %v4172_v51 = vrot.slane %v1867_v44, %v7152_v16  ;;  %4226 = vrot.lane.b32.xlu1 %v7746_v36, %s7080_s11  ;;  %v4021_v63 = vrot.slane %v4014_v39, %v7152_v16  ;;  %v4250_v18 = vrot.slane %v1868_v32, %v7152_v16 }
  0x8f   :  { %v3965_v17 = vrot.slane %v3958_v21, %v7152_v16  ;;  %v3979_v8 = vrot.slane %v3972_v34, %v7152_v16  ;;  %v3986_v33 = vrot.slane %v1864_v53, %v7152_v16  ;;  %v4106_v50 = vunpack.c.l.b16 %v3951_v14  ;;  %4224 = vrot.lane.b32.xlu0 %v7681_v37, %s7080_s11 }
  0x90   :  { %v4110_v42 = vunpack.c.l.b16 %v4007_v61  ;;  %v4179_v11 = vrot.slane %v4172_v51, %v7152_v16  ;;  %v100_v58 = vmax.bf16 %v52_v24, %v50_v23  ;;  %v4111_v5 = vunpack.c.l.b16 %v4021_v63  ;;  %v57_v24 = vld [vmem:[%s9389_s0 + $0x90] sm:$0xf] }
  0x91   :  { %v3993_v4 = vrot.slane %v3986_v33, %v7152_v16  ;;  %v4107_v59 = vunpack.c.l.b16 %v3965_v17  ;;  %v4108_v31 = vunpack.c.l.b16 %v3979_v8  ;;  %v4257_v56 = vrot.slane %v4250_v18, %v7152_v16  ;;  %v59_v17 = vld [vmem:[%s9389_s0 + $0x98] sm:$0xf]  ;;  %v60_v18 = vld [vmem:[%s9389_s0 + $0x9c] sm:$0xf] }
  0x92   :  { %v4124_v26 = vrot.slane %v4110_v42, 4  ;;  %v4194_v49 = vunpack.c.l.b16 %v4179_v11  ;;  %v4200_v46 = vrot.slane %v4110_v42, 5  ;;  %4302 = vrot.lane.b32.xlu1 %v7691_v40, %s7082_s6  ;;  %v4126_v10 = vrot.slane %v4111_v5, 3  ;;  %v58_v11 = vld [vmem:[%s9389_s0 + $0x94] sm:$0xf] }
  0x93   :  { %v4109_v37 = vunpack.c.l.b16 %v3993_v4  ;;  %v4118_v35 = vrot.slane %v4107_v59, 7  ;;  %v4120_v45 = vrot.slane %v4108_v31, 6  ;;  %v4196_v38 = vrot.slane %v4108_v31, 7 }
  0x94   :  { %v4202_v19 = vrot.slane %v4111_v5, 4  ;;  %v4204_v47 = vrot.slane %v4194_v49, 3  ;;  %v4272_v29 = vunpack.c.l.b16 %v4257_v56  ;;  %v4276_v40 = vrot.slane %v4110_v42, 6 }
  0x95   :  { %v4119_v54 = vsel %vm3094_vm0, %v4118_v35, %v4106_v50  ;;  %v4122_v1 = vrot.slane %v4109_v37, 5  ;;  %v4197_v27 = vsel %vm3094_vm0, %v4196_v38, %v4107_v59  ;;  %v4198_v13 = vrot.slane %v4109_v37, 6 }
  0x96   :  { %v4121_v28 = vsel %vm3097_vm1, %v4120_v45, %v4119_v54  ;;  %v4274_v43 = vrot.slane %v4109_v37, 7  ;;  %v4278_v48 = vrot.slane %v4111_v5, 5  ;;  %v4280_v53 = vrot.slane %v4194_v49, 4 }
  0x97   :  { %v4123_v30 = vsel %vm3100_vm2, %v4122_v1, %v4121_v28  ;;  %v4199_v44 = vsel %vm3097_vm1, %v4198_v13, %v4197_v27  ;;  %v4282_v61 = vrot.slane %v4272_v29, 3  ;;  %v491_v23 = vrot.slane %v99_v60, %v7152_v16 }
  0x98   :  { %v4125_v14 = vsel %vm3103_vm3, %v4124_v26, %v4123_v30  ;;  %v4201_v21 = vsel %vm3100_vm2, %v4200_v46, %v4199_v44  ;;  %v4275_v34 = vsel %vm3094_vm0, %v4274_v43, %v4108_v31  ;;  %v515_v63 = vrot.slane %v100_v58, %v7152_v16 }
  0x99   :  { %v4127_v39 = vsel %vm3106_vm4, %v4126_v10, %v4125_v14  ;;  %v4203_v51 = vsel %vm3103_vm3, %v4202_v19, %v4201_v21  ;;  %v4277_v32 = vsel %vm3097_vm1, %v4276_v40, %v4275_v34  ;;  %v492_v22 = vcombine.high %v491_v23, %v491_v23 }
  0x9a   :  { %v4138_v8 = vpack.c.b16 %v4127_v39, %v4127_v39  ;;  %v4205_v33 = vsel %vm3106_vm4, %v4204_v47, %v4203_v51  ;;  %v4279_v50 = vsel %vm3100_vm2, %v4278_v48, %v4277_v32  ;;  %v499_v60 = vrot.slane %v491_v23, %v7152_v16 }
  0x9b   :  { %v7827_v42 = vpack.c.b16 %v4205_v33, %v4205_v33  ;;  %v4281_v3 = vsel %vm3103_vm3, %v4280_v53, %v4279_v50  ;;  %v516_v59 = vcombine.high %v515_v63, %v515_v63  ;;  %v7840_v31 = vrot.slane %v515_v63, %v7152_v16 }
  0x9c   :  { %4150 = vrot.lane.b32.xlu0 %v4138_v8, %s7077_s25  ;;  %v4283_v4 = vsel %vm3106_vm4, %v4282_v61, %v4281_v3  ;;  %v103_v58 = vmax.bf16 %v59_v17, %v57_v24  ;;  %v506_v26 = vrot.slane %v492_v22, %v7152_v16  ;;  %v507_v49 = vcombine.high %v499_v60, %v499_v60 }
  0x9d   :  { %4228 = vrot.lane.b32.xlu1 %v7827_v42, %s7080_s11  ;;  %v7844_v5 = vpack.c.b16 %v4283_v4, %v4283_v4  ;;  %v1326_v46 = vshrl.u32 %v499_v60, 16  ;;  %v7848_v37 = vrot.slane %v516_v59, %v7152_v16  ;;  %v1346_v35 = vshrl.u32 %v7840_v31, 16 }
  0x9e   :  { %v104_v45 = vmax.bf16 %v60_v18, %v58_v11  ;;  %v587_v38 = vrot.slane %v103_v58, %v7152_v16  ;;  %v508_v10 = vcombine.high %v506_v26, %v506_v26  ;;  %v1331_v19 = vshrl.u32 %v506_v26, 16 }
  0x9f   :  { %v1336_v47 = vshrl.u32 %v507_v49, 16  ;;  %v1869_v56 = vmax.bf16 %v1326_v46, %v499_v60  ;;  %v1351_v54 = vshrl.u32 %v7848_v37, 16  ;;  %v1873_v1 = vmax.bf16 %v1346_v35, %v7840_v31 }
  0xa0   :  { %4304 = vrot.lane.b32.xlu0 %v7754_v15, %s7082_s6  ;;  %v588_v27 = vcombine.high %v587_v38, %v587_v38  ;;  %v7857_v13 = vrot.slane %v587_v38, %v7152_v16  ;;  %v1341_v28 = vshrl.u32 %v508_v10, 16  ;;  %v1870_v29 = vmax.bf16 %v1331_v19, %v506_v26 }
  0xa1   :  { %4542 = vrot.lane.b32.xlu1 %v4138_v8, %s7078_s26  ;;  %v1871_v43 = vmax.bf16 %v1336_v47, %v507_v49  ;;  %v4338_v40 = vrot.slane %v1869_v56, %v7152_v16  ;;  %v1874_v30 = vmax.bf16 %v1351_v54, %v7848_v37  ;;  %v4394_v44 = vrot.slane %v1873_v1, %v7152_v16 }
  0xa2   :  { %v602_v48 = vrot.slane %v588_v27, %v7152_v16  ;;  %v603_v53 = vcombine.high %v7857_v13, %v7857_v13  ;;  %v1872_v14 = vmax.bf16 %v1341_v28, %v508_v10  ;;  %v4352_v34 = vrot.slane %v1870_v29, %v7152_v16 }
  0xa3   :  { %v4345_v21 = vrot.slane %v4338_v40, %v7152_v16  ;;  %v4366_v61 = vrot.slane %v1871_v43, %v7152_v16  ;;  %v4401_v39 = vrot.slane %v4394_v44, %v7152_v16  ;;  %v4408_v51 = vrot.slane %v1874_v30, %v7152_v16 }
  0xa4   :  { %4540 = vrot.lane.b32.xlu0 %v7768_v2, %s7078_s26  ;;  %v604_v32 = vcombine.high %v602_v48, %v602_v48  ;;  %v611_v23 = vrot.slane %v104_v45, %v7152_v16  ;;  %v7877_v24 = vrot.slane %v4352_v34, %v7152_v16  ;;  %v4380_v8 = vrot.slane %v1872_v14, %v7152_v16 }
  0xa5   :  { %4618 = vrot.lane.b32.xlu1 %v7746_v36, %s7083_s7  ;;  %v4373_v17 = vrot.slane %v4366_v61, %v7152_v16  ;;  %v4500_v33 = vunpack.c.l.b16 %v4345_v21  ;;  %v4415_v50 = vrot.slane %v4408_v51, %v7152_v16  ;;  %v7882_v63 = vunpack.c.l.b16 %v4401_v39 }
  0xa6   :  { %v612_v3 = vcombine.high %v611_v23, %v611_v23  ;;  %v619_v22 = vrot.slane %v611_v23, %v7152_v16  ;;  %v4387_v60 = vrot.slane %v4380_v8, %v7152_v16  ;;  %v4501_v11 = vunpack.c.l.b16 %v7877_v24  ;;  %v54_v8 = vld [vmem:[%s9389_s0 + $0x84] sm:$0xf] }
  0xa7   :  { %v7887_v36 = vunpack.c.l.b16 %v4373_v17  ;;  %v1411_v18 = vshrl.u32 %v602_v48, 16  ;;  %v7891_v4 = vunpack.c.l.b16 %v4415_v50  ;;  %v4518_v59 = vrot.slane %v7882_v63, 4 }
  0xa8   :  { %4306 = vrot.lane.b32.xlu0 %v7844_v5, %s7082_s6  ;;  %v7895_v58 = vrot.slane %v612_v3, %v7152_v16  ;;  %v627_v26 = vcombine.high %v619_v22, %v619_v22  ;;  %v7897_v49 = vunpack.c.l.b16 %v4387_v60  ;;  %v4512_v46 = vrot.slane %v4501_v11, 7 }
  0xa9   :  { %v4514_v35 = vrot.slane %v7887_v36, 6  ;;  %v1416_v45 = vshrl.u32 %v603_v53, 16  ;;  %v4520_v38 = vrot.slane %v7891_v4, 3  ;;  %v1421_v10 = vshrl.u32 %v604_v32, 16 }
  0xaa   :  { %v1426_v19 = vshrl.u32 %v619_v22, 16  ;;  %v1431_v47 = vshrl.u32 %v7895_v58, 16  ;;  %v4513_v56 = vsel %vm3094_vm0, %v4512_v46, %v4500_v33  ;;  %v4516_v54 = vrot.slane %v7897_v49, 5  ;;  %v56_v33 = vld [vmem:[%s9389_s0 + $0x8c] sm:$0xf] }
  0xab   :  { %v1436_v1 = vshrl.u32 %v627_v26, 16  ;;  %v1886_v27 = vmax.bf16 %v1411_v18, %v602_v48  ;;  %v4515_v28 = vsel %vm3097_vm1, %v4514_v35, %v4513_v56  ;;  %v1887_v29 = vmax.bf16 %v1416_v45, %v603_v53  ;;  %v55_v53 = vld [vmem:[%s9389_s0 + $0x88] sm:$0xf] }
  0xac   :  { %4620 = vrot.lane.b32.xlu0 %v7827_v42, %s7083_s7  ;;  %v1888_v43 = vmax.bf16 %v1421_v10, %v604_v32  ;;  %v1889_v40 = vmax.bf16 %v1426_v19, %v619_v22  ;;  %v4517_v30 = vsel %vm3100_vm2, %v4516_v54, %v4515_v28  ;;  %v1890_v44 = vmax.bf16 %v1431_v47, %v7895_v58  ;;  %v53_v42 = vld [vmem:[%s9389_s0 + $0x80] sm:$0xf] }
  0xad   :  { %v1891_v14 = vmax.bf16 %v1436_v1, %v627_v26  ;;  %v2621_v21 = vrot.slane %v1886_v27, %v7152_v16  ;;  %v4519_v34 = vsel %vm3103_vm3, %v4518_v59, %v4517_v30  ;;  %v2635_v61 = vrot.slane %v1887_v29, %v7152_v16 }
  0xae   :  { %v2649_v48 = vrot.slane %v1888_v43, %v7152_v16  ;;  %v2663_v39 = vrot.slane %v1889_v40, %v7152_v16  ;;  %v4521_v51 = vsel %vm3106_vm4, %v4520_v38, %v4519_v34  ;;  %v2677_v23 = vrot.slane %v1890_v44, %v7152_v16 }
  0xaf   :  { %v7924_v32 = vrot.slane %v2621_v21, %v7152_v16  ;;  %v3346_v17 = vrot.slane %v1891_v14, %v7152_v16  ;;  %v4532_v50 = vpack.c.b16 %v4521_v51, %v4521_v51  ;;  %v2642_v3 = vrot.slane %v2635_v61, %v7152_v16 }
  0xb0   :  { %4696 = vrot.lane.b32.xlu0 %v7754_v15, %s7084_s8  ;;  %v2656_v22 = vrot.slane %v2649_v48, %v7152_v16  ;;  %v2670_v60 = vrot.slane %v2663_v39, %v7152_v16  ;;  %v2684_v18 = vrot.slane %v2677_v23, %v7152_v16  ;;  %v101_v46 = vmax.bf16 %v55_v53, %v53_v42 }
  0xb1   :  { %v3064_v59 = vunpack.c.l.b16 %v7924_v32  ;;  %v7942_v26 = vrot.slane %v3346_v17, %v7152_v16  ;;  %4544 = vrot.lane.b32.xlu1 %v4532_v50, %s7078_s26  ;;  %v7945_v35 = vunpack.c.l.b16 %v2642_v3  ;;  %v102_v38 = vmax.bf16 %v56_v33, %v54_v8 }
  0xb2   :  { %v7947_v45 = vunpack.c.l.b16 %v2656_v22  ;;  %v7949_v15 = vunpack.c.l.b16 %v2670_v60  ;;  %v7951_v10 = vunpack.c.l.b16 %v2684_v18  ;;  %v539_v47 = vrot.slane %v101_v46, %v7152_v16 }
  0xb3   :  { %v3417_v19 = vunpack.c.l.b16 %v7942_v26  ;;  %v531_v56 = vcombine.high %v7840_v31, %v7840_v31  ;;  %v3492_v54 = vrot.slane %v7945_v35, 7  ;;  %v563_v28 = vrot.slane %v102_v38, %v7152_v16  ;;  %v8084_v26 = vpop.permute.xlu0 %4140 }
  0xb4   :  { %v3494_v1 = vrot.slane %v7947_v45, 6  ;;  %v3496_v27 = vrot.slane %v7949_v15, 5  ;;  %v3498_v29 = vrot.slane %v7951_v10, 4  ;;  %v540_v43 = vcombine.high %v539_v47, %v539_v47 }
  0xb5   :  { %v7963_v40 = vrot.slane %v539_v47, %v7152_v16  ;;  %4698 = vrot.lane.b32.xlu1 %v7844_v5, %s7084_s8  ;;  %v3493_v31 = vsel %vm3094_vm0, %v3492_v54, %v3064_v59  ;;  %v3500_v30 = vrot.slane %v3417_v19, 3  ;;  %v564_v44 = vcombine.high %v563_v28, %v563_v28 }
  0xb6   :  { %v571_v14 = vrot.slane %v563_v28, %v7152_v16  ;;  %v3495_v21 = vsel %vm3097_vm1, %v3494_v1, %v3493_v31  ;;  %v554_v34 = vrot.slane %v540_v43, %v7152_v16  ;;  %v1356_v48 = vshrl.u32 %v531_v56, 16 }
  0xb7   :  { %v555_v61 = vcombine.high %v7963_v40, %v7963_v40  ;;  %v3497_v5 = vsel %vm3100_vm2, %v3496_v27, %v3495_v21  ;;  %v578_v39 = vrot.slane %v564_v44, %v7152_v16  ;;  %vm4776_vm7 = vcmask 97280  }
  0xb8   :  { %v579_v42 = vcombine.high %v571_v14, %v571_v14  ;;  %v1386_v53 = vshrl.u32 %v571_v14, 16  ;;  %v3499_v51 = vsel %vm3103_vm3, %v3498_v29, %v3497_v5  ;;  %v556_v23 = vcombine.high %v554_v34, %v554_v34 }
  0xb9   :  { %v1371_v17 = vshrl.u32 %v554_v34, 16  ;;  %v1376_v8 = vshrl.u32 %v555_v61, 16  ;;  %v3501_v33 = vsel %vm3106_vm4, %v3500_v30, %v3499_v51  ;;  %v1391_v50 = vshrl.u32 %v578_v39, 16 }
  0xba   :  { %v1396_v3 = vshrl.u32 %v579_v42, 16  ;;  %v1881_v22 = vmax.bf16 %v1386_v53, %v571_v14  ;;  %v7981_v60 = vpack.c.b16 %v3501_v33, %v3501_v33  ;;  %v1381_v18 = vshrl.u32 %v556_v23, 16 }
  0xbb   :  { %v1878_v46 = vmax.bf16 %v1371_v17, %v554_v34  ;;  %v1879_v38 = vmax.bf16 %v1376_v8, %v555_v61  ;;  %v1882_v47 = vmax.bf16 %v1391_v50, %v578_v39  ;;  %v580_v27 = vcombine.high %v578_v39, %v578_v39 }
  0xbc   :  { %v1883_v54 = vmax.bf16 %v1396_v3, %v579_v42  ;;  %v2579_v1 = vrot.slane %v1881_v22, %v7152_v16  ;;  %3568 = vrot.lane.b32.xlu1 %v7981_v60, %s7079_s10  ;;  %v1880_v28 = vmax.bf16 %v1381_v18, %v556_v23  ;;  %v1875_v31 = vmax.bf16 %v1356_v48, %v531_v56 }
  0xbd   :  { %v2537_v29 = vrot.slane %v1878_v46, %v7152_v16  ;;  %v2551_v43 = vrot.slane %v1879_v38, %v7152_v16  ;;  %v2593_v44 = vrot.slane %v1882_v47, %v7152_v16  ;;  %v1401_v21 = vshrl.u32 %v580_v27, 16 }
  0xbe   :  { %v2586_v30 = vrot.slane %v2579_v1, %v7152_v16  ;;  %v3332_v14 = vrot.slane %v1883_v54, %v7152_v16  ;;  %v2565_v5 = vrot.slane %v1880_v28, %v7152_v16  ;;  %v4566_v39 = vrot.slane %v1875_v31, %v7152_v16 }
  0xbf   :  { %v7992_v34 = vrot.slane %v2537_v29, %v7152_v16  ;;  %v2558_v61 = vrot.slane %v2551_v43, %v7152_v16  ;;  %v2600_v42 = vrot.slane %v2593_v44, %v7152_v16  ;;  %v1884_v48 = vmax.bf16 %v1401_v21, %v580_v27 }
  0xc0   :  { %v7998_v53 = vunpack.c.l.b16 %v2586_v30  ;;  %v3339_v56 = vrot.slane %v3332_v14, %v7152_v16  ;;  %v2572_v51 = vrot.slane %v2565_v5, %v7152_v16  ;;  %v4590_v8 = vrot.slane %v7887_v36, 7 }
  0xc1   :  { %v9395_v23 = vunpack.c.l.b16 %v7992_v34  ;;  %v8003_v17 = vunpack.c.l.b16 %v2558_v61  ;;  %v8006_v33 = vunpack.c.l.b16 %v2600_v42  ;;  %v3680_v3 = vrot.slane %v1884_v48, %v7152_v16 }
  0xc2   :  { %9404 = vst [vmem:[#allocation3_spill] sm:$0xff] %v7998_v53  ;;  %v3416_v50 = vunpack.c.l.b16 %v3339_v56  ;;  %v4573_v22 = vrot.slane %v4566_v39, %v7152_v16  ;;  %v8010_v18 = vunpack.c.l.b16 %v2572_v51  ;;  %v3486_v38 = vrot.slane %v7998_v53, 5 }
  0xc3   :  { %9405 = vst [vmem:[#allocation4_spill] sm:$0xff] %v8006_v33  ;;  %v3482_v46 = vrot.slane %v8003_v17, 7  ;;  %v3832_v47 = vrot.slane %v7998_v53, 6  ;;  %v3488_v54 = vrot.slane %v8006_v33, 4  ;;  %v3687_v27 = vrot.slane %v3680_v3, %v7152_v16 }
  0xc4   :  { %v3490_v1 = vrot.slane %v3416_v50, 3  ;;  %v3834_v28 = vrot.slane %v8006_v33, 5  ;;  %v3484_v43 = vrot.slane %v8010_v18, 6  ;;  %v3830_v31 = vrot.slane %v8010_v18, 7 }
  0xc5   :  { %v3483_v29 = vsel %vm3094_vm0, %v3482_v46, %v9395_v23  ;;  %v3836_v30 = vrot.slane %v3416_v50, 4  ;;  %v3764_v44 = vunpack.c.l.b16 %v3687_v27  ;;  %v4588_v14 = vunpack.c.l.b16 %v4573_v22  ;;  %v8038_v46 = vpop.permute.xlu1 %4142 }
  0xc6   :  { %v4591_v21 = vsel %vm3094_vm0, %v4590_v8, %v4501_v11  ;;  %v4592_v61 = vrot.slane %v7897_v49, 6  ;;  %v3485_v5 = vsel %vm3097_vm1, %v3484_v43, %v3483_v29  ;;  %v3831_v39 = vsel %vm3094_vm0, %v3830_v31, %v8003_v17 }
  0xc7   :  { %v4594_v42 = vrot.slane %v7882_v63, 5  ;;  %v4596_v56 = vrot.slane %v7891_v4, 4  ;;  %v3487_v48 = vsel %vm3100_vm2, %v3486_v38, %v3485_v5  ;;  %v3833_v51 = vsel %vm3097_vm1, %v3832_v47, %v3831_v39 }
  0xc8   :  { %v3838_v50 = vrot.slane %v3764_v44, 3  ;;  %v4593_v24 = vsel %vm3097_vm1, %v4592_v61, %v4591_v21  ;;  %v3489_v11 = vsel %vm3103_vm3, %v3488_v54, %v3487_v48  ;;  %v3835_v8 = vsel %vm3100_vm2, %v3834_v28, %v3833_v51 }
  0xc9   :  { %v4595_v3 = vsel %vm3100_vm2, %v4594_v42, %v4593_v24  ;;  %v4598_v22 = vrot.slane %v4588_v14, 3  ;;  %v3491_v27 = vsel %vm3106_vm4, %v3490_v1, %v3489_v11  ;;  %v3837_v29 = vsel %vm3103_vm3, %v3836_v30, %v3835_v8  ;;  %v63_v42 = vld [vmem:[%s9389_s0 + $0xa8] sm:$0xf]  ;;  %v8075_v11 = vpop.permute.xlu1 %4534 }
  0xca   :  { %v4597_v38 = vsel %vm3103_vm3, %v4596_v56, %v4595_v3  ;;  %v532_v47 = vcombine.high %v7848_v37, %v7848_v37  ;;  %v3548_v43 = vpack.c.b16 %v3491_v27, %v3491_v27  ;;  %v3839_v31 = vsel %vm3106_vm4, %v3838_v50, %v3837_v29 }
  0xcb   :  { %v4599_v54 = vsel %vm3106_vm4, %v4598_v22, %v4597_v38  ;;  %v4668_v28 = vrot.slane %v7897_v49, 7  ;;  %v3896_v44 = vpack.c.b16 %v3839_v31, %v3839_v31  ;;  %v4670_v5 = vrot.slane %v7882_v63, 6  ;;  %v61_v49 = vld [vmem:[%s9389_s0 + $0xa0] sm:$0xf] }
  0xcc   :  { %v4610_v21 = vpack.c.b16 %v4599_v54, %v4599_v54  ;;  %v1361_v61 = vshrl.u32 %v532_v47, 16  ;;  %3566 = vrot.lane.b32.xlu0 %v3548_v43, %s7079_s10  ;;  %v4672_v30 = vrot.slane %v7891_v4, 5  ;;  %v4674_v37 = vrot.slane %v4588_v14, 4  ;;  %v64_v14 = vld [vmem:[%s9389_s0 + $0xac] sm:$0xf] }
  0xcd   :  { %v4669_v1 = vsel %vm3094_vm0, %v4668_v28, %v7887_v36  ;;  %v628_v39 = vcombine.high %v7895_v58, %v7895_v58  ;;  %3914 = vrot.lane.b32.xlu1 %v3896_v44, %s7081_s12  ;;  %v3840_v36 = vrot.slane %v7947_v45, 7  ;;  %v3842_v4 = vrot.slane %v7949_v15, 6  ;;  %v62_v58 = vld [vmem:[%s9389_s0 + $0xa4] sm:$0xf] }
  0xce   :  { %v1876_v63 = vmax.bf16 %v1361_v61, %v532_v47  ;;  %v4671_v56 = vsel %vm3097_vm1, %v4670_v5, %v4669_v1  ;;  %v3844_v50 = vrot.slane %v7951_v10, 5  ;;  %v3846_v24 = vrot.slane %v3417_v19, 4 }
  0xcf   :  { %v4673_v48 = vsel %vm3100_vm2, %v4672_v30, %v4671_v56  ;;  %v1441_v51 = vshrl.u32 %v628_v39, 16  ;;  %v3841_v22 = vsel %vm3094_vm0, %v3840_v36, %v7945_v35  ;;  %v105_v27 = vmax.bf16 %v63_v42, %v61_v49 }
  0xd0   :  { %v4644_v8 = vrot.slane %v1876_v63, %v7152_v16  ;;  %v4675_v3 = vsel %vm3103_vm3, %v4674_v37, %v4673_v48  ;;  %4622 = vrot.lane.b32.xlu0 %v4610_v21, %s7083_s7  ;;  %v3843_v38 = vsel %vm3097_vm1, %v3842_v4, %v3841_v22  ;;  %v106_v47 = vmax.bf16 %v64_v14, %v62_v58  ;;  %v8102_v63 = vpop.permute.xlu1 %4538 }
  0xd1   :  { %v1892_v29 = vmax.bf16 %v1441_v51, %v628_v39  ;;  %v1406_v43 = vshrl.u32 %v7857_v13, 16  ;;  %v3845_v31 = vsel %vm3100_vm2, %v3844_v50, %v3843_v38  ;;  %v635_v54 = vrot.slane %v105_v27, %v7152_v16  ;;  %v8110_v51 = vpop.permute.xlu0 %4144 }
  0xd2   :  { %v4651_v19 = vrot.slane %v4644_v8, %v7152_v16  ;;  %v3168_v28 = vrot.slane %v3064_v59, 7  ;;  %v3847_v21 = vsel %vm3103_vm3, %v3846_v24, %v3845_v31  ;;  %v659_v61 = vrot.slane %v106_v47, %v7152_v16 }
  0xd3   :  { %v3694_v44 = vrot.slane %v1892_v29, %v7152_v16  ;;  %v1885_v5 = vmax.bf16 %v1406_v43, %v7857_v13  ;;  %v636_v30 = vcombine.high %v635_v54, %v635_v54  ;;  %v643_v37 = vrot.slane %v635_v54, %v7152_v16 }
  0xd4   :  { %v4666_v1 = vunpack.c.l.b16 %v4651_v19  ;;  %v3170_v39 = vrot.slane %v7945_v35, 6  ;;  %v660_v42 = vcombine.high %v659_v61, %v659_v61  ;;  %v8099_v32 = vrot.slane %v659_v61, %v7152_v16 }
  0xd5   :  { %v3701_v49 = vrot.slane %v3694_v44, %v7152_v16  ;;  %v2607_v59 = vrot.slane %v1885_v5, %v7152_v16  ;;  %v650_v36 = vrot.slane %v636_v30, %v7152_v16  ;;  %v651_v13 = vcombine.high %v643_v37, %v643_v37 }
  0xd6   :  { %v4676_v56 = vrot.slane %v4666_v1, 3  ;;  %v1446_v4 = vshrl.u32 %v643_v37, 16  ;;  %v8106_v14 = vrot.slane %v660_v42, %v7152_v16  ;;  %v1466_v35 = vshrl.u32 %v8099_v32, 16  ;;  %v8119_v1 = vpop.permute.xlu1 %3558 }
  0xd7   :  { %v3765_v58 = vunpack.c.l.b16 %v3701_v49  ;;  %v2614_v48 = vrot.slane %v2607_v59, %v7152_v16  ;;  %v652_v24 = vcombine.high %v650_v36, %v650_v36  ;;  %v1451_v8 = vshrl.u32 %v650_v36, 16 }
  0xd8   :  { %v4677_v50 = vsel %vm3106_vm4, %v4676_v56, %v4675_v3  ;;  %v1456_v22 = vshrl.u32 %v651_v13, 16  ;;  %v1471_v38 = vshrl.u32 %v8106_v14, 16  ;;  %v1893_v47 = vmax.bf16 %v1446_v4, %v643_v37 }
  0xd9   :  { %v4688_v27 = vpack.c.b16 %v4677_v50, %v4677_v50  ;;  %v3848_v29 = vrot.slane %v3765_v58, 3  ;;  %v1461_v43 = vshrl.u32 %v652_v24, 16  ;;  %v1894_v19 = vmax.bf16 %v1451_v8, %v650_v36 }
  0xda   :  { %v1895_v31 = vmax.bf16 %v1456_v22, %v651_v13  ;;  %v1897_v54 = vmax.bf16 %v1466_v35, %v8099_v32  ;;  %v1898_v61 = vmax.bf16 %v1471_v38, %v8106_v14  ;;  %v2691_v3 = vrot.slane %v1893_v47, %v7152_v16  ;;  %v8129_v13 = vpop.permute.xlu0 %4536 }
  0xdb   :  { %4700 = vrot.lane.b32.xlu1 %v4688_v27, %s7084_s8  ;;  %v3849_v44 = vsel %vm3106_vm4, %v3848_v29, %v3847_v21  ;;  %v3063_v5 = vunpack.c.l.b16 %v2614_v48  ;;  %v1896_v49 = vmax.bf16 %v1461_v43, %v652_v24  ;;  %v2705_v37 = vrot.slane %v1894_v19, %v7152_v16 }
  0xdc   :  { %v8121_v30 = vpack.c.b16 %v3849_v44, %v3849_v44  ;;  %v2719_v42 = vrot.slane %v1895_v31, %v7152_v16  ;;  %v2698_v59 = vrot.slane %v2691_v3, %v7152_v16  ;;  %v2747_v56 = vrot.slane %v1897_v54, %v7152_v16 }
  0xdd   :  { %v2761_v21 = vrot.slane %v1898_v61, %v7152_v16  ;;  %v3169_v36 = vsel %vm3094_vm0, %v3168_v28, %v3063_v5  ;;  %v2712_v4 = vrot.slane %v2705_v37, %v7152_v16  ;;  %v2733_v35 = vrot.slane %v1896_v49, %v7152_v16 }
  0xde   :  { %3916 = vrot.lane.b32.xlu0 %v8121_v30, %s7081_s12  ;;  %v2726_v58 = vrot.slane %v2719_v42, %v7152_v16  ;;  %v3171_v48 = vsel %vm3097_vm1, %v3170_v39, %v3169_v36  ;;  %v2754_v50 = vrot.slane %v2747_v56, %v7152_v16  ;;  %v3069_v8 = vunpack.c.l.b16 %v2698_v59  ;;  %v8144_v39 = vpop.permute.xlu1 %4218  ;;  %v8150_v37 = vpop.permute.xlu0 %3554 }
  0xdf   :  { %v2768_v24 = vrot.slane %v2761_v21, %v7152_v16  ;;  %v3172_v28 = vrot.slane %v7947_v45, 5  ;;  %v2740_v22 = vrot.slane %v2733_v35, %v7152_v16  ;;  %v3070_v27 = vunpack.c.l.b16 %v2712_v4 }
  0xe0   :  { %v3071_v29 = vunpack.c.l.b16 %v2726_v58  ;;  %v3174_v38 = vrot.slane %v7949_v15, 4  ;;  %v3073_v47 = vunpack.c.l.b16 %v2754_v50  ;;  %v3176_v31 = vrot.slane %v7951_v10, 3  ;;  %v65_v50 = vld [vmem:[%s9389_s0 + $0xb0] sm:$0xf] }
  0xe1   :  { %v3074_v43 = vunpack.c.l.b16 %v2768_v24  ;;  %v3173_v19 = vsel %vm3100_vm2, %v3172_v28, %v3171_v48  ;;  %v3072_v54 = vunpack.c.l.b16 %v2740_v22  ;;  %v3178_v44 = vrot.slane %v3070_v27, 7 }
  0xe2   :  { %v3180_v61 = vrot.slane %v3071_v29, 6  ;;  %v3175_v3 = vsel %vm3103_vm3, %v3174_v38, %v3173_v19  ;;  %v3184_v45 = vrot.slane %v3073_v47, 4  ;;  %v675_v15 = vcombine.high %v8099_v32, %v8099_v32  ;;  %v66_v38 = vld [vmem:[%s9389_s0 + $0xb4] sm:$0xf]  ;;  %v8173_v19 = vpop.permute.xlu1 %4222 }
  0xe3   :  { %v3186_v5 = vrot.slane %v3074_v43, 3  ;;  %v3177_v49 = vsel %vm3106_vm4, %v3176_v31, %v3175_v3  ;;  %v3179_v42 = vsel %vm3094_vm0, %v3178_v44, %v3069_v8  ;;  %v3182_v59 = vrot.slane %v3072_v54, 5  ;;  %v68_v3 = vld [vmem:[%s9389_s0 + $0xbc] sm:$0xf] }
  0xe4   :  { %v8153_v10 = vpack.c.b16 %v3177_v49, %v3177_v49  ;;  %v3502_v56 = vrot.slane %v3071_v29, 7  ;;  %v3181_v21 = vsel %vm3097_vm1, %v3180_v61, %v3179_v42  ;;  %v1476_v36 = vshrl.u32 %v675_v15, 16  ;;  %v8184_v42 = vpop.permute.xlu0 %3556 }
  0xe5   :  { %v3504_v4 = vrot.slane %v3072_v54, 6  ;;  %v3506_v58 = vrot.slane %v3073_v47, 5  ;;  %v3183_v35 = vsel %vm3100_vm2, %v3182_v59, %v3181_v21  ;;  %v676_v48 = vcombine.high %v8106_v14, %v8106_v14 }
  0xe6   :  { %4152 = vrot.lane.b32.xlu0 %v8153_v10, %s7077_s25  ;;  %v3503_v32 = vsel %vm3094_vm0, %v3502_v56, %v3070_v27  ;;  %v3185_v24 = vsel %vm3103_vm3, %v3184_v45, %v3183_v35  ;;  %v1899_v8 = vmax.bf16 %v1476_v36, %v675_v15  ;;  %v3850_v22 = vrot.slane %v3072_v54, 7  ;;  %v67_v27 = vld [vmem:[%s9389_s0 + $0xb8] sm:$0xf] }
  0xe7   :  { %v3505_v28 = vsel %vm3097_vm1, %v3504_v4, %v3503_v32  ;;  %v3187_v14 = vsel %vm3106_vm4, %v3186_v5, %v3185_v24  ;;  %v3508_v31 = vrot.slane %v3074_v43, 4  ;;  %v1481_v44 = vshrl.u32 %v676_v48, 16 }
  0xe8   :  { %v3852_v61 = vrot.slane %v3073_v47, 6  ;;  %v8179_v54 = vpack.c.b16 %v3187_v14, %v3187_v14  ;;  %v3360_v45 = vrot.slane %v1899_v8, %v7152_v16  ;;  %v3507_v49 = vsel %vm3100_vm2, %v3506_v58, %v3505_v28  ;;  %v8212_v14 = vpop.permute.xlu0 %4220 }
  0xe9   :  { %v3851_v15 = vsel %vm3094_vm0, %v3850_v22, %v3071_v29  ;;  %v1900_v5 = vmax.bf16 %v1481_v44, %v676_v48  ;;  %v3854_v59 = vrot.slane %v3074_v43, 5  ;;  %v107_v56 = vmax.bf16 %v67_v27, %v65_v50  ;;  %v8202_v50 = vpop.permute.xlu1 %3902 }
  0xea   :  { %9406 = vst [vmem:[#allocation5_spill] sm:$0xff] %v8179_v54  ;;  %4230 = vrot.lane.b32.xlu0 %v7981_v60, %s7080_s11  ;;  %v3853_v47 = vsel %vm3097_vm1, %v3852_v61, %v3851_v15  ;;  %4154 = vrot.lane.b32.xlu1 %v8179_v54, %s7077_s25  ;;  %v3367_v21 = vrot.slane %v3360_v45, %v7152_v16  ;;  %v1046_v4 = vshrl.u32 %v7446_v55, 16  ;;  %v8195_v29 = vrot.slane %v3022_v62, 7 }
  0xeb   :  { %v108_v36 = vmax.bf16 %v68_v3, %v66_v38  ;;  %v3708_v58 = vrot.slane %v1900_v5, %v7152_v16  ;;  %v683_v60 = vrot.slane %v107_v56, %v7152_v16  ;;  %v3509_v43 = vsel %vm3103_vm3, %v3508_v31, %v3507_v49 }
  0xec   :  { %v3418_v35 = vunpack.c.l.b16 %v3367_v21  ;;  %v3855_v32 = vsel %vm3100_vm2, %v3854_v59, %v3853_v47  ;;  %v8209_v8 = vmax.bf16 %v1046_v4, %v7446_v55  ;;  %vm4801_vm8 = vcmask 130048  }
  0xed   :  { %v707_v48 = vrot.slane %v108_v36, %v7152_v16  ;;  %v3715_v24 = vrot.slane %v3708_v58, %v7152_v16  ;;  %v684_v0 = vcombine.high %v683_v60, %v683_v60  ;;  %v691_v62 = vrot.slane %v683_v60, %v7152_v16  ;;  %v8220_v58 = vpop.permute.xlu1 %3906 }
  0xee   :  { %4308 = vrot.lane.b32.xlu0 %v8121_v30, %s7082_s6  ;;  %v3510_v28 = vrot.slane %v3418_v35, 3  ;;  %v3856_v22 = vrot.slane %v3418_v35, 4  ;;  %vm4826_vm9 = vcmask 162816   ;;  %vm4851_vm10 = vcmask 195584  }
  0xef   :  { %v708_v38 = vcombine.high %v707_v48, %v707_v48  ;;  %v715_v27 = vrot.slane %v707_v48, %v7152_v16  ;;  %v3766_v31 = vunpack.c.l.b16 %v3715_v24  ;;  %v698_v44 = vrot.slane %v684_v0, %v7152_v16 }
  0xf0   :  { %v699_v61 = vcombine.high %v691_v62, %v691_v62  ;;  %v1486_v3 = vshrl.u32 %v691_v62, 16  ;;  %v3511_v30 = vsel %vm3106_vm4, %v3510_v28, %v3509_v43  ;;  %v3857_v45 = vsel %vm3103_vm3, %v3856_v22, %v3855_v32  ;;  %v8227_v22 = vpop.permute.xlu0 %3904 }
  0xf1   :  { %v722_v49 = vrot.slane %v708_v38, %v7152_v16  ;;  %v1506_v55 = vshrl.u32 %v715_v27, 16  ;;  %v3550_v15 = vpack.c.b16 %v3511_v30, %v3511_v30  ;;  %v3858_v5 = vrot.slane %v3766_v31, 3 }
  0xf2   :  { %v700_v47 = vcombine.high %v698_v44, %v698_v44  ;;  %v1491_v59 = vshrl.u32 %v698_v44, 16  ;;  %4546 = vrot.lane.b32.xlu0 %v8179_v54, %s7078_s26  ;;  %v1496_v56 = vshrl.u32 %v699_v61, 16  ;;  %v1901_v36 = vmax.bf16 %v1486_v3, %v691_v62 }
  0xf3   :  { %v1511_v21 = vshrl.u32 %v722_v49, 16  ;;  %v1905_v4 = vmax.bf16 %v1506_v55, %v715_v27  ;;  %4232 = vrot.lane.b32.xlu1 %v3550_v15, %s7080_s11  ;;  %v3859_v60 = vsel %vm3106_vm4, %v3858_v5, %v3857_v45  ;;  %v723_v32 = vcombine.high %v715_v27, %v715_v27 }
  0xf4   :  { %v1501_v35 = vshrl.u32 %v700_v47, 16  ;;  %v1902_v43 = vmax.bf16 %v1491_v59, %v698_v44  ;;  %v8224_v48 = vpack.c.b16 %v3859_v60, %v3859_v60  ;;  %v1903_v24 = vmax.bf16 %v1496_v56, %v699_v61 }
  0xf5   :  { %v1906_v0 = vmax.bf16 %v1511_v21, %v722_v49  ;;  %v2775_v28 = vrot.slane %v1901_v36, %v7152_v16  ;;  %v2831_v31 = vrot.slane %v1905_v4, %v7152_v16  ;;  %v1516_v3 = vshrl.u32 %v723_v32, 16  ;;  %v8242_v4 = vpop.permute.xlu1 %4298 }
  0xf6   :  { %v1904_v38 = vmax.bf16 %v1501_v35, %v700_v47  ;;  %v2789_v62 = vrot.slane %v1902_v43, %v7152_v16  ;;  %4624 = vrot.lane.b32.xlu0 %v3550_v15, %s7083_s7  ;;  %v2803_v27 = vrot.slane %v1903_v24, %v7152_v16  ;;  %v724_v61 = vcombine.high %v722_v49, %v722_v49 }
  0xf7   :  { %v2782_v30 = vrot.slane %v2775_v28, %v7152_v16  ;;  %v2845_v44 = vrot.slane %v1906_v0, %v7152_v16  ;;  %4310 = vrot.lane.b32.xlu1 %v8224_v48, %s7082_s6  ;;  %v2838_v5 = vrot.slane %v2831_v31, %v7152_v16  ;;  %v1907_v47 = vmax.bf16 %v1516_v3, %v723_v32 }
  0xf8   :  { %v2796_v45 = vrot.slane %v2789_v62, %v7152_v16  ;;  %v2817_v55 = vrot.slane %v1904_v38, %v7152_v16  ;;  %v2810_v59 = vrot.slane %v2803_v27, %v7152_v16  ;;  %v1521_v36 = vshrl.u32 %v724_v61, 16  ;;  %v8250_v38 = vpop.permute.xlu0 %4296 }
  0xf9   :  { %v2852_v56 = vrot.slane %v2845_v44, %v7152_v16  ;;  %v3075_v21 = vunpack.c.l.b16 %v2782_v30  ;;  %v3079_v35 = vunpack.c.l.b16 %v2838_v5  ;;  %v3374_v43 = vrot.slane %v1907_v47, %v7152_v16  ;;  %v8258_v23 = vpop.permute.xlu1 %4614 }
  0xfa   :  { %v2824_v49 = vrot.slane %v2817_v55, %v7152_v16  ;;  %v3076_v60 = vunpack.c.l.b16 %v2796_v45  ;;  %4702 = vrot.lane.b32.xlu0 %v8224_v48, %s7084_s8  ;;  %v3077_v24 = vunpack.c.l.b16 %v2810_v59  ;;  %v1908_v0 = vmax.bf16 %v1521_v36, %v724_v61 }
  0xfb   :  { %v3080_v32 = vunpack.c.l.b16 %v2852_v56  ;;  %v2019_v28 = vrot.slane %v8209_v8, %v7152_v16  ;;  %v3194_v3 = vrot.slane %v3079_v35, 4  ;;  %v3381_v30 = vrot.slane %v3374_v43, %v7152_v16 }
  0xfc   :  { %v3078_v62 = vunpack.c.l.b16 %v2824_v49  ;;  %v3188_v31 = vrot.slane %v3076_v60, 7  ;;  %v3190_v27 = vrot.slane %v3077_v24, 6  ;;  %v3512_v45 = vrot.slane %v3077_v24, 7 }
  0xfd   :  { %v3196_v44 = vrot.slane %v3080_v32, 3  ;;  %v3516_v55 = vrot.slane %v3079_v35, 5  ;;  %v3419_v59 = vunpack.c.l.b16 %v3381_v30  ;;  %v3518_v36 = vrot.slane %v3080_v32, 4 }
  0xfe   :  { %v3189_v5 = vsel %vm3094_vm0, %v3188_v31, %v3075_v21  ;;  %v3192_v47 = vrot.slane %v3078_v62, 5  ;;  %v3514_v56 = vrot.slane %v3078_v62, 6  ;;  %3570 = vrot.lane.b32.xlu0 %v3550_v15, %s7079_s10  ;;  %v3513_v61 = vsel %vm3094_vm0, %v3512_v45, %v3076_v60 }
  0xff   :  { %v3191_v8 = vsel %vm3097_vm1, %v3190_v27, %v3189_v5  ;;  %v3722_v49 = vrot.slane %v1908_v0, %v7152_v16  ;;  %v3520_v54 = vrot.slane %v3419_v59, 3  ;;  %v3860_v21 = vrot.slane %v3078_v62, 7  ;;  %v8265_v5 = vpop.permute.xlu0 %4300  ;;  %v69_v62 = vld [vmem:[%s9389_s0 + $0xc0] sm:$0xf] }
 0x100   :  { %v3193_v43 = vsel %vm3100_vm2, %v3192_v47, %v3191_v8  ;;  %v3515_v7 = vsel %vm3097_vm1, %v3514_v56, %v3513_v61  ;;  %v3862_v27 = vrot.slane %v3079_v35, 6  ;;  %v3864_v47 = vrot.slane %v3080_v32, 5  ;;  %v72_v32 = vld [vmem:[%s9389_s0 + $0xcc] sm:$0xf] }
 0x101   :  { %v3195_v31 = vsel %vm3103_vm3, %v3194_v3, %v3193_v43  ;;  %v3517_v30 = vsel %vm3100_vm2, %v3516_v55, %v3515_v7  ;;  %v3729_v15 = vrot.slane %v3722_v49, %v7152_v16  ;;  %v3861_v45 = vsel %vm3094_vm0, %v3860_v21, %v3077_v24  ;;  %v71_v24 = vld [vmem:[%s9389_s0 + $0xc8] sm:$0xf] }
 0x102   :  { %v3197_v60 = vsel %vm3106_vm4, %v3196_v44, %v3195_v31  ;;  %v3519_v0 = vsel %vm3103_vm3, %v3518_v36, %v3517_v30  ;;  %v3863_v35 = vsel %vm3097_vm1, %v3862_v27, %v3861_v45  ;;  %v70_v44 = vld [vmem:[%s9389_s0 + $0xc4] sm:$0xf]  ;;  %v3866_v8 = vrot.slane %v3419_v59, 4  ;;  %v8297_v31 = vpop.permute.xlu1 %4690 }
 0x103   :  { %v8273_v56 = vpack.c.b16 %v3197_v60, %v3197_v60  ;;  %v3521_v7 = vsel %vm3106_vm4, %v3520_v54, %v3519_v0  ;;  %v3767_v3 = vunpack.c.l.b16 %v3729_v15  ;;  %v3865_v55 = vsel %vm3100_vm2, %v3864_v47, %v3863_v35  ;;  %v8303_v60 = vpop.permute.xlu0 %4612 }
 0x104   :  { %v4723_v54 = vsel %vm4714_vm5, %v7274_v6, %v8119_v1  ;;  %v2026_v61 = vrot.slane %v2019_v28, %v7152_v16  ;;  %v8293_v36 = vpack.c.b16 %v3521_v7, %v3521_v7  ;;  %v3096_v43 = vrot.slane %v7497_v25, 6 }
 0x105   :  { %4548 = vrot.lane.b32.xlu1 %v8273_v56, %s7078_s26  ;;  %v3868_v49 = vrot.slane %v3767_v3, 3  ;;  %v3099_v21 = vrot.slane %v7503_v41, 5  ;;  %v3867_v59 = vsel %vm3103_vm3, %v3866_v8, %v3865_v55  ;;  %v109_v15 = vmax.bf16 %v71_v24, %v69_v62 }
 0x106   :  { %v3021_v30 = vunpack.c.l.b16 %v2026_v61  ;;  %v110_v27 = vmax.bf16 %v72_v32, %v70_v44  ;;  %v3102_v1 = vrot.slane %v7491_v9, 4  ;;  %v3105_v28 = vrot.slane %v7500_v20, 3  ;;  %v8327_v44 = vpop.permute.xlu1 %4694 }
 0x107   :  { %v3869_v6 = vsel %vm3106_vm4, %v3868_v49, %v3867_v59  ;;  %v4720_v41 = vsel %vm4714_vm5, %v7311_v52, %v8184_v42  ;;  %v731_v0 = vrot.slane %v109_v15, %v7152_v16  ;;  %v8325_v35 = vsel %vm4751_vm6, %v4723_v54, %v8220_v58  ;;  %v8338_v58 = vpop.permute.xlu0 %4616 }
 0x108   :  { %v3095_v25 = vsel %vm3094_vm0, %v8195_v29, %v3021_v30  ;;  %v755_v45 = vrot.slane %v110_v27, %v7152_v16  ;;  %v8314_v9 = vpack.c.b16 %v3869_v6, %v3869_v6  ;;  %v4755_v47 = vsel %vm4751_vm6, %v4720_v41, %v8227_v22 }
 0x109   :  { %4626 = vrot.lane.b32.xlu1 %v8293_v36, %s7083_s7  ;;  %v3098_v20 = vsel %vm3097_vm1, %v3096_v43, %v3095_v25  ;;  %v732_v62 = vcombine.high %v731_v0, %v731_v0  ;;  %v739_v52 = vrot.slane %v731_v0, %v7152_v16  ;;  %v8336_v43 = vsel %vm4776_vm7, %v4755_v47, %v8038_v46 }
 0x10a   :  { %v3101_v29 = vsel %vm3100_vm2, %v3099_v21, %v3098_v20  ;;  %v756_v42 = vcombine.high %v755_v45, %v755_v45  ;;  %v763_v3 = vrot.slane %v755_v45, %v7152_v16  ;;  %vm4876_vm11 = vcmask 228352  }
 0x10b   :  { %v3104_v7 = vsel %vm3103_vm3, %v3102_v1, %v3101_v29  ;;  %v746_v22 = vrot.slane %v732_v62, %v7152_v16  ;;  %v747_v32 = vcombine.high %v739_v52, %v739_v52  ;;  %v1526_v1 = vshrl.u32 %v739_v52, 16  ;;  %v8345_v29 = vpop.permute.xlu1 %3562 }
 0x10c   :  { %v3107_v24 = vsel %vm3106_vm4, %v3105_v28, %v3104_v7  ;;  %v770_v55 = vrot.slane %v756_v42, %v7152_v16  ;;  %v771_v61 = vcombine.high %v763_v3, %v763_v3  ;;  %v1546_v49 = vshrl.u32 %v763_v3, 16 }
 0x10d   :  { %4704 = vrot.lane.b32.xlu1 %v8314_v9, %s7084_s8  ;;  %v3218_v8 = vpack.c.b16 %v3107_v24, %v3107_v24  ;;  %v748_v54 = vcombine.high %v746_v22, %v746_v22  ;;  %v1531_v21 = vshrl.u32 %v746_v22, 16  ;;  %v1536_v59 = vshrl.u32 %v747_v32, 16 }
 0x10e   :  { %v1551_v30 = vshrl.u32 %v770_v55, 16  ;;  %v1556_v15 = vshrl.u32 %v771_v61, 16  ;;  %v1913_v27 = vmax.bf16 %v1546_v49, %v763_v3  ;;  %v772_v6 = vcombine.high %v770_v55, %v770_v55 }
 0x10f   :  { %v1541_v28 = vshrl.u32 %v748_v54, 16  ;;  %v1910_v25 = vmax.bf16 %v1531_v21, %v746_v22  ;;  %v1911_v41 = vmax.bf16 %v1536_v59, %v747_v32  ;;  %v4717_v45 = vsel %vm4714_vm5, %v3218_v8, %v8150_v37 }
 0x110   :  { %v1914_v0 = vmax.bf16 %v1551_v30, %v770_v55  ;;  %v1915_v46 = vmax.bf16 %v1556_v15, %v771_v61  ;;  %v2915_v20 = vrot.slane %v1913_v27, %v7152_v16  ;;  %v1561_v47 = vshrl.u32 %v772_v6, 16  ;;  %v8354_v55 = vpop.permute.xlu0 %4692 }
 0x111   :  { %3572 = vrot.lane.b32.xlu1 %v8293_v36, %s7079_s10  ;;  %v1912_v62 = vmax.bf16 %v1541_v28, %v748_v54  ;;  %v2873_v42 = vrot.slane %v1910_v25, %v7152_v16  ;;  %v2887_v7 = vrot.slane %v1911_v41, %v7152_v16  ;;  %v4753_v32 = vsel %vm4751_vm6, %v4717_v45, %v8202_v50  ;;  %v8371_v45 = vpop.permute.xlu1 %3910 }
 0x112   :  { %v2929_v3 = vrot.slane %v1914_v0, %v7152_v16  ;;  %v2922_v24 = vrot.slane %v2915_v20, %v7152_v16  ;;  %v3388_v37 = vrot.slane %v1915_v46, %v7152_v16  ;;  %v1916_v22 = vmax.bf16 %v1561_v47, %v772_v6 }
 0x113   :  { %v2880_v8 = vrot.slane %v2873_v42, %v7152_v16  ;;  %v2894_v61 = vrot.slane %v2887_v7, %v7152_v16  ;;  %v2901_v49 = vrot.slane %v1912_v62, %v7152_v16  ;;  %v1909_v30 = vmax.bf16 %v1526_v1, %v739_v52 }
 0x114   :  { %v2936_v54 = vrot.slane %v2929_v3, %v7152_v16  ;;  %v8362_v21 = vunpack.c.l.b16 %v2922_v24  ;;  %v3395_v59 = vrot.slane %v3388_v37, %v7152_v16  ;;  %v3736_v50 = vrot.slane %v1916_v22, %v7152_v16  ;;  %v8375_v3 = vpop.permute.xlu0 %3560 }
 0x115   :  { %3918 = vrot.lane.b32.xlu1 %v8224_v48, %s7081_s12  ;;  %v2908_v15 = vrot.slane %v2901_v49, %v7152_v16  ;;  %v3082_v27 = vunpack.c.l.b16 %v2880_v8  ;;  %v3083_v6 = vunpack.c.l.b16 %v2894_v61  ;;  %v4778_v48 = vsel %vm4776_vm7, %v4753_v32, %v8084_v26  ;;  %v73_v32 = vld [vmem:[%s9389_s0 + $0xd0] sm:$0xf] }
 0x116   :  { %v3086_v28 = vunpack.c.l.b16 %v2936_v54  ;;  %v3420_v25 = vunpack.c.l.b16 %v3395_v59  ;;  %v3526_v41 = vrot.slane %v8362_v21, 5  ;;  %v3743_v0 = vrot.slane %v3736_v50, %v7152_v16  ;;  %v75_v59 = vld [vmem:[%s9389_s0 + $0xd8] sm:$0xf] }
 0x117   :  { %v3084_v46 = vunpack.c.l.b16 %v2908_v15  ;;  %v3522_v20 = vrot.slane %v3083_v6, 7  ;;  %v3872_v52 = vrot.slane %v8362_v21, 6  ;;  %v2859_v7 = vrot.slane %v1909_v30, %v7152_v16 }
 0x118   :  { %v3528_v47 = vrot.slane %v3086_v28, 4  ;;  %v3530_v1 = vrot.slane %v3420_v25, 3  ;;  %v3768_v62 = vunpack.c.l.b16 %v3743_v0  ;;  %v3874_v42 = vrot.slane %v3086_v28, 5  ;;  %v74_v0 = vld [vmem:[%s9389_s0 + $0xd4] sm:$0xf] }
 0x119   :  { %v3523_v24 = vsel %vm3094_vm0, %v3522_v20, %v3082_v27  ;;  %v3524_v37 = vrot.slane %v3084_v46, 6  ;;  %v3870_v22 = vrot.slane %v3084_v46, 7  ;;  %v3876_v26 = vrot.slane %v3420_v25, 4 }
 0x11a   :  { %v3878_v8 = vrot.slane %v3768_v62, 3  ;;  %v2866_v61 = vrot.slane %v2859_v7, %v7152_v16  ;;  %v3198_v49 = vrot.slane %v3082_v27, 7  ;;  %v3200_v54 = vrot.slane %v3083_v6, 6  ;;  %v76_v27 = vld [vmem:[%s9389_s0 + $0xdc] sm:$0xf] }
 0x11b   :  { %v3525_v50 = vsel %vm3097_vm1, %v3524_v37, %v3523_v24  ;;  %v3871_v30 = vsel %vm3094_vm0, %v3870_v22, %v3083_v6  ;;  %v3202_v15 = vrot.slane %v3084_v46, 5  ;;  %v3204_v25 = vrot.slane %v8362_v21, 4  ;;  %v8396_v24 = vpop.permute.xlu1 %4146 }
 0x11c   :  { %v3527_v20 = vsel %vm3100_vm2, %v3526_v41, %v3525_v50  ;;  %v3873_v62 = vsel %vm3097_vm1, %v3872_v52, %v3871_v30  ;;  %v3081_v7 = vunpack.c.l.b16 %v2866_v61  ;;  %v3206_v33 = vrot.slane %v3086_v28, 3  ;;  %v8405_v52 = vpop.permute.xlu0 %3908 }
 0x11d   :  { %v3529_v6 = vsel %vm3103_vm3, %v3528_v47, %v3527_v20  ;;  %v3875_v21 = vsel %vm3100_vm2, %v3874_v42, %v3873_v62  ;;  %v4803_v46 = vsel %vm4801_vm8, %v4778_v48, %v8144_v39  ;;  %v111_v37 = vmax.bf16 %v75_v59, %v73_v32 }
 0x11e   :  { %v3531_v22 = vsel %vm3106_vm4, %v3530_v1, %v3529_v6  ;;  %v3877_v53 = vsel %vm3103_vm3, %v3876_v26, %v3875_v21  ;;  %v3199_v41 = vsel %vm3094_vm0, %v3198_v49, %v3081_v7  ;;  %v112_v50 = vmax.bf16 %v76_v27, %v74_v0 }
 0x11f   :  { %v8407_v28 = vpack.c.b16 %v3531_v22, %v3531_v22  ;;  %v3879_v61 = vsel %vm3106_vm4, %v3878_v8, %v3877_v53  ;;  %v3201_v47 = vsel %vm3097_vm1, %v3200_v54, %v3199_v41  ;;  %v779_v42 = vrot.slane %v111_v37, %v7152_v16  ;;  %v8434_v59 = vpop.permute.xlu1 %3912 }
 0x120   :  { %v8412_v30 = vpack.c.b16 %v3879_v61, %v3879_v61  ;;  %v3203_v39 = vsel %vm3100_vm2, %v3202_v15, %v3201_v47  ;;  %v4782_v48 = vsel %vm4776_vm7, %v8325_v35, %v8110_v51  ;;  %v803_v1 = vrot.slane %v112_v50, %v7152_v16  ;;  %v8444_v7 = vpop.permute.xlu0 %3564 }
 0x121   :  { %3574 = vrot.lane.b32.xlu0 %v8407_v28, %s7079_s10  ;;  %v3205_v26 = vsel %vm3103_vm3, %v3204_v25, %v3203_v39  ;;  %v8424_v53 = vsel %vm4826_vm9, %v4803_v46, %v8250_v38  ;;  %v780_v32 = vcombine.high %v779_v42, %v779_v42  ;;  %v787_v8 = vrot.slane %v779_v42, %v7152_v16 }
 0x122   :  { %3922 = vrot.lane.b32.xlu1 %v8412_v30, %s7081_s12  ;;  %v3207_v49 = vsel %vm3106_vm4, %v3206_v33, %v3205_v26  ;;  %v804_v51 = vcombine.high %v803_v1, %v803_v1  ;;  %v811_v35 = vrot.slane %v803_v1, %v7152_v16  ;;  %v4805_v54 = vsel %vm4801_vm8, %v8336_v43, %v8212_v14 }
 0x123   :  { %v8436_v15 = vpack.c.b16 %v3207_v49, %v3207_v49  ;;  %v794_v38 = vrot.slane %v780_v32, %v7152_v16  ;;  %v795_v25 = vcombine.high %v787_v8, %v787_v8  ;;  %v1566_v0 = vshrl.u32 %v787_v8, 16  ;;  %v8460_v26 = vpop.permute.xlu1 %4226 }
 0x124   :  { %v8440_v27 = vrot.slane %v804_v51, %v7152_v16  ;;  %v1586_v20 = vshrl.u32 %v811_v35, 16  ;;  %v4807_v33 = vsel %vm4801_vm8, %v4782_v48, %v8173_v19  ;;  %v819_v62 = vcombine.high %v811_v35, %v811_v35 }
 0x125   :  { %3920 = vrot.lane.b32.xlu0 %v8314_v9, %s7081_s12  ;;  %v796_v14 = vcombine.high %v794_v38, %v794_v38  ;;  %v1571_v43 = vshrl.u32 %v794_v38, 16  ;;  %v1576_v6 = vshrl.u32 %v795_v25, 16  ;;  %v1917_v21 = vmax.bf16 %v1566_v0, %v787_v8 }
 0x126   :  { %4158 = vrot.lane.b32.xlu1 %v8436_v15, %s7077_s25  ;;  %v1591_v46 = vshrl.u32 %v8440_v27, 16  ;;  %v1921_v37 = vmax.bf16 %v1586_v20, %v811_v35  ;;  %v4830_v22 = vsel %vm4826_vm9, %v4805_v54, %v8242_v4  ;;  %v1596_v19 = vshrl.u32 %v819_v62, 16  ;;  %v8472_v54 = vpop.permute.xlu0 %4148 }
 0x127   :  { %v1581_v41 = vshrl.u32 %v796_v14, 16  ;;  %v1918_v50 = vmax.bf16 %v1571_v43, %v794_v38  ;;  %v1919_v61 = vmax.bf16 %v1576_v6, %v795_v25  ;;  %v2943_v47 = vrot.slane %v1917_v21, %v7152_v16 }
 0x128   :  { %v1922_v42 = vmax.bf16 %v1591_v46, %v8440_v27  ;;  %v2999_v39 = vrot.slane %v1921_v37, %v7152_v16  ;;  %v8458_v48 = vsel %vm4826_vm9, %v4807_v33, %v8265_v5  ;;  %v1923_v1 = vmax.bf16 %v1596_v19, %v819_v62 }
 0x129   :  { %4156 = vrot.lane.b32.xlu0 %v8273_v56, %s7077_s25  ;;  %v1920_v4 = vmax.bf16 %v1581_v41, %v796_v14  ;;  %v2950_v32 = vrot.slane %v2943_v47, %v7152_v16  ;;  %v2957_v8 = vrot.slane %v1918_v50, %v7152_v16  ;;  %v2971_v49 = vrot.slane %v1919_v61, %v7152_v16  ;;  %v8490_v50 = vpop.permute.xlu1 %4302 }
 0x12a   :  { %4234 = vrot.lane.b32.xlu1 %v8293_v36, %s7080_s11  ;;  %v3006_v51 = vrot.slane %v2999_v39, %v7152_v16  ;;  %v3013_v5 = vrot.slane %v1922_v42, %v7152_v16  ;;  %v3402_v35 = vrot.slane %v1923_v1, %v7152_v16  ;;  %v4855_v62 = vsel %vm4851_vm10, %v4830_v22, %v8129_v13 }
 0x12b   :  { %v2964_v38 = vrot.slane %v2957_v8, %v7152_v16  ;;  %v2978_v25 = vrot.slane %v2971_v49, %v7152_v16  ;;  %v2985_v0 = vrot.slane %v1920_v4, %v7152_v16  ;;  %v3087_v43 = vunpack.c.l.b16 %v2950_v32  ;;  %v8494_v32 = vpop.permute.xlu0 %4224 }
 0x12c   :  { %v3020_v20 = vrot.slane %v3013_v5, %v7152_v16  ;;  %v3091_v33 = vunpack.c.l.b16 %v3006_v51  ;;  %v8479_v36 = vrot.slane %v3402_v35, %v7152_v16  ;;  %v4853_v41 = vsel %vm4851_vm10, %v8424_v53, %v8075_v11 }
 0x12d   :  { %v2992_v14 = vrot.slane %v2985_v0, %v7152_v16  ;;  %v3088_v6 = vunpack.c.l.b16 %v2964_v38  ;;  %v3089_v21 = vunpack.c.l.b16 %v2978_v25  ;;  %v4878_v5 = vsel %vm4876_vm11, %v4853_v41, %v8303_v60 }
 0x12e   :  { %v8484_v46 = vunpack.c.l.b16 %v3020_v20  ;;  %v3214_v37 = vrot.slane %v3091_v33, 4  ;;  %v3421_v19 = vunpack.c.l.b16 %v8479_v36  ;;  %v3536_v39 = vrot.slane %v3091_v33, 5 }
 0x12f   :  { %v3090_v61 = vunpack.c.l.b16 %v2992_v14  ;;  %v3208_v47 = vrot.slane %v3088_v6, 7  ;;  %v3210_v42 = vrot.slane %v3089_v21, 6  ;;  %v3532_v13 = vrot.slane %v3089_v21, 7 }
 0x130   :  { %v3216_v22 = vrot.slane %v8484_v46, 3  ;;  %v3538_v1 = vrot.slane %v8484_v46, 4  ;;  %v3540_v4 = vrot.slane %v3421_v19, 3  ;;  %vm4901_vm12 = vcmask 261120  }
 0x131   :  { %v3209_v8 = vsel %vm3094_vm0, %v3208_v47, %v3087_v43  ;;  %v3212_v49 = vrot.slane %v3090_v61, 5  ;;  %v3533_v51 = vsel %vm3094_vm0, %v3532_v13, %v3088_v6  ;;  %v3534_v11 = vrot.slane %v3090_v61, 6  ;;  %v8512_v6 = vpop.permute.xlu1 %4228 }
 0x132   :  { %v3211_v53 = vsel %vm3097_vm1, %v3210_v42, %v3209_v8  ;;  %v820_v35 = vcombine.high %v8440_v27, %v8440_v27  ;;  %v4880_v0 = vsel %vm4876_vm11, %v4855_v62, %v8258_v23  ;;  %v4903_v20 = vsel %vm4901_vm12, %v4878_v5, %v8297_v31 }
 0x133   :  { %v3213_v38 = vsel %vm3100_vm2, %v3212_v49, %v3211_v53  ;;  %v3535_v25 = vsel %vm3097_vm1, %v3534_v11, %v3533_v51  ;;  %v4944_v60 = vrot.slane %v4903_v20, %v7152_v16  ;;  %v3880_v47 = vrot.slane %v3090_v61, 7  ;;  %v80_v49 = vld [vmem:[%s9389_s0 + $0xec] sm:$0xf] }
 0x134   :  { %v3215_v36 = vsel %vm3103_vm3, %v3214_v37, %v3213_v38  ;;  %v3537_v14 = vsel %vm3100_vm2, %v3536_v39, %v3535_v25  ;;  %v1601_v43 = vshrl.u32 %v820_v35, 16  ;;  %v3882_v42 = vrot.slane %v3091_v33, 6  ;;  %v8522_v37 = vpop.permute.xlu0 %4150  ;;  %v77_v33 = vld [vmem:[%s9389_s0 + $0xe0] sm:$0xf] }
 0x135   :  { %v3217_v27 = vsel %vm3106_vm4, %v3216_v22, %v3215_v36  ;;  %v3539_v41 = vsel %vm3103_vm3, %v3538_v1, %v3537_v14  ;;  %v4945_v31 = vcombine.high %v4944_v60, %v4944_v60  ;;  %v4857_v62 = vsel %vm4851_vm10, %v8458_v48, %v8102_v63  ;;  %v8556_v38 = vpop.permute.xlu1 %4542 }
 0x136   :  { %v8516_v13 = vpack.c.b16 %v3217_v27, %v3217_v27  ;;  %v3541_v23 = vsel %vm3106_vm4, %v3540_v4, %v3539_v41  ;;  %v1924_v8 = vmax.bf16 %v1601_v43, %v820_v35  ;;  %v3881_v22 = vsel %vm3094_vm0, %v3880_v47, %v3089_v21  ;;  %v78_v21 = vld [vmem:[%s9389_s0 + $0xe4] sm:$0xf] }
 0x137   :  { %v8524_v39 = vpack.c.b16 %v3541_v23, %v3541_v23  ;;  %v3884_v1 = vrot.slane %v8484_v46, 5  ;;  %v4952_v61 = vrot.slane %v4944_v60, %v7152_v16  ;;  %v4959_v63 = vrot.slane %v4945_v31, %v7152_v16  ;;  %v79_v46 = vld [vmem:[%s9389_s0 + $0xe8] sm:$0xf] }
 0x138   :  { %9407 = vst [vmem:[#allocation6_spill] sm:$0xff] %v8516_v13  ;;  %4160 = vrot.lane.b32.xlu0 %v8516_v13, %s7077_s25  ;;  %v4882_v48 = vsel %vm4876_vm11, %v4857_v62, %v8338_v58  ;;  %v3883_v4 = vsel %vm3097_vm1, %v3882_v42, %v3881_v22  ;;  %v3750_v51 = vrot.slane %v1924_v8, %v7152_v16  ;;  %v3886_v53 = vrot.slane %v3421_v19, 4  ;;  %v8562_v19 = vpop.permute.xlu0 %4304 }
 0x139   :  { %4238 = vrot.lane.b32.xlu1 %v8524_v39, %s7080_s11  ;;  %v4907_v58 = vsel %vm4901_vm12, %v4882_v48, %v8327_v44  ;;  %v4905_v11 = vsel %vm4901_vm12, %v4880_v0, %v8354_v55  ;;  %v3885_v20 = vsel %vm3100_vm2, %v3884_v1, %v3883_v4  ;;  %v113_v36 = vmax.bf16 %v79_v46, %v77_v33 }
 0x13a   :  { %v4990_v5 = vrot.slane %v4907_v58, %v7152_v16  ;;  %v4967_v35 = vrot.slane %v4905_v11, %v7152_v16  ;;  %v3757_v25 = vrot.slane %v3750_v51, %v7152_v16  ;;  %v114_v14 = vmax.bf16 %v80_v49, %v78_v21  ;;  %v8582_v21 = vpop.permute.xlu1 %4618 }
 0x13b   :  { %v4960_v44 = vcombine.high %v4952_v61, %v4952_v61  ;;  %v5226_v60 = vcombine.low %v4952_v61, %v4959_v63  ;;  %v827_v41 = vrot.slane %v113_v36, %v7152_v16  ;;  %v3887_v42 = vsel %vm3103_vm3, %v3886_v53, %v3885_v20  ;;  %v7068_v36 = vld [vmem:[%s9390_s1] sm:$0xff]  }
 0x13c   :  { %4236 = vrot.lane.b32.xlu0 %v8407_v28, %s7080_s11  ;;  %v4991_v43 = vcombine.high %v4990_v5, %v4990_v5  ;;  %v4968_v55 = vcombine.high %v4967_v35, %v4967_v35  ;;  %v3769_v0 = vunpack.c.l.b16 %v3757_v25  ;;  %v4975_v27 = vrot.slane %v4967_v35, %v7152_v16 }
 0x13d   :  { %4314 = vrot.lane.b32.xlu1 %v8412_v30, %s7082_s6  ;;  %v851_v47 = vrot.slane %v114_v14, %v7152_v16  ;;  %v8571_v23 = vrot.slane %v4990_v5, %v7152_v16  ;;  %v828_v33 = vcombine.high %v827_v41, %v827_v41  ;;  %v835_v61 = vrot.slane %v827_v41, %v7152_v16 }
 0x13e   :  { %v5005_v31 = vrot.slane %v4991_v43, %v7152_v16  ;;  %v4982_v62 = vrot.slane %v4968_v55, %v7152_v16  ;;  %v3888_v8 = vrot.slane %v3769_v0, 3  ;;  %v4983_v22 = vcombine.high %v4975_v27, %v4975_v27 }
 0x13f   :  { %v5227_v1 = vcombine.low %v4960_v44, %v4975_v27  ;;  %v852_v63 = vcombine.high %v851_v47, %v851_v47  ;;  %v859_v48 = vrot.slane %v851_v47, %v7152_v16  ;;  %v4729_v4 = vsel %vm4714_vm5, %v7448_v57, %v8345_v29  ;;  %v8598_v29 = vpop.permute.xlu0 %4540 }
 0x140   :  { %4312 = vrot.lane.b32.xlu0 %v8314_v9, %s7082_s6  ;;  %v5236_v46 = vrot.slane %v5226_v60, %v7152_v16  ;;  %v3889_v49 = vsel %vm3106_vm4, %v3888_v8, %v3887_v42  ;;  %v5229_v9 = vcombine.low %v8571_v23, %v5005_v31  ;;  %v842_v51 = vrot.slane %v828_v33, %v7152_v16  ;;  %v8612_v31 = vpop.permute.xlu1 %4544  ;;  %v7069_v33 = vld [vmem:[%s9390_s1 + $0x8] sm:$0xff]  }
 0x141   :  { %4550 = vrot.lane.b32.xlu1 %v8436_v15, %s7078_s26  ;;  %v8590_v58 = vpack.c.b16 %v3889_v49, %v3889_v49  ;;  %v843_v11 = vcombine.high %v835_v61, %v835_v61  ;;  %v866_v53 = vrot.slane %v852_v63, %v7152_v16  ;;  %v8596_v57 = vsel %vm4714_vm5, %v7375_v12, %v8375_v3 }
 0x142   :  { %v8600_v5 = vcombine.low %v4982_v62, %v4983_v22  ;;  %v5243_v35 = vrot.slane %v5227_v1, %v7152_v16  ;;  %v844_v25 = vcombine.high %v842_v51, %v842_v51  ;;  %v1606_v20 = vshrl.u32 %v835_v61, 16 }
 0x143   :  { %v1611_v14 = vshrl.u32 %v842_v51, 16  ;;  %v1616_v44 = vshrl.u32 %v843_v11, 16  ;;  %v1626_v60 = vshrl.u32 %v859_v48, 16  ;;  %v1631_v12 = vshrl.u32 %v866_v53, 16 }
 0x144   :  { %4316 = vrot.lane.b32.xlu0 %v8590_v58, %s7082_s6  ;;  %v8609_v3 = vrot.slane %v5229_v9, %v7152_v16  ;;  %v1621_v43 = vshrl.u32 %v844_v25, 16  ;;  %v1925_v55 = vmax.bf16 %v1606_v20, %v835_v61  ;;  %v9400_v42 = vmov 0.0  }
 0x145   :  { %v1926_v0 = vmax.bf16 %v1611_v14, %v842_v51  ;;  %v1927_v27 = vmax.bf16 %v1616_v44, %v843_v11  ;;  %v1929_v41 = vmax.bf16 %v1626_v60, %v859_v48  ;;  %v1930_v47 = vmax.bf16 %v1631_v12, %v866_v53  ;;  %7011 = vmatprep.subr.bf16.mxu0 %v9400_v42  ;;  %v8626_v51 = vpop.permute.xlu0 %4306 }
 0x146   :  { %v1928_v8 = vmax.bf16 %v1621_v43, %v844_v25  ;;  %v4028_v22 = vrot.slane %v1925_v55, %v7152_v16  ;;  %7012 = vmatpush3.bf16.msra.mxu0 %v7068_v36  ;;  %v867_v1 = vcombine.high %v859_v48, %v859_v48  ;;  %v8628_v11 = vcombine.low %v5236_v46, %v5243_v35 }
 0x147   :  { %v4042_v61 = vrot.slane %v1926_v0, %v7152_v16  ;;  %v4056_v63 = vrot.slane %v1927_v27, %v7152_v16  ;;  %v4084_v49 = vrot.slane %v1929_v41, %v7152_v16  ;;  %v4098_v9 = vrot.slane %v1930_v47, %v7152_v16  ;;  %7013 = vmatprep.subr.bf16.mxu0 %v9400_v42  ;;  %v8645_v47 = vpop.permute.xlu1 %4698 }
 0x148   :  { %4552 = vrot.lane.b32.xlu0 %v8516_v13, %s7078_s26  ;;  %v4035_v48 = vrot.slane %v4028_v22, %v7152_v16  ;;  %v4070_v25 = vrot.slane %v1928_v8, %v7152_v16  ;;  %v1636_v20 = vshrl.u32 %v867_v1, 16  ;;  %v8640_v46 = vsel %vm4751_vm6, %v4729_v4, %v8371_v45 }
 0x149   :  { %v4049_v36 = vrot.slane %v4042_v61, %v7152_v16  ;;  %v4063_v14 = vrot.slane %v4056_v63, %v7152_v16  ;;  %v4091_v44 = vrot.slane %v4084_v49, %v7152_v16  ;;  %v4105_v60 = vrot.slane %v4098_v9, %v7152_v16  ;;  %v8648_v63 = vpop.permute.xlu0 %4620 }
 0x14a   :  { %v4077_v12 = vrot.slane %v4070_v25, %v7152_v16  ;;  %v4112_v43 = vunpack.c.l.b16 %v4035_v48  ;;  %v1931_v35 = vmax.bf16 %v1636_v20, %v867_v1  ;;  %7014 = vmatpush3.bf16.msra.mxu0 %v7069_v33  ;;  %v868_v61 = vcombine.high %v866_v53, %v866_v53 }
 0x14b   :  { %v4113_v55 = vunpack.c.l.b16 %v4049_v36  ;;  %v4114_v0 = vunpack.c.l.b16 %v4063_v14  ;;  %v4116_v27 = vunpack.c.l.b16 %v4091_v44  ;;  %v4117_v41 = vunpack.c.l.b16 %v4105_v60  ;;  %7015 = vmatprep.subr.bf16.mxu0 %v9400_v42 }
 0x14c   :  { %4628 = vrot.lane.b32.xlu0 %v8407_v28, %s7083_s7  ;;  %v4115_v8 = vunpack.c.l.b16 %v4077_v12  ;;  %v4186_v22 = vrot.slane %v1931_v35, %v7152_v16  ;;  %vm5477_vm13 = vcmask 1041408   ;;  %v1641_v14 = vshrl.u32 %v868_v61, 16 }
 0x14d   :  { %v4128_v45 = vrot.slane %v4113_v55, 7  ;;  %v4130_v4 = vrot.slane %v4114_v0, 6  ;;  %v4134_v1 = vrot.slane %v4116_v27, 4  ;;  %v4136_v33 = vrot.slane %v4117_v41, 3 }
 0x14e   :  { %v4132_v49 = vrot.slane %v4115_v8, 5  ;;  %v4193_v9 = vrot.slane %v4186_v22, %v7152_v16  ;;  %v4206_v48 = vrot.slane %v4114_v0, 7  ;;  %v4208_v28 = vrot.slane %v4115_v8, 6  ;;  %v7070_v22 = vld [vmem:[%s9390_s1 + $0x10] ss:$0 sps:$4 sm:$0x33]  }
 0x14f   :  { %v4129_v25 = vsel %vm3094_vm0, %v4128_v45, %v4112_v43  ;;  %v4210_v20 = vrot.slane %v4116_v27, 5  ;;  %v4212_v36 = vrot.slane %v4117_v41, 4  ;;  %v4284_v12 = vrot.slane %v4115_v8, 7  ;;  %v8659_v43 = vpop.permute.xlu1 %3568 }
 0x150   :  { %v4131_v44 = vsel %vm3097_vm1, %v4130_v4, %v4129_v25  ;;  %v4195_v53 = vunpack.c.l.b16 %v4193_v9  ;;  %v4207_v60 = vsel %vm3094_vm0, %v4206_v48, %v4113_v55  ;;  %v1932_v62 = vmax.bf16 %v1641_v14, %v868_v61  ;;  %v4697_v48 = vpop.permute.xlu0 %4696 }
 0x151   :  { %v4133_v35 = vsel %vm3100_vm2, %v4132_v49, %v4131_v44  ;;  %v4209_v42 = vsel %vm3097_vm1, %v4208_v28, %v4207_v60  ;;  %v4286_v13 = vrot.slane %v4116_v27, 6  ;;  %v4285_v55 = vsel %vm3094_vm0, %v4284_v12, %v4114_v0  ;;  %v82_v44 = vld [vmem:[%s9389_s0 + $0xf4] sm:$0xf] }
 0x152   :  { %v4135_v45 = vsel %vm3103_vm3, %v4134_v1, %v4133_v35  ;;  %v4211_v4 = vsel %vm3100_vm2, %v4210_v20, %v4209_v42  ;;  %v4214_v9 = vrot.slane %v4195_v53, 3  ;;  %v4264_v61 = vrot.slane %v1932_v62, %v7152_v16  ;;  %v83_v62 = vld [vmem:[%s9389_s0 + $0xf8] sm:$0xf] }
 0x153   :  { %v4137_v8 = vsel %vm3106_vm4, %v4136_v33, %v4135_v45  ;;  %v4213_v49 = vsel %vm3103_vm3, %v4212_v36, %v4211_v4  ;;  %v4287_v27 = vsel %vm3097_vm1, %v4286_v13, %v4285_v55  ;;  %v4288_v14 = vrot.slane %v4117_v41, 5  ;;  %v81_v13 = vld [vmem:[%s9389_s0 + $0xf0] sm:$0xf]  ;;  %v8709_v35 = vpop.permute.xlu1 %3914 }
 0x154   :  { %v8668_v28 = vpack.c.b16 %v4137_v8, %v4137_v8  ;;  %v4215_v25 = vsel %vm3106_vm4, %v4214_v9, %v4213_v49  ;;  %v4290_v1 = vrot.slane %v4195_v53, 4  ;;  %v4759_v42 = vsel %vm4751_vm6, %v8596_v57, %v8405_v52  ;;  %v84_v53 = vld [vmem:[%s9389_s0 + $0xfc] sm:$0xf]  ;;  %v8718_v8 = vpop.permute.xlu0 %3566 }
 0x155   :  { %v8674_v0 = vpack.c.b16 %v4215_v25, %v4215_v25  ;;  %v4271_v33 = vrot.slane %v4264_v61, %v7152_v16  ;;  %v5479_v20 = vsel %vm5477_vm13, %v7070_v22, 0  ;;  %v4784_v52 = vsel %vm4776_vm7, %v4759_v42, %v8396_v24 }
 0x156   :  { %4554 = vrot.lane.b32.xlu1 %v8668_v28, %s7078_s26  ;;  %v4289_v57 = vsel %vm3100_vm2, %v4288_v14, %v4287_v27  ;;  %7016 = vmatpush3.bf16.msra.mxu0 %v5479_v20  ;;  %v9408_v41 = vrot.slane %v8600_v5, %v7152_v16  ;;  %v4786_v12 = vsel %vm4776_vm7, %v8640_v46, %v8472_v54  ;;  %vm7086_vm14 = vmmov 0  }
 0x157   :  { %4632 = vrot.lane.b32.xlu0 %v8674_v0, %s7083_s7  ;;  %v4273_v24 = vunpack.c.l.b16 %v4271_v33  ;;  %v4291_v60 = vsel %vm3103_vm3, %v4290_v1, %v4289_v57  ;;  %v9409_v5 = vmov 0.0   ;;  %vm5461_vm15 = vcmask 293888   ;;  %v8743_v20 = vpop.permute.xlu1 %4700 }
 0x158   :  { %v5259_v36 = vcombine.low %v9408_v41, %v8609_v3  ;;  %7017 = vmatprep.mubr.msk.bf16.mxu0 %vm7086_vm14, %v9409_v5  ;;  %v5266_v3 = vrot.slane %v8628_v11, %v7152_v16  ;;  %v4811_v45 = vsel %vm4801_vm8, %v4786_v12, %v8460_v26  ;;  %v4809_v4 = vsel %vm4801_vm8, %v4784_v52, %v8494_v32 }
 0x159   :  { %v4292_v9 = vrot.slane %v4273_v24, 3  ;;  %v4834_v54 = vsel %vm4826_vm9, %v4809_v4, %v8490_v50  ;;  %v115_v46 = vmax.bf16 %v83_v62, %v81_v13  ;;  %v116_v55 = vmax.bf16 %v84_v53, %v82_v44 }
 0x15a   :  { %v5273_v22 = vrot.slane %v5259_v36, %v7152_v16  ;;  %4630 = vrot.lane.b32.xlu1 %v8524_v39, %s7083_s7  ;;  %v4836_v49 = vsel %vm4826_vm9, %v4811_v45, %v8562_v19  ;;  %v4859_v26 = vsel %vm4851_vm10, %v4834_v54, %v8598_v29  ;;  %v4732_v25 = vsel %vm4714_vm5, %v7768_v2, %v8444_v7 }
 0x15b   :  { %v4293_v32 = vsel %vm3106_vm4, %v4292_v9, %v4291_v60  ;;  %4708 = vrot.lane.b32.xlu0 %v8590_v58, %s7084_s8  ;;  %v875_v50 = vrot.slane %v115_v46, %v7152_v16  ;;  %v899_v61 = vrot.slane %v116_v55, %v7152_v16  ;;  %v4861_v27 = vsel %vm4851_vm10, %v4836_v49, %v8556_v38 }
 0x15c   :  { %v5274_v11 = vcombine.low %v5266_v3, %v5273_v22  ;;  %v4884_v19 = vsel %vm4876_vm11, %v4859_v26, %v8582_v21  ;;  %v4886_v29 = vsel %vm4876_vm11, %v4861_v27, %v8648_v63  ;;  %v4295_v2 = vpack.c.b16 %v4293_v32, %v4293_v32  ;;  %v8771_v9 = vpop.permute.xlu1 %4154 }
 0x15d   :  { %v876_v14 = vcombine.high %v875_v50, %v875_v50  ;;  %v883_v1 = vrot.slane %v875_v50, %v7152_v16  ;;  %v900_v42 = vcombine.high %v899_v61, %v899_v61  ;;  %v907_v33 = vrot.slane %v899_v61, %v7152_v16 }
 0x15e   :  { %7018 = vmatmul.mubr.msk.bf16.vlgmr.msra.gmra.mrb[0].mxu0 %vm5461_vm15, %v5274_v11  ;;  %4706 = vrot.lane.b32.xlu1 %v8412_v30, %s7084_s8  ;;  %v8751_v7 = vsel %vm4751_vm6, %v4732_v25, %v8434_v59  ;;  %v4911_v38 = vsel %vm4901_vm12, %v4886_v29, %v8645_v47  ;;  %v4909_v21 = vsel %vm4901_vm12, %v4884_v19, %v4697_v48  ;;  %v8760_v30 = vpop.permute.xlu0 %4622 }
 0x15f   :  { %7021 = vmatprep.mubr.msk.bf16.mxu0 %vm7086_vm14, %v9409_v5  ;;  %3576 = vrot.lane.b32.xlu0 %v8524_v39, %s7079_s10  ;;  %v890_v63 = vrot.slane %v876_v14, %v7152_v16  ;;  %v891_v13 = vcombine.high %v883_v1, %v883_v1  ;;  %v914_v62 = vrot.slane %v900_v42, %v7152_v16  ;;  %v1646_v52 = vshrl.u32 %v883_v1, 16  ;;  %s7088_s10 = smov 48  }
 0x160   :  { %v1666_v57 = vshrl.u32 %v907_v33, 16  ;;  %v915_v41 = vcombine.high %v907_v33, %v907_v33  ;;  %v8763_v59 = vrot.slane %v4911_v38, %v7152_v16  ;;  %v8766_v47 = vrot.slane %v4909_v21, %v7152_v16 }
 0x161   :  { %v892_v48 = vcombine.high %v890_v63, %v890_v63  ;;  %v1651_v36 = vshrl.u32 %v890_v63, 16  ;;  %v1656_v44 = vshrl.u32 %v891_v13, 16  ;;  %v1671_v39 = vshrl.u32 %v914_v62, 16 }
 0x162   :  { %4710 = vrot.lane.b32.xlu1 %v4295_v2, %s7084_s8  ;;  %v1933_v53 = vmax.bf16 %v1646_v52, %v883_v1  ;;  %v1937_v24 = vmax.bf16 %v1666_v57, %v907_v33  ;;  %v1676_v60 = vshrl.u32 %v915_v41, 16  ;;  %v916_v12 = vcombine.high %v914_v62, %v914_v62 }
 0x163   :  { %4162 = vrot.lane.b32.xlu0 %v8668_v28, %s7077_s25  ;;  %v1661_v3 = vshrl.u32 %v892_v48, 16  ;;  %v1934_v22 = vmax.bf16 %v1651_v36, %v890_v63  ;;  %v1935_v45 = vmax.bf16 %v1656_v44, %v891_v13  ;;  %v1938_v4 = vmax.bf16 %v1671_v39, %v914_v62  ;;  %v8778_v28 = vpop.permute.xlu0 %3916 }
 0x164   :  { %v4422_v54 = vrot.slane %v1933_v53, %v7152_v16  ;;  %v4478_v46 = vrot.slane %v1937_v24, %v7152_v16  ;;  %v1939_v55 = vmax.bf16 %v1676_v60, %v915_v41  ;;  %v1681_v11 = vshrl.u32 %v916_v12, 16 }
 0x165   :  { %v1936_v49 = vmax.bf16 %v1661_v3, %v892_v48  ;;  %v4436_v26 = vrot.slane %v1934_v22, %v7152_v16  ;;  %v4450_v32 = vrot.slane %v1935_v45, %v7152_v16  ;;  %v4492_v50 = vrot.slane %v1938_v4, %v7152_v16 }
 0x166   :  { %3924 = vrot.lane.b32.xlu1 %v8590_v58, %s7081_s12  ;;  %v4429_v61 = vrot.slane %v4422_v54, %v7152_v16  ;;  %v4485_v27 = vrot.slane %v4478_v46, %v7152_v16  ;;  %v4580_v25 = vrot.slane %v1939_v55, %v7152_v16  ;;  %v1940_v19 = vmax.bf16 %v1681_v11, %v916_v12 }
 0x167   :  { %4318 = vrot.lane.b32.xlu0 %v4295_v2, %s7082_s6  ;;  %v4443_v29 = vrot.slane %v4436_v26, %v7152_v16  ;;  %v4457_v14 = vrot.slane %v4450_v32, %v7152_v16  ;;  %v4464_v1 = vrot.slane %v1936_v49, %v7152_v16  ;;  %v4499_v42 = vrot.slane %v4492_v50, %v7152_v16  ;;  %v8793_v2 = vpop.permute.xlu1 %4232  ;;  %v8798_v60 = vpop.permute.xlu0 %4152  ;;  %s7089_s6 = smov 64  }
 0x168   :  { %v4506_v33 = vunpack.c.l.b16 %v4429_v61  ;;  %v4510_v38 = vunpack.c.l.b16 %v4485_v27  ;;  %v4587_v58 = vrot.slane %v4580_v25, %v7152_v16  ;;  %v4658_v21 = vrot.slane %v1940_v19, %v7152_v16 }
 0x169   :  { %v4471_v63 = vrot.slane %v4464_v1, %v7152_v16  ;;  %v4507_v13 = vunpack.c.l.b16 %v4443_v29  ;;  %v4508_v62 = vunpack.c.l.b16 %v4457_v14  ;;  %v4511_v52 = vunpack.c.l.b16 %v4499_v42 }
 0x16a   :  { %4240 = vrot.lane.b32.xlu1 %v8674_v0, %s7080_s11  ;;  %v4528_v57 = vrot.slane %v4510_v38, 4  ;;  %v4589_v41 = vunpack.c.l.b16 %v4587_v58  ;;  %v4604_v48 = vrot.slane %v4510_v38, 5  ;;  %v4665_v36 = vrot.slane %v4658_v21, %v7152_v16 }
 0x16b   :  { %v4509_v44 = vunpack.c.l.b16 %v4471_v63  ;;  %v4522_v39 = vrot.slane %v4507_v13, 7  ;;  %v4524_v53 = vrot.slane %v4508_v62, 6  ;;  %v4530_v24 = vrot.slane %v4511_v52, 3  ;;  %v4311_v25 = vpop.permute.xlu1 %4310  ;;  %v8815_v21 = vpop.permute.xlu0 %4230 }
 0x16c   :  { %v4600_v12 = vrot.slane %v4508_v62, 7  ;;  %v4606_v3 = vrot.slane %v4511_v52, 4  ;;  %v4608_v22 = vrot.slane %v4589_v41, 3  ;;  %v4667_v45 = vunpack.c.l.b16 %v4665_v36 }
 0x16d   :  { %v4523_v4 = vsel %vm3094_vm0, %v4522_v39, %v4506_v33  ;;  %v4526_v54 = vrot.slane %v4509_v44, 5  ;;  %v4602_v46 = vrot.slane %v4509_v44, 6  ;;  %v4678_v0 = vrot.slane %v4509_v44, 7 }
 0x16e   :  { %v4525_v55 = vsel %vm3097_vm1, %v4524_v53, %v4523_v4  ;;  %v4601_v11 = vsel %vm3094_vm0, %v4600_v12, %v4507_v13  ;;  %v4680_v49 = vrot.slane %v4510_v38, 6  ;;  %v4682_v26 = vrot.slane %v4511_v52, 5 }
 0x16f   :  { %v4527_v32 = vsel %vm3100_vm2, %v4526_v54, %v4525_v55  ;;  %v4603_v50 = vsel %vm3097_vm1, %v4602_v46, %v4601_v11  ;;  %v4679_v61 = vsel %vm3094_vm0, %v4678_v0, %v4508_v62  ;;  %v4684_v27 = vrot.slane %v4589_v41, 4  ;;  %v4309_v4 = vpop.permute.xlu0 %4308 }
 0x170   :  { %v4529_v19 = vsel %vm3103_vm3, %v4528_v57, %v4527_v32  ;;  %v4605_v29 = vsel %vm3100_vm2, %v4604_v48, %v4603_v50  ;;  %v4681_v14 = vsel %vm3097_vm1, %v4680_v49, %v4679_v61  ;;  %v4686_v1 = vrot.slane %v4667_v45, 3 }
 0x171   :  { %v4788_v42 = vsel %vm4776_vm7, %v8751_v7, %v8522_v37  ;;  %v4531_v33 = vsel %vm3106_vm4, %v4530_v24, %v4529_v19  ;;  %v4607_v38 = vsel %vm3103_vm3, %v4606_v3, %v4605_v29  ;;  %v4683_v58 = vsel %vm3100_vm2, %v4682_v26, %v4681_v14  ;;  %v9411_v29 = vld [vmem:[#allocation3_spill] sm:$0xff] }
 0x172   :  { %v4533_v63 = vpack.c.b16 %v4531_v33, %v4531_v33  ;;  %v4609_v13 = vsel %vm3106_vm4, %v4608_v22, %v4607_v38  ;;  %v4685_v62 = vsel %vm3103_vm3, %v4684_v27, %v4683_v58  ;;  %v5037_v52 = vcombine.high %v8763_v59, %v8763_v59 }
 0x173   :  { %v4813_v57 = vsel %vm4801_vm8, %v4788_v42, %v8512_v6  ;;  %v4611_v37 = vpack.c.b16 %v4609_v13, %v4609_v13  ;;  %v4687_v7 = vsel %vm3106_vm4, %v4686_v1, %v4685_v62  ;;  %v5014_v41 = vcombine.high %v8766_v47, %v8766_v47  ;;  %v4547_v42 = vpop.permute.xlu0 %4546 }
 0x174   :  { %4556 = vrot.lane.b32.xlu1 %v4533_v63, %s7078_s26  ;;  %v4689_v48 = vpack.c.b16 %v4687_v7, %v4687_v7  ;;  %v4838_v36 = vsel %vm4826_vm9, %v4813_v57, %v8626_v51  ;;  %v5021_v44 = vrot.slane %v8766_v47, %v7152_v16  ;;  %v1366_v39 = vshrl.u32 %v7963_v40, 16 }
 0x175   :  { %4634 = vrot.lane.b32.xlu0 %v4611_v37, %s7083_s7  ;;  %v4863_v6 = vsel %vm4851_vm10, %v4838_v36, %v8612_v31  ;;  %v5028_v53 = vrot.slane %v5014_v41, %v7152_v16  ;;  %v5044_v12 = vrot.slane %v8763_v59, %v7152_v16  ;;  %v5051_v3 = vrot.slane %v5037_v52, %v7152_v16  ;;  %s7090_s7 = smov 56  }
 0x176   :  { %v5029_v22 = vcombine.high %v5021_v44, %v5021_v44  ;;  %v1877_v51 = vmax.bf16 %v1366_v39, %v7963_v40  ;;  %v5006_v47 = vcombine.high %v8571_v23, %v8571_v23  ;;  %v4888_v45 = vsel %vm4876_vm11, %v4863_v6, %v8760_v30 }
 0x177   :  { %v4549_v24 = vpop.permute.xlu1 %4548  ;;  %v4913_v59 = vsel %vm4901_vm12, %v4888_v45, %v8743_v20  ;;  %v9410_v46 = vunpack.c.l.b16 %v7992_v34  ;;  %v4738_v40 = vsel %vm4714_vm5, %v8153_v10, %v8659_v43  ;;  %v5052_v11 = vcombine.high %v5044_v12, %v5044_v12 }
 0x178   :  { %4712 = vrot.lane.b32.xlu1 %v4689_v48, %s7084_s8  ;;  %v5276_v31 = vcombine.low %v5028_v53, %v5029_v22  ;;  %v2523_v54 = vrot.slane %v1877_v51, %v7152_v16  ;;  %v5275_v55 = vcombine.low %v5006_v47, %v5021_v44  ;;  %v5059_v23 = vrot.slane %v4913_v59, %v7152_v16  ;;  %v4625_v44 = vpop.permute.xlu0 %4624 }
 0x179   :  { %v3158_v0 = vrot.slane %v9410_v46, 7  ;;  %v5277_v49 = vcombine.low %v5044_v12, %v5051_v3  ;;  %v4767_v32 = vsel %vm4751_vm6, %v4738_v40, %v8778_v28  ;;  %v3160_v34 = vrot.slane %v8003_v17, 6 }
 0x17a   :  { %v2530_v26 = vrot.slane %v2523_v54, %v7152_v16  ;;  %v5292_v20 = vrot.slane %v5276_v31, %v7152_v16  ;;  %v5067_v50 = vrot.slane %v5059_v23, %v7152_v16  ;;  %v4792_v61 = vsel %vm4776_vm7, %v4767_v32, %v8771_v9  ;;  %v9412_v9 = vld [vmem:[#allocation4_spill] sm:$0xff] }
 0x17b   :  { %v4627_v30 = vpop.permute.xlu1 %4626  ;;  %v3162_v43 = vrot.slane %v8010_v18, 5  ;;  %v4817_v27 = vsel %vm4801_vm8, %v4792_v61, %v8793_v2  ;;  %v5285_v19 = vrot.slane %v5275_v55, %v7152_v16  ;;  %v3164_v14 = vrot.slane %v9411_v29, 4 }
 0x17c   :  { %v3057_v10 = vunpack.c.l.b16 %v2530_v26  ;;  %v5278_v28 = vcombine.low %v5052_v11, %v5067_v50  ;;  %v4842_v1 = vsel %vm4826_vm9, %v4817_v27, %v4311_v25  ;;  %v5299_v33 = vrot.slane %v5277_v49, %v7152_v16  ;;  %v4703_v45 = vpop.permute.xlu0 %4702 }
 0x17d   :  { %v3166_v58 = vrot.slane %v9412_v9, 3  ;;  %v4867_v18 = vsel %vm4851_vm10, %v4842_v1, %v4549_v24  ;;  %v5307_v63 = vcombine.low %v5285_v19, %v5292_v20  ;;  %v5060_v47 = vcombine.high %v5059_v23, %v5059_v23 }
 0x17e   :  { %v3159_v38 = vsel %vm3094_vm0, %v3158_v0, %v3057_v10  ;;  %v5306_v13 = vrot.slane %v5278_v28, %v7152_v16  ;;  %v4892_v62 = vsel %vm4876_vm11, %v4867_v18, %v4627_v30  ;;  %v5075_v0 = vcombine.high %v5067_v50, %v5067_v50 }
 0x17f   :  { %v4705_v17 = vpop.permute.xlu1 %4704  ;;  %v3161_v2 = vsel %vm3097_vm1, %v3160_v34, %v3159_v38  ;;  %v5315_v48 = vrot.slane %v5307_v63, %v7152_v16  ;;  %v5074_v46 = vrot.slane %v5060_v47, %v7152_v16  ;;  %vm6776_vm0 = vcmask 1043456  }
 0x180   :  { %v3163_v52 = vsel %vm3100_vm2, %v3162_v43, %v3161_v2  ;;  %v4917_v25 = vsel %vm4901_vm12, %v4892_v62, %v4705_v17  ;;  %v5308_v37 = vcombine.low %v5299_v33, %v5306_v13  ;;  %v3571_v49 = vpop.permute.xlu0 %3570  ;;  %vm6616_vm1 = vcmask 326656  }
 0x181   :  { %v3165_v57 = vsel %vm3103_vm3, %v3164_v14, %v3163_v52  ;;  %v5105_v39 = vrot.slane %v4917_v25, %v7152_v16  ;;  %vm6633_vm2 = vcmask 392192   ;;  %vm6650_vm3 = vcmask 457728  }
 0x182   :  { %v3167_v7 = vsel %vm3106_vm4, %v3166_v58, %v3165_v57  ;;  %v5322_v36 = vrot.slane %v5308_v37, %v7152_v16  ;;  %vm6667_vm4 = vcmask 523264  }
 0x183   :  { %v3224_v41 = vpack.c.b16 %v3167_v7, %v3167_v7  ;;  %v5106_v3 = vcombine.high %v5105_v39, %v5105_v39  ;;  %v5113_v22 = vrot.slane %v5105_v39, %v7152_v16  ;;  %v3573_v19 = vpop.permute.xlu1 %3572 }
 0x184   :  { %v5323_v53 = vcombine.low %v5315_v48, %v5322_v36  ;;  %v4744_v37 = vsel %vm4714_vm5, %v8273_v56, %v3573_v19  ;;  %v9414_v19 = vld [vmem:[#allocation6_spill] sm:$0xff] }
 0x185   :  { %v4735_v6 = vsel %vm4714_vm5, %v3224_v41, %v8718_v8  ;;  %v5121_v54 = vcombine.high %v5113_v22, %v5113_v22 }
 0x186   :  { %v4765_v24 = vsel %vm4751_vm6, %v4735_v6, %v8709_v35  ;;  %7022 = vmatmul.mubr.msk.bf16.gmra.mrb[4].mxu0 %vm5461_vm15, %v5323_v53 }
 0x187   :  { %v4790_v12 = vsel %vm4776_vm7, %v4765_v24, %v8798_v60  ;;  %7025 = vmatprep.mubr.msk.bf16.mxu0 %vm7086_vm14, %v9409_v5  ;;  %v5120_v60 = vrot.slane %v5106_v3, %v7152_v16 }
 0x188   :  { %v4815_v51 = vsel %vm4801_vm8, %v4790_v12, %v8815_v21 }
 0x189   :  { %v4840_v8 = vsel %vm4826_vm9, %v4815_v51, %v4309_v4  ;;  %v5327_v55 = vcombine.low %v5120_v60, %v5121_v54  ;;  %v5324_v4 = vcombine.low %v5074_v46, %v5075_v0 }
 0x18a   :  { %v4865_v35 = vsel %vm4851_vm10, %v4840_v8, %v4547_v42  ;;  %v3919_v42 = vpop.permute.xlu1 %3918 }
 0x18b   :  { %v4890_v31 = vsel %vm4876_vm11, %v4865_v35, %v4625_v44  ;;  %v5355_v26 = vrot.slane %v5327_v55, %v7152_v16  ;;  %v5334_v34 = vrot.slane %v5324_v4, %v7152_v16  ;;  %v9413_v44 = vld [vmem:[#allocation5_spill] sm:$0xff] }
 0x18c   :  { %v4915_v59 = vsel %vm4901_vm12, %v4890_v31, %v4703_v45  ;;  %v4741_v39 = vsel %vm4714_vm5, %v9413_v44, %v3571_v49 }
 0x18d   :  { %v5082_v21 = vrot.slane %v4915_v59, %v7152_v16  ;;  %v4769_v53 = vsel %vm4751_vm6, %v4741_v39, %v3919_v42 }
 0x18f   :  { %v5083_v40 = vcombine.high %v5082_v21, %v5082_v21  ;;  %v5090_v23 = vrot.slane %v5082_v21, %v7152_v16 }
 0x191   :  { %v5097_v30 = vrot.slane %v5083_v40, %v7152_v16  ;;  %v5098_v11 = vcombine.high %v5090_v23, %v5090_v23 }
 0x193   :  { %v5325_v32 = vcombine.low %v5090_v23, %v5097_v30  ;;  %v5326_v20 = vcombine.low %v5098_v11, %v5113_v22  ;;  %v3575_v43 = vpop.permute.xlu0 %3574 }
 0x194   :  { %v3923_v33 = vpop.permute.xlu1 %3922  ;;  %v4747_v22 = vsel %vm4714_vm5, %v8436_v15, %v3575_v43 }
 0x195   :  { %v5341_v61 = vrot.slane %v5325_v32, %v7152_v16  ;;  %v5348_v50 = vrot.slane %v5326_v20, %v7152_v16  ;;  %v4773_v45 = vsel %vm4751_vm6, %v4747_v22, %v3923_v33 }
 0x197   :  { %v5356_v10 = vcombine.low %v5334_v34, %v5341_v61  ;;  %v5357_v27 = vcombine.low %v5348_v50, %v5355_v26  ;;  %v3921_v1 = vpop.permute.xlu0 %3920 }
 0x198   :  { %v4159_v9 = vpop.permute.xlu1 %4158  ;;  %v4771_v7 = vsel %vm4751_vm6, %v4744_v37, %v3921_v1 }
 0x199   :  { %v5364_v29 = vrot.slane %v5356_v10, %v7152_v16  ;;  %v5371_v14 = vrot.slane %v5357_v27, %v7152_v16  ;;  %v4796_v48 = vsel %vm4776_vm7, %v4771_v7, %v4159_v9 }
 0x19b   :  { %v5372_v28 = vcombine.low %v5364_v29, %v5371_v14  ;;  %v4157_v17 = vpop.permute.xlu0 %4156 }
 0x19c   :  { %v4235_v18 = vpop.permute.xlu1 %4234  ;;  %v4794_v12 = vsel %vm4776_vm7, %v4769_v53, %v4157_v17 }
 0x19d   :  { %7026 = vmatmul.mubr.msk.bf16.gmra.mrb[8].mxu0 %vm5461_vm15, %v5372_v28  ;;  %v4819_v51 = vsel %vm4801_vm8, %v4794_v12, %v4235_v18 }
 0x19e   :  { %7029 = vmatprep.mubr.msk.bf16.mxu0 %vm7086_vm14, %v9409_v5 }
 0x1aa   :  { %v4161_v38 = vpop.permute.xlu0 %4160 }
 0x1ab   :  { %v4239_v2 = vpop.permute.xlu1 %4238  ;;  %v4798_v60 = vsel %vm4776_vm7, %v4773_v45, %v4161_v38 }
 0x1ac   :  { %v4823_v46 = vsel %vm4801_vm8, %v4798_v60, %v4239_v2 }
 0x1ae   :  { %v4237_v58 = vpop.permute.xlu0 %4236 }
 0x1af   :  { %v4315_v62 = vpop.permute.xlu1 %4314  ;;  %v4821_v6 = vsel %vm4801_vm8, %v4796_v48, %v4237_v58 }
 0x1b0   :  { %v4846_v24 = vsel %vm4826_vm9, %v4821_v6, %v4315_v62 }
 0x1b2   :  { %v4313_v63 = vpop.permute.xlu0 %4312 }
 0x1b3   :  { %v4551_v25 = vpop.permute.xlu1 %4550  ;;  %v4844_v35 = vsel %vm4826_vm9, %v4819_v51, %v4313_v63 }
 0x1b4   :  { %v4869_v54 = vsel %vm4851_vm10, %v4844_v35, %v4551_v25 }
 0x1b6   :  { %v4317_v13 = vpop.permute.xlu0 %4316 }
 0x1b7   :  { %v4848_v21 = vsel %vm4826_vm9, %v4823_v46, %v4317_v13 }
 0x1ba   :  { %v4553_v52 = vpop.permute.xlu0 %4552 }
 0x1bb   :  { %v4871_v3 = vsel %vm4851_vm10, %v4846_v24, %v4553_v52 }
 0x1be   :  { %v4629_v57 = vpop.permute.xlu0 %4628 }
 0x1bf   :  { %v4894_v15 = vsel %vm4876_vm11, %v4869_v54, %v4629_v57 }
 0x1c8   :  { %v4555_v41 = vpop.permute.xlu1 %4554 }
 0x1c9   :  { %v4633_v36 = vpop.permute.xlu0 %4632  ;;  %v4873_v4 = vsel %vm4851_vm10, %v4848_v21, %v4555_v41 }
 0x1ca   :  { %v4898_v11 = vsel %vm4876_vm11, %v4873_v4, %v4633_v36 }
 0x1cc   :  { %v4631_v56 = vpop.permute.xlu1 %4630 }
 0x1cd   :  { %v4896_v47 = vsel %vm4876_vm11, %v4871_v3, %v4631_v56  ;;  %v4709_v8 = vpop.permute.xlu0 %4708 }
 0x1ce   :  { %v4921_v31 = vsel %vm4901_vm12, %v4896_v47, %v4709_v8 }
 0x1cf   :  { %v5151_v59 = vrot.slane %v4921_v31, %v7152_v16 }
 0x1d0   :  { %v4707_v0 = vpop.permute.xlu1 %4706 }
 0x1d1   :  { %v4919_v55 = vsel %vm4901_vm12, %v4894_v15, %v4707_v0  ;;  %v5152_v40 = vcombine.high %v5151_v59, %v5151_v59  ;;  %v5159_v23 = vrot.slane %v5151_v59, %v7152_v16  ;;  %v3577_v50 = vpop.permute.xlu0 %3576  ;;  %v8976_v15 = vld [vmem:[%s9391_s2] ss:$0 sm:$0xff]  ;;  %s7087_s2 = smov 40  }
 0x1d2   :  { %v5128_v30 = vrot.slane %v4919_v55, %v7152_v16  ;;  %v4750_v29 = vsel %vm4714_vm5, %v9414_v19, %v3577_v50  ;;  %vm6769_vm5 = vcmask 588800  }
 0x1d3   :  { %v5166_v20 = vrot.slane %v5152_v40, %v7152_v16  ;;  %v5167_v34 = vcombine.high %v5159_v23, %v5159_v23 }
 0x1d4   :  { %v5129_v49 = vcombine.high %v5128_v30, %v5128_v30  ;;  %v5136_v26 = vrot.slane %v5128_v30, %v7152_v16  ;;  %v4711_v32 = vpop.permute.xlu1 %4710 }
 0x1d5   :  { %v4923_v61 = vsel %vm4901_vm12, %v4898_v11, %v4711_v32  ;;  %v5375_v42 = vcombine.low %v5166_v20, %v5167_v34  ;;  %v4163_v18 = vpop.permute.xlu0 %4162 }
 0x1d6   :  { %v5143_v10 = vrot.slane %v5129_v49, %v7152_v16  ;;  %v5144_v43 = vcombine.high %v5136_v26, %v5136_v26  ;;  %v5174_v27 = vrot.slane %v4923_v61, %v7152_v16 }
 0x1d7   :  { %v5397_v13 = vrot.slane %v5375_v42, %v7152_v16 }
 0x1d8   :  { %v5373_v14 = vcombine.low %v5136_v26, %v5143_v10  ;;  %v5175_v28 = vcombine.high %v5174_v27, %v5174_v27  ;;  %v5374_v1 = vcombine.low %v5144_v43, %v5159_v23  ;;  %v5182_v17 = vrot.slane %v5174_v27, %v7152_v16  ;;  %v3925_v9 = vpop.permute.xlu1 %3924 }
 0x1d9   :  { %v4775_v58 = vsel %vm4751_vm6, %v4750_v29, %v3925_v9  ;;  %v4319_v41 = vpop.permute.xlu0 %4318 }
 0x1da   :  { %v5189_v33 = vrot.slane %v5175_v28, %v7152_v16  ;;  %v5390_v38 = vrot.slane %v5374_v1, %v7152_v16  ;;  %v5383_v63 = vrot.slane %v5373_v14, %v7152_v16  ;;  %v4800_v25 = vsel %vm4776_vm7, %v4775_v58, %v4163_v18 }
 0x1db   :  { %v5190_v51 = vcombine.high %v5182_v17, %v5182_v17 }
 0x1dc   :  { %v5376_v2 = vcombine.low %v5182_v17, %v5189_v33  ;;  %v5405_v52 = vcombine.low %v5383_v63, %v5390_v38  ;;  %v4241_v57 = vpop.permute.xlu1 %4240 }
 0x1dd   :  { %v4825_v7 = vsel %vm4801_vm8, %v4800_v25, %v4241_v57 }
 0x1de   :  { %v5404_v62 = vrot.slane %v5376_v2, %v7152_v16  ;;  %v5413_v48 = vrot.slane %v5405_v52, %v7152_v16  ;;  %v4850_v44 = vsel %vm4826_vm9, %v4825_v7, %v4319_v41 }
 0x1e0   :  { %v5406_v37 = vcombine.low %v5397_v13, %v5404_v62 }
 0x1e2   :  { %v5420_v36 = vrot.slane %v5406_v37, %v7152_v16 }
 0x1e4   :  { %v5421_v39 = vcombine.low %v5413_v48, %v5420_v36 }
 0x1e6   :  { %v4557_v6 = vpop.permute.xlu1 %4556  ;;  %7030 = vmatmul.mubr.msk.bf16.gmra.mrb[12].mxu0 %vm5461_vm15, %v5421_v39 }
 0x1e7   :  { %v4875_v53 = vsel %vm4851_vm10, %v4850_v44, %v4557_v6  ;;  %v4635_v24 = vpop.permute.xlu0 %4634  ;;  %7033 = vmatprep.mubr.msk.bf16.mxu0 %vm7086_vm14, %v9409_v5 }
 0x1e8   :  { %v4900_v12 = vsel %vm4876_vm11, %v4875_v53, %v4635_v24 }
 0x1ea   :  { %v4713_v3 = vpop.permute.xlu1 %4712 }
 0x1eb   :  { %v4925_v56 = vsel %vm4901_vm12, %v4900_v12, %v4713_v3 }
 0x1ec   :  { %v5197_v22 = vrot.slane %v4925_v56, %v7152_v16 }
 0x1ee   :  { %v5198_v47 = vcombine.high %v5197_v22, %v5197_v22  ;;  %v5205_v8 = vrot.slane %v5197_v22, %v7152_v16 }
 0x1f0   :  { %v5212_v45 = vrot.slane %v5198_v47, %v7152_v16  ;;  %v5213_v35 = vcombine.high %v5205_v8, %v5205_v8  ;;  %v5422_v31 = vcombine.low %v5190_v51, %v5205_v8 }
 0x1f2   :  { %v5423_v60 = vcombine.low %v5212_v45, %v5213_v35  ;;  %v5430_v54 = vrot.slane %v5422_v31, %v7152_v16 }
 0x1f4   :  { %v5437_v5 = vrot.slane %v5423_v60, %v7152_v16 }
 0x1f6   :  { %v5438_v59 = vcombine.low %v5430_v54, %v5437_v5 }
 0x1f8   :  { %v5445_v46 = vrot.slane %v5438_v59, %v7152_v16 }
 0x1fa   :  { %7034 = vmatmul.mubr.msk.bf16.gmra.mrb[16].mxu0 %vm5461_vm15, %v5445_v46 }
 0x231   :  { %v5515_v0 = vpop.f32.mrb[0].mxu0 }
 0x232   :  { %v5516_v21 = vadd.f32 %v8976_v15, %v5515_v0  ;;  %v7019_v55 = vpop.f32.mrb[1].mxu0 }
 0x233   :  { %v5518_v40 = vpop.f32.mrb[2].mxu0 }
 0x234   :  { %v5519_v23 = vadd.f32 %v8976_v15, %v5518_v40  ;;  %v7020_v4 = vpop.f32.mrb[3].mxu0  ;;  %v5553_v30 = vmax.f32 %v5516_v21, 0.0 }
 0x236   :  { %v5554_v11 = vmax.f32 %v5519_v23, 0.0 }
 0x238   :  { %v5562_v49 = vpack.c.bf16 %v5554_v11, %v5553_v30  ;;  %v6978_v26 = vpack.c.bf16 %v5554_v11, %v5554_v11 }
 0x23a   :  { %v5579_v32 = vrot.slane %v5562_v49, %v7152_v16  ;;  %v5586_v20 = vrot.slane %v6978_v26, %v7152_v16 }
 0x23c   :  { %v5587_v34 = vcombine.high %v5579_v32, %v5579_v32  ;;  %v5588_v61 = vcombine.high %v5586_v20, %v5586_v20  ;;  %v5595_v50 = vrot.slane %v5579_v32, %v7152_v16  ;;  %v5602_v10 = vrot.slane %v5586_v20, %v7152_v16 }
 0x23e   :  { %v5609_v43 = vrot.slane %v5587_v34, %v7152_v16  ;;  %v5616_v27 = vrot.slane %v5588_v61, %v7152_v16  ;;  %v5617_v19 = vcombine.high %v5595_v50, %v5595_v50 }
 0x240   :  { %v6119_v29 = vcombine.low %v5602_v10, %v5616_v27  ;;  %v6104_v14 = vcombine.low %v5609_v43, %v5617_v19  ;;  %v6982_v28 = vcombine.high %v5602_v10, %v5616_v27  ;;  %v5619_v1 = vcombine.high %v5609_v43, %v5609_v43 }
 0x241   :  { %v5933_v63 = vrot.slane %v5616_v27, %v7152_v16  ;;  %v5792_v25 = vcombine.low %v5595_v50, %v5609_v43  ;;  %v5918_v6 = vrot.slane %v5617_v19, %v7152_v16  ;;  %v5620_v8 = vcombine.high %v5616_v27, %v5616_v27 }
 0x242   :  { %v6126_v42 = vrot.slane %v6119_v29, %v7152_v16  ;;  %v6111_v17 = vrot.slane %v6104_v14, %v7152_v16  ;;  %v5807_v33 = vcombine.low %v5619_v1, %v5602_v10  ;;  %v5829_v58 = vrot.slane %v6982_v28, %v7152_v16 }
 0x243   :  { %v9013_v36 = vrot.slane %v5792_v25, %v7152_v16 }
 0x244   :  { %v6133_v38 = vrot.slane %v6126_v42, %v7152_v16  ;;  %v6118_v9 = vrot.slane %v6111_v17, %v7152_v16  ;;  %v5814_v18 = vrot.slane %v5807_v33, %v7152_v16  ;;  %v8998_v13 = vrot.slane %v5829_v58, %v7152_v16 }
 0x245   :  { %v5919_v12 = vcombine.low %v9013_v36, %v5918_v6 }
 0x246   :  { %6226 = vrot.lane.b32.xlu1 %v6133_v38, %s7080_s11  ;;  %6224 = vrot.lane.b32.xlu0 %v6118_v9, %s7080_s11  ;;  %v8995_v2 = vcombine.low %v5814_v18, %v5933_v63  ;;  %v9006_v62 = vrot.slane %v5814_v18, %v7152_v16 }
 0x247   :  { %v5926_v60 = vrot.slane %v5919_v12, %v7152_v16 }
 0x248   :  { %v5941_v63 = vrot.slane %v8995_v2, %v7152_v16 }
 0x249   :  { %v6035_v55 = vshll.u32 %v5926_v60, 16  ;;  %v6033_v10 = vshrl.u32 %v5926_v60, 16 }
 0x24a   :  { %6272 = vrot.lane.b32.xlu1 %v8998_v13, %s7078_s26  ;;  %6376 = vrot.lane.b32.xlu0 %v6133_v38, %s7087_s2 }
 0x24b   :  { %v6037_v11 = vrot.slane %v6035_v55, 1 }
 0x24d   :  { %v6038_v29 = vor.u32 %v6037_v11, %v6033_v10 }
 0x24e   :  { %6422 = vrot.lane.b32.xlu0 %v8998_v13, %s7088_s10 }
 0x252   :  { %6270 = vrot.lane.b32.xlu0 %v9006_v62, %s7078_s26 }
 0x259   :  { %v5523_v52 = vpop.f32.mrb[4].mxu0 }
 0x25a   :  { %v5524_v57 = vadd.f32 %v8976_v15, %v5523_v52  ;;  %v7023_v37 = vpop.f32.mrb[5].mxu0 }
 0x25b   :  { %v5526_v7 = vpop.f32.mrb[6].mxu0 }
 0x25c   :  { %v5527_v41 = vadd.f32 %v8976_v15, %v5526_v7  ;;  %v7024_v48 = vpop.f32.mrb[7].mxu0  ;;  %v5555_v44 = vmax.f32 %v5524_v57, 0.0 }
 0x25d   :  { %v6042_v48 = vshll.u32 %v5941_v63, 16 }
 0x25e   :  { %v5556_v39 = vmax.f32 %v5527_v41, 0.0 }
 0x260   :  { %v5563_v53 = vpack.c.bf16 %v5556_v39, %v5555_v44  ;;  %v6979_v24 = vpack.c.bf16 %v5556_v39, %v5556_v39 }
 0x262   :  { %v5628_v3 = vrot.slane %v5563_v53, %v7152_v16  ;;  %v5635_v56 = vrot.slane %v6979_v24, %v7152_v16 }
 0x264   :  { %v5636_v22 = vcombine.high %v5628_v3, %v5628_v3  ;;  %v5637_v51 = vcombine.high %v5635_v56, %v5635_v56  ;;  %v5644_v47 = vrot.slane %v5628_v3, %v7152_v16  ;;  %v5651_v45 = vrot.slane %v5635_v56, %v7152_v16 }
 0x265   :  { %v6044_v56 = vrot.slane %v6042_v48, 1 }
 0x266   :  { %v5658_v35 = vrot.slane %v5636_v22, %v7152_v16  ;;  %v5948_v31 = vrot.slane %v5644_v47, %v7152_v16  ;;  %v5665_v54 = vrot.slane %v5637_v51, %v7152_v16  ;;  %v6134_v5 = vcombine.low %v5620_v8, %v5644_v47 }
 0x267   :  { %v9026_v21 = vcombine.high %v5651_v45, %v5651_v45  ;;  %v5666_v30 = vcombine.high %v5644_v47, %v5644_v47 }
 0x268   :  { %v6141_v59 = vrot.slane %v6134_v5, %v7152_v16  ;;  %v6984_v46 = vcombine.high %v5644_v47, %v5658_v35  ;;  %v5949_v0 = vcombine.low %v5829_v58, %v5948_v31  ;;  %v6240_v40 = vcombine.low %v5651_v45, %v5665_v54 }
 0x269   :  { %v6346_v49 = vcombine.low %v5665_v54, %v9026_v21  ;;  %v5837_v34 = vcombine.low %v5658_v35, %v5666_v30  ;;  %v5668_v9 = vcombine.high %v5658_v35, %v5658_v35  ;;  %v5669_v7 = vcombine.high %v5665_v54, %v5665_v54 }
 0x26a   :  { %v6148_v23 = vrot.slane %v6141_v59, %v7152_v16  ;;  %v6156_v4 = vrot.slane %v6984_v46, %v7152_v16  ;;  %v9035_v20 = vrot.slane %v6240_v40, %v7152_v16  ;;  %v5956_v44 = vrot.slane %v5949_v0, %v7152_v16 }
 0x26b   :  { %v6353_v28 = vrot.slane %v6346_v49, %v7152_v16  ;;  %v5844_v1 = vrot.slane %v5837_v34, %v7152_v16  ;;  %v5963_v41 = vrot.slane %v5668_v9, %v7152_v16  ;;  %v6040_v35 = vshrl.u32 %v5941_v63, 16 }
 0x26c   :  { %6378 = vrot.lane.b32.xlu1 %v6148_v23, %s7087_s2  ;;  %6228 = vrot.lane.b32.xlu0 %v6148_v23, %s7080_s11  ;;  %v6163_v26 = vrot.slane %v6156_v4, %v7152_v16  ;;  %v6254_v14 = vrot.slane %v9035_v20, %v7152_v16  ;;  %v6049_v22 = vshll.u32 %v5956_v44, 16  ;;  %v6292_v0 = vrot.slane %v9026_v21, %v7152_v16 }
 0x26d   :  { %v6360_v58 = vrot.slane %v6353_v28, %v7152_v16  ;;  %v9049_v18 = vrot.slane %v5844_v1, %v7152_v16  ;;  %v5964_v3 = vcombine.low %v5844_v1, %v5963_v41  ;;  %v6045_v5 = vor.u32 %v6044_v56, %v6040_v35 }
 0x26e   :  { %v6051_v59 = vrot.slane %v6049_v22, 1  ;;  %v6047_v55 = vshrl.u32 %v5956_v44, 16  ;;  %v6293_v40 = vcombine.low %v9035_v20, %v6292_v0 }
 0x26f   :  { %v5971_v46 = vrot.slane %v5964_v3, %v7152_v16 }
 0x270   :  { %v5531_v32 = vpop.f32.mrb[8].mxu0  ;;  %6528 = vrot.lane.b32.xlu0 %v6148_v23, %s7089_s6  ;;  %6230 = vrot.lane.b32.xlu1 %v6163_v26, %s7080_s11  ;;  %v6052_v4 = vor.u32 %v6051_v59, %v6047_v55  ;;  %v6300_v49 = vrot.slane %v6293_v40, %v7152_v16 }
 0x271   :  { %v5532_v61 = vadd.f32 %v8976_v15, %v5531_v32  ;;  %v7027_v50 = vpop.f32.mrb[9].mxu0  ;;  %v6056_v30 = vshll.u32 %v5971_v46, 16  ;;  %v6054_v20 = vshrl.u32 %v5971_v46, 16 }
 0x272   :  { %v5534_v43 = vpop.f32.mrb[10].mxu0  ;;  %v6317_v1 = vshrl.u32 %v6300_v49, 16 }
 0x273   :  { %v5535_v27 = vadd.f32 %v8976_v15, %v5534_v43  ;;  %v7028_v19 = vpop.f32.mrb[11].mxu0  ;;  %v5557_v42 = vmax.f32 %v5532_v61, 0.0  ;;  %v6319_v61 = vshll.u32 %v6300_v49, 16 }
 0x274   :  { %6088 = vrot.lane.b32.xlu0 %v6038_v29, %s7081_s12  ;;  %6276 = vrot.lane.b32.xlu1 %v6254_v14, %s7078_s26 }
 0x275   :  { %v5558_v17 = vmax.f32 %v5535_v27, 0.0  ;;  %v6321_v28 = vrot.slane %v6319_v61, 1 }
 0x277   :  { %v5564_v33 = vpack.c.bf16 %v5558_v17, %v5557_v42  ;;  %v6980_v38 = vpack.c.bf16 %v5558_v17, %v5558_v17 }
 0x278   :  { %6382 = vrot.lane.b32.xlu1 %v6360_v58, %s7087_s2  ;;  %6274 = vrot.lane.b32.xlu0 %v9049_v18, %s7078_s26 }
 0x279   :  { %v5677_v52 = vrot.slane %v5564_v33, %v7152_v16  ;;  %v5684_v25 = vrot.slane %v6980_v38, %v7152_v16  ;;  %v6322_v33 = vor.u32 %v6321_v28, %v6317_v1 }
 0x27b   :  { %v5685_v57 = vcombine.high %v5677_v52, %v5677_v52  ;;  %v9059_v37 = vrot.slane %v5677_v52, %v7152_v16  ;;  %v5700_v2 = vrot.slane %v5684_v25, %v7152_v16  ;;  %v5686_v54 = vcombine.high %v5684_v25, %v5684_v25 }
 0x27c   :  { %6424 = vrot.lane.b32.xlu1 %v9049_v18, %s7088_s10  ;;  %6380 = vrot.lane.b32.xlu0 %v6163_v26, %s7087_s2 }
 0x27d   :  { %v9065_v39 = vrot.slane %v5685_v57, %v7152_v16  ;;  %v6392_v6 = vcombine.low %v5669_v7, %v9059_v37  ;;  %v5978_v8 = vrot.slane %v5700_v2, %v7152_v16  ;;  %v5714_v23 = vrot.slane %v5686_v54, %v7152_v16 }
 0x27e   :  { %v5716_v11 = vcombine.high %v5700_v2, %v5700_v2 }
 0x27f   :  { %v6983_v53 = vcombine.high %v9059_v37, %v9065_v39  ;;  %v6399_v24 = vrot.slane %v6392_v6, %v7152_v16  ;;  %v6444_v12 = vrot.slane %v9065_v39, %v7152_v16  ;;  %v5717_v51 = vcombine.high %v9065_v39, %v9065_v39 }
 0x280   :  { %6530 = vrot.lane.b32.xlu1 %v6163_v26, %s7089_s6  ;;  %6426 = vrot.lane.b32.xlu0 %v6254_v14, %s7088_s10  ;;  %v6058_v26 = vrot.slane %v6056_v30, 1  ;;  %v5867_v32 = vcombine.low %v5714_v23, %v5716_v11  ;;  %v6985_v34 = vcombine.high %v5700_v2, %v5714_v23  ;;  %v5718_v50 = vcombine.high %v5714_v23, %v5714_v23 }
 0x281   :  { %v9079_v47 = vrot.slane %v6983_v53, %v7152_v16  ;;  %v6445_v45 = vcombine.low %v6399_v24, %v6444_v12  ;;  %v6164_v31 = vcombine.low %v5717_v51, %v5700_v2  ;;  %v6406_v21 = vrot.slane %v6399_v24, %v7152_v16 }
 0x282   :  { %v6059_v10 = vor.u32 %v6058_v26, %v6054_v20  ;;  %v5874_v43 = vrot.slane %v5867_v32, %v7152_v16  ;;  %v6186_v27 = vrot.slane %v6985_v34, %v7152_v16  ;;  %v5993_v29 = vrot.slane %v5718_v50, %v7152_v16 }
 0x283   :  { %v5979_v60 = vcombine.low %v9079_v47, %v5978_v8  ;;  %v6498_v42 = vcombine.low %v9059_v37, %v9065_v39  ;;  %v6452_v38 = vrot.slane %v6445_v45, %v7152_v16  ;;  %v6171_v37 = vrot.slane %v6164_v31, %v7152_v16 }
 0x284   :  { %6090 = vrot.lane.b32.xlu1 %v6045_v5, %s7081_s12  ;;  %6532 = vrot.lane.b32.xlu0 %v6360_v58, %s7089_s6  ;;  %v9103_v19 = vrot.slane %v5874_v43, %v7152_v16  ;;  %v6193_v14 = vrot.slane %v6186_v27, %v7152_v16  ;;  %v5994_v17 = vcombine.low %v5874_v43, %v5993_v29 }
 0x285   :  { %v6505_v9 = vrot.slane %v6498_v42, %v7152_v16  ;;  %v6471_v58 = vshll.u32 %v6452_v38, 16  ;;  %v5986_v52 = vrot.slane %v5979_v60, %v7152_v16  ;;  %v6469_v48 = vshrl.u32 %v6452_v38, 16 }
 0x286   :  { %v6001_v63 = vrot.slane %v5994_v17, %v7152_v16  ;;  %v6178_v2 = vrot.slane %v6171_v37, %v7152_v16 }
 0x287   :  { %v6512_v25 = vrot.slane %v6505_v9, %v7152_v16  ;;  %v6473_v57 = vrot.slane %v6471_v58, 1  ;;  %v6063_v41 = vshll.u32 %v5986_v52, 16  ;;  %v6061_v24 = vshrl.u32 %v5986_v52, 16 }
 0x288   :  { %6332 = vrot.lane.b32.xlu1 %v6052_v4, %s7084_s8  ;;  %6330 = vrot.lane.b32.xlu0 %v6045_v5, %s7084_s8  ;;  %v6070_v7 = vshll.u32 %v6001_v63, 16  ;;  %v6068_v53 = vshrl.u32 %v6001_v63, 16 }
 0x289   :  { %v6474_v44 = vor.u32 %v6473_v57, %v6469_v48  ;;  %v6065_v6 = vrot.slane %v6063_v41, 1 }
 0x28a   :  { %v6072_v39 = vrot.slane %v6070_v7, 1 }
 0x28b   :  { %v6066_v3 = vor.u32 %v6065_v6, %v6061_v24 }
 0x28c   :  { %6092 = vrot.lane.b32.xlu0 %v6052_v4, %s7081_s12  ;;  %6428 = vrot.lane.b32.xlu1 %v6406_v21, %s7088_s10  ;;  %v6073_v12 = vor.u32 %v6072_v39, %v6068_v53 }
 0x290   :  { %6482 = vrot.lane.b32.xlu0 %v6052_v4, %s7090_s7  ;;  %6094 = vrot.lane.b32.xlu1 %v6059_v10, %s7081_s12 }
 0x294   :  { %6278 = vrot.lane.b32.xlu0 %v9103_v19, %s7078_s26  ;;  %6234 = vrot.lane.b32.xlu1 %v6193_v14, %s7080_s11 }
 0x298   :  { %6334 = vrot.lane.b32.xlu0 %v6059_v10, %s7084_s8  ;;  %6336 = vrot.lane.b32.xlu1 %v6322_v33, %s7084_s8 }
 0x29c   :  { %6384 = vrot.lane.b32.xlu0 %v6193_v14, %s7087_s2  ;;  %6484 = vrot.lane.b32.xlu1 %v6059_v10, %s7090_s7 }
 0x2a0   :  { %6486 = vrot.lane.b32.xlu0 %v6322_v33, %s7090_s7  ;;  %6534 = vrot.lane.b32.xlu1 %v6512_v25, %s7089_s6 }
 0x2a4   :  { %6488 = vrot.lane.b32.xlu1 %v6474_v44, %s7090_s7  ;;  %6232 = vrot.lane.b32.xlu0 %v6178_v2, %s7080_s11 }
 0x2a8   :  { %6098 = vrot.lane.b32.xlu1 %v6073_v12, %s7081_s12  ;;  %6096 = vrot.lane.b32.xlu0 %v6066_v3, %s7081_s12 }
 0x2b8   :  { %v9137_v34 = vpop.permute.xlu0 %6224  ;;  %v9161_v41 = vpop.permute.xlu1 %6226 }
 0x2b9   :  { %v5539_v56 = vpop.f32.mrb[12].mxu0 }
 0x2ba   :  { %v5540_v22 = vadd.f32 %v8976_v15, %v5539_v56  ;;  %v7031_v51 = vpop.f32.mrb[13].mxu0 }
 0x2bb   :  { %v5542_v8 = vpop.f32.mrb[14].mxu0 }
 0x2bc   :  { %v5543_v45 = vadd.f32 %v8976_v15, %v5542_v8  ;;  %v7032_v35 = vpop.f32.mrb[15].mxu0  ;;  %v5559_v31 = vmax.f32 %v5540_v22, 0.0  ;;  %v9149_v9 = vpop.permute.xlu0 %6376 }
 0x2bd   :  { %v9176_v3 = vpop.permute.xlu1 %6272 }
 0x2be   :  { %v5560_v60 = vmax.f32 %v5543_v45, 0.0 }
 0x2c0   :  { %v5565_v54 = vpack.c.bf16 %v5560_v60, %v5559_v31  ;;  %v6981_v5 = vpack.c.bf16 %v5560_v60, %v5560_v60  ;;  %v9163_v48 = vpop.permute.xlu0 %6422 }
 0x2c2   :  { %v5726_v59 = vrot.slane %v5565_v54, %v7152_v16  ;;  %v5733_v46 = vrot.slane %v6981_v5, %v7152_v16 }
 0x2c4   :  { %v5734_v0 = vcombine.high %v5726_v59, %v5726_v59  ;;  %v5735_v55 = vcombine.high %v5733_v46, %v5733_v46  ;;  %v5742_v40 = vrot.slane %v5726_v59, %v7152_v16  ;;  %v5749_v23 = vrot.slane %v5733_v46, %v7152_v16  ;;  %v9181_v22 = vpop.permute.xlu0 %6270 }
 0x2c6   :  { %v5756_v4 = vrot.slane %v5734_v0, %v7152_v16  ;;  %v5763_v30 = vrot.slane %v5735_v55, %v7152_v16  ;;  %v5764_v11 = vcombine.high %v5742_v40, %v5742_v40 }
 0x2c8   :  { %v5882_v49 = vcombine.low %v5742_v40, %v5756_v4  ;;  %v6194_v21 = vcombine.low %v5756_v4, %v5764_v11  ;;  %v6209_v26 = vcombine.low %v5749_v23, %v5763_v30  ;;  %v5766_v32 = vcombine.high %v5756_v4, %v5756_v4 }
 0x2c9   :  { %v6986_v29 = vcombine.high %v5749_v23, %v5763_v30  ;;  %v6023_v1 = vrot.slane %v5763_v30, %v7152_v16  ;;  %v6008_v7 = vrot.slane %v5764_v11, %v7152_v16  ;;  %v5767_v2 = vcombine.high %v5763_v30, %v5763_v30 }
 0x2ca   :  { %v6216_v20 = vrot.slane %v6209_v26, %v7152_v16  ;;  %v6201_v61 = vrot.slane %v6194_v21, %v7152_v16  ;;  %v5897_v50 = vcombine.low %v5766_v32, %v5749_v23  ;;  %v5889_v27 = vrot.slane %v5882_v49, %v7152_v16  ;;  %v7071_v49 = vld [vmem:[%s9392_s3] sm:$0xff]  }
 0x2cb   :  { %v6262_v25 = vrot.slane %v6986_v29, %v7152_v16  ;;  %7037 = vmatprep.subr.bf16.mxu1 %v7071_v49 }
 0x2cc   :  { %v6223_v10 = vrot.slane %v6216_v20, %v7152_v16  ;;  %v6208_v43 = vrot.slane %v6201_v61, %v7152_v16  ;;  %v5904_v28 = vrot.slane %v5897_v50, %v7152_v16  ;;  %v9152_v52 = vrot.slane %v5889_v27, %v7152_v16  ;;  %7038 = vmatpush3.bf16.msra.mxu1 %v7071_v49 }
 0x2cd   :  { %v5547_v14 = vpop.f32.mrb[16].mxu0  ;;  %v6269_v37 = vrot.slane %v6262_v25, %v7152_v16  ;;  %v6009_v6 = vcombine.low %v5889_v27, %v6008_v7 }
 0x2ce   :  { %v5548_v42 = vadd.f32 %v8976_v15, %v5547_v14  ;;  %v7035_v17 = vpop.f32.mrb[17].mxu0  ;;  %6238 = vrot.lane.b32.xlu1 %v6223_v10, %s7080_s11  ;;  %6236 = vrot.lane.b32.xlu0 %v6208_v43, %s7080_s11  ;;  %v6024_v38 = vcombine.low %v5904_v28, %v6023_v1  ;;  %v9189_v45 = vrot.slane %v5904_v28, %v7152_v16 }
 0x2cf   :  { %v5550_v33 = vpop.f32.mrb[18].mxu0  ;;  %v6016_v51 = vrot.slane %v6009_v6, %v7152_v16 }
 0x2d0   :  { %v5561_v58 = vmax.f32 %v5548_v42, 0.0  ;;  %v7036_v63 = vpop.f32.mrb[19].mxu0  ;;  %v6031_v59 = vrot.slane %v6024_v38, %v7152_v16 }
 0x2d1   :  { %v6077_v31 = vshll.u32 %v6016_v51, 16  ;;  %v6075_v30 = vshrl.u32 %v6016_v51, 16  ;;  %v7073_v63 = vld [vmem:[%s9392_s3 + $0x10] sm:$0xff]   ;;  %v7075_v51 = vld [vmem:[%s9392_s3 + $0x20] ss:$0 sps:$4 sm:$0xff]  }
 0x2d2   :  { %v5566_v57 = vpack.c.bf16 %v5561_v58, %v5561_v58  ;;  %6338 = vrot.lane.b32.xlu0 %v6073_v12, %s7084_s8  ;;  %6280 = vrot.lane.b32.xlu1 %v9152_v52, %s7078_s26  ;;  %v6084_v11 = vshll.u32 %v6031_v59, 16  ;;  %v6082_v1 = vshrl.u32 %v6031_v59, 16 }
 0x2d3   :  { %v6079_v55 = vrot.slane %v6077_v31, 1 }
 0x2d4   :  { %v5774_v15 = vrot.slane %v5566_v57, %v7152_v16  ;;  %v6086_v27 = vrot.slane %v6084_v11, 1 }
 0x2d5   :  { %v6080_v21 = vor.u32 %v6079_v55, %v6075_v30  ;;  %v5806_v30 = vrot.slane %v9013_v36, %v7152_v16 }
 0x2d6   :  { %v9166_v44 = vrot.slane %v5774_v15, %v7152_v16  ;;  %6388 = vrot.lane.b32.xlu0 %v6223_v10, %s7087_s2  ;;  %6284 = vrot.lane.b32.xlu1 %v6269_v37, %s7078_s26  ;;  %v5775_v39 = vcombine.high %v5774_v15, %v5774_v15  ;;  %v6087_v42 = vor.u32 %v6086_v27, %v6082_v1 }
 0x2d8   :  { %v6307_v53 = vrot.slane %v9166_v44, %v7152_v16  ;;  %v6361_v24 = vcombine.low %v5767_v2, %v9166_v44  ;;  %v9179_v56 = vrot.slane %v5775_v39, %v7152_v16  ;;  %v5790_v8 = vcombine.high %v9166_v44, %v9166_v44 }
 0x2da   :  { %v6308_v12 = vcombine.low %v6262_v25, %v6307_v53  ;;  %6430 = vrot.lane.b32.xlu0 %v9152_v52, %s7088_s10  ;;  %6386 = vrot.lane.b32.xlu1 %v6208_v43, %s7087_s2  ;;  %v6368_v35 = vrot.slane %v6361_v24, %v7152_v16  ;;  %v6407_v60 = vcombine.low %v9179_v56, %v5790_v8  ;;  %v7074_v25 = vld [vmem:[%s9392_s3 + $0x18] sm:$0xff]  }
 0x2db   :  { %v5791_v46 = vcombine.high %v9179_v56, %v9179_v56  ;;  %v6987_v6 = vcombine.high %v9166_v44, %v9179_v56  ;;  %v6778_v44 = vsel %vm6776_vm0, %v7075_v51, 0 }
 0x2dc   :  { %v6375_v0 = vrot.slane %v6368_v35, %v7152_v16  ;;  %v6414_v40 = vrot.slane %v6407_v60, %v7152_v16  ;;  %v6315_v20 = vrot.slane %v6308_v12, %v7152_v16 }
 0x2dd   :  { %v6459_v32 = vrot.slane %v5791_v46, %v7152_v16  ;;  %v6520_v35 = vrot.slane %v6987_v6, %v7152_v16 }
 0x2de   :  { %6434 = vrot.lane.b32.xlu0 %v6269_v37, %s7088_s10  ;;  %6538 = vrot.lane.b32.xlu1 %v6223_v10, %s7089_s6  ;;  %v9193_v54 = vpop.permute.xlu1 %6378  ;;  %v9195_v5 = vpop.permute.xlu0 %6228  ;;  %v6421_v26 = vrot.slane %v6414_v40, %v7152_v16  ;;  %v7072_v10 = vld [vmem:[%s9392_s3 + $0x8] sm:$0xff]   ;;  %v6326_v29 = vshll.u32 %v6315_v20, 16  ;;  %v6324_v57 = vshrl.u32 %v6315_v20, 16 }
 0x2df   :  { %7039 = vmatprep.subr.bf16.mxu1 %v7072_v10  ;;  %v6527_v56 = vrot.slane %v6520_v35, %v7152_v16 }
 0x2e0   :  { %7040 = vmatpush3.bf16.msra.mxu1 %v7072_v10  ;;  %v6328_v17 = vrot.slane %v6326_v29, 1 }
 0x2e1   :  { %7041 = vmatprep.subr.bf16.mxu1 %v7073_v63 }
 0x2e2   :  { %6536 = vrot.lane.b32.xlu0 %v6208_v43, %s7089_s6  ;;  %6432 = vrot.lane.b32.xlu1 %v9189_v45, %s7088_s10  ;;  %v9205_v23 = vpop.permute.xlu0 %6528  ;;  %v9207_v4 = vpop.permute.xlu1 %6230  ;;  %v6460_v43 = vcombine.low %v6414_v40, %v6459_v32  ;;  %v6329_v15 = vor.u32 %v6328_v17, %v6324_v57  ;;  %v7091_v17 = vmov 1983009808  }
 0x2e4   :  { %v6467_v33 = vrot.slane %v6460_v43, %v7152_v16  ;;  %7042 = vmatpush3.bf16.msra.mxu1 %v7073_v63 }
 0x2e5   :  { %7043 = vmatprep.subr.bf16.mxu1 %v7074_v25 }
 0x2e6   :  { %6282 = vrot.lane.b32.xlu0 %v9189_v45, %s7078_s26  ;;  %6390 = vrot.lane.b32.xlu1 %v6375_v0, %s7087_s2  ;;  %v9218_v61 = vpop.permute.xlu0 %6088  ;;  %v9220_v50 = vpop.permute.xlu1 %6276  ;;  %v6478_v37 = vshll.u32 %v6467_v33, 16  ;;  %v6476_v12 = vshrl.u32 %v6467_v33, 16  ;;  %v6711_v33 = vunpack.c.l.s4 %v7091_v17 }
 0x2e7   :  { %v6546_v49 = vsel %vm4751_vm6, %v5806_v30, %v9218_v61 }
 0x2e8   :  { %v6480_v39 = vrot.slane %v6478_v37, 1  ;;  %7044 = vmatpush3.bf16.msra.mxu1 %v7074_v25  ;;  %v6569_v20 = vsel %vm4801_vm8, %v6546_v49, %v9137_v34  ;;  %v6712_v37 = vunpack.c.0.s8 %v6711_v33 }
 0x2e9   :  { %7051 = vmatprep.subr.msk.bf16.mxu1 %vm6776_vm0, %v7075_v51 }
 0x2ea   :  { %6100 = vrot.lane.b32.xlu0 %v6080_v21, %s7081_s12  ;;  %6436 = vrot.lane.b32.xlu1 %v6421_v26, %s7088_s10  ;;  %v9227_v14 = vpop.permute.xlu1 %6382  ;;  %v9229_v28 = vpop.permute.xlu0 %6274  ;;  %v6481_v8 = vor.u32 %v6480_v39, %v6476_v12 }
 0x2ec   :  { %7046 = vmatpush3.bf16.msra.mxu1 %v6778_v44 }
 0x2ee   :  { %6490 = vrot.lane.b32.xlu0 %v6080_v21, %s7090_s7  ;;  %6340 = vrot.lane.b32.xlu1 %v6080_v21, %s7084_s8  ;;  %v9234_v38 = vpop.permute.xlu1 %6424  ;;  %v9236_v58 = vpop.permute.xlu0 %6380 }
 0x2f2   :  { %6342 = vrot.lane.b32.xlu0 %v6087_v42, %s7084_s8  ;;  %6102 = vrot.lane.b32.xlu1 %v6087_v42, %s7081_s12  ;;  %v9246_v7 = vpop.permute.xlu1 %6530  ;;  %v9248_v2 = vpop.permute.xlu0 %6426 }
 0x2f6   :  { %6494 = vrot.lane.b32.xlu0 %v6329_v15, %s7090_s7  ;;  %6344 = vrot.lane.b32.xlu1 %v6329_v15, %s7084_s8  ;;  %v6091_v53 = vpop.permute.xlu1 %6090  ;;  %v9254_v24 = vpop.permute.xlu0 %6532 }
 0x2fa   :  { %6540 = vrot.lane.b32.xlu0 %v6375_v0, %s7089_s6  ;;  %6492 = vrot.lane.b32.xlu1 %v6087_v42, %s7090_s7  ;;  %v6333_v31 = vpop.permute.xlu1 %6332  ;;  %v6331_v60 = vpop.permute.xlu0 %6330  ;;  %v6549_v0 = vsel %vm4751_vm6, %v9006_v62, %v6091_v53 }
 0x2fb   :  { %v6571_v11 = vsel %vm4801_vm8, %v6549_v0, %v9161_v41 }
 0x2fc   :  { %v6587_v32 = vsel %vm4851_vm10, %v6571_v11, %v9176_v3  ;;  %v6585_v3 = vsel %vm4851_vm10, %v6569_v20, %v9181_v22 }
 0x2fd   :  { %v6603_v41 = vsel %vm4901_vm12, %v6587_v32, %v6333_v31  ;;  %v6601_v27 = vsel %vm4901_vm12, %v6585_v3, %v6331_v60  ;;  %v5866_v60 = vrot.slane %v9079_v47, %v7152_v16 }
 0x2fe   :  { %6496 = vrot.lane.b32.xlu1 %v6481_v8, %s7090_s7  ;;  %v6093_v59 = vpop.permute.xlu0 %6092  ;;  %v6429_v46 = vpop.permute.xlu1 %6428  ;;  %v6620_v34 = vsel %vm6616_vm1, %v6603_v41, %v9193_v54  ;;  %v6618_v42 = vsel %vm6616_vm1, %v6601_v27, %v9149_v9 }
 0x2ff   :  { %v6552_v62 = vsel %vm4751_vm6, %v8998_v13, %v6093_v59  ;;  %v6637_v54 = vsel %vm6633_vm2, %v6620_v34, %v9234_v38  ;;  %v6635_v25 = vsel %vm6633_vm2, %v6618_v42, %v9163_v48 }
 0x300   :  { %v6573_v61 = vsel %vm4801_vm8, %v6552_v62, %v9195_v5 }
 0x302   :  { %6542 = vrot.lane.b32.xlu1 %v6527_v56, %s7089_s6  ;;  %v6483_v55 = vpop.permute.xlu0 %6482  ;;  %v6095_v40 = vpop.permute.xlu1 %6094 }
 0x303   :  { %v6555_v36 = vsel %vm4751_vm6, %v9049_v18, %v6095_v40  ;;  %v6589_v18 = vsel %vm4851_vm10, %v6573_v61, %v9229_v28 }
 0x304   :  { %v6575_v13 = vsel %vm4801_vm8, %v6555_v36, %v9207_v4 }
 0x305   :  { %v6591_v22 = vsel %vm4851_vm10, %v6575_v13, %v9220_v50  ;;  %v6652_v50 = vsel %vm6650_vm3, %v6635_v25, %v6483_v55 }
 0x306   :  { %v6279_v21 = vpop.permute.xlu0 %6278  ;;  %v9273_v26 = vpop.permute.xlu1 %6234  ;;  %v6669_v48 = vsel %vm6667_vm4, %v6652_v50, %v9205_v23 }
 0x30a   :  { %v6335_v10 = vpop.permute.xlu0 %6334  ;;  %v6337_v43 = vpop.permute.xlu1 %6336 }
 0x30b   :  { %v6605_v29 = vsel %vm4901_vm12, %v6589_v18, %v6335_v10  ;;  %v6607_v4 = vsel %vm4901_vm12, %v6591_v22, %v6337_v43 }
 0x30c   :  { %v6622_v28 = vsel %vm6616_vm1, %v6605_v29, %v9236_v58  ;;  %v6624_v15 = vsel %vm6616_vm1, %v6607_v4, %v9227_v14  ;;  %v9415_v14 = vld [vmem:[#allocation2_spill] sm:$0xff] }
 0x30d   :  { %v6639_v58 = vsel %vm6633_vm2, %v6622_v28, %v9248_v2  ;;  %v6641_v6 = vsel %vm6633_vm2, %v6624_v15, %v6429_v46  ;;  %v9321_v35 = vsub.s32 %v6712_v37, %v9415_v14 }
 0x30e   :  { %v6385_v5 = vpop.permute.xlu0 %6384  ;;  %v6485_v1 = vpop.permute.xlu1 %6484 }
 0x30f   :  { %v6654_v63 = vsel %vm6650_vm3, %v6637_v54, %v6485_v1 }
 0x310   :  { %v6671_v38 = vsel %vm6667_vm4, %v6654_v63, %v9246_v7 }
 0x311   :  { %v6708_v51 = vcombine.low %v6669_v48, %v6671_v38 }
 0x312   :  { %v6487_v9 = vpop.permute.xlu0 %6486  ;;  %v6535_v57 = vpop.permute.xlu1 %6534 }
 0x313   :  { %v6656_v39 = vsel %vm6650_vm3, %v6639_v58, %v6487_v9  ;;  %v6716_v56 = vrot.slane %v6708_v51, %v9321_v35 }
 0x314   :  { %v6673_v7 = vsel %vm6667_vm4, %v6656_v39, %v9254_v24 }
 0x316   :  { %v6489_v53 = vpop.permute.xlu1 %6488  ;;  %v6233_v12 = vpop.permute.xlu0 %6232 }
 0x317   :  { %v6658_v8 = vsel %vm6650_vm3, %v6641_v6, %v6489_v53 }
 0x318   :  { %v6675_v2 = vsel %vm6667_vm4, %v6658_v8, %v6535_v57 }
 0x319   :  { %v6709_v31 = vcombine.low %v6673_v7, %v6675_v2 }
 0x31a   :  { %v6097_v23 = vpop.permute.xlu0 %6096  ;;  %v6099_v24 = vpop.permute.xlu1 %6098 }
 0x31b   :  { %v6558_v44 = vsel %vm4751_vm6, %v5866_v60, %v6097_v23  ;;  %v6723_v59 = vrot.slane %v6709_v31, %v9321_v35  ;;  %v6561_v29 = vsel %vm4751_vm6, %v9103_v19, %v6099_v24 }
 0x31c   :  { %v6577_v46 = vsel %vm4801_vm8, %v6558_v44, %v6233_v12 }
 0x31d   :  { %v6724_v0 = vcombine.low %v6716_v56, %v6723_v59  ;;  %v6593_v55 = vsel %vm4851_vm10, %v6577_v46, %v6279_v21 }
 0x31f   :  { %7047 = vmatprep.mubr.msk.bf16.mxu1 %vm6769_vm5, %v6724_v0  ;;  %v6988_v0 = vld [vmem:[%s9393_s4] ss:$0 sm:$0xff] }
 0x340   :  { %v6239_v40 = vpop.permute.xlu1 %6238  ;;  %v6237_v30 = vpop.permute.xlu0 %6236 }
 0x344   :  { %v6339_v11 = vpop.permute.xlu0 %6338  ;;  %v6281_v16 = vpop.permute.xlu1 %6280 }
 0x345   :  { %v6609_v47 = vsel %vm4901_vm12, %v6593_v55, %v6339_v11 }
 0x346   :  { %v6626_v49 = vsel %vm6616_vm1, %v6609_v47, %v6385_v5  ;;  %v6579_v5 = vsel %vm4801_vm8, %v6561_v29, %v9273_v26 }
 0x347   :  { %v6595_v22 = vsel %vm4851_vm10, %v6579_v5, %v6281_v16 }
 0x348   :  { %v6389_v32 = vpop.permute.xlu0 %6388  ;;  %v6285_v62 = vpop.permute.xlu1 %6284 }
 0x34c   :  { %v6431_v20 = vpop.permute.xlu0 %6430  ;;  %v6387_v36 = vpop.permute.xlu1 %6386 }
 0x34d   :  { %v6643_v26 = vsel %vm6633_vm2, %v6626_v49, %v6431_v20 }
 0x350   :  { %v6435_v41 = vpop.permute.xlu0 %6434  ;;  %v6539_v61 = vpop.permute.xlu1 %6538 }
 0x354   :  { %v6537_v10 = vpop.permute.xlu0 %6536  ;;  %v6433_v43 = vpop.permute.xlu1 %6432 }
 0x358   :  { %v6283_v21 = vpop.permute.xlu0 %6282  ;;  %v6391_v3 = vpop.permute.xlu1 %6390 }
 0x35c   :  { %v6101_v27 = vpop.permute.xlu0 %6100  ;;  %v6437_v13 = vpop.permute.xlu1 %6436 }
 0x35d   :  { %v6564_v1 = vsel %vm4751_vm6, %v9152_v52, %v6101_v27 }
 0x35e   :  { %v6581_v54 = vsel %vm4801_vm8, %v6564_v1, %v6237_v30 }
 0x35f   :  { %v6597_v52 = vsel %vm4851_vm10, %v6581_v54, %v6283_v21 }
 0x360   :  { %v6491_v34 = vpop.permute.xlu0 %6490  ;;  %v6341_v18 = vpop.permute.xlu1 %6340 }
 0x361   :  { %v6611_v33 = vsel %vm4901_vm12, %v6595_v22, %v6341_v18  ;;  %v6660_v9 = vsel %vm6650_vm3, %v6643_v26, %v6491_v34 }
 0x362   :  { %v6628_v63 = vsel %vm6616_vm1, %v6611_v33, %v6387_v36  ;;  %v6677_v58 = vsel %vm6667_vm4, %v6660_v9, %v6537_v10 }
 0x363   :  { %v6645_v50 = vsel %vm6633_vm2, %v6628_v63, %v6433_v43 }
 0x364   :  { %v6103_v42 = vpop.permute.xlu1 %6102  ;;  %v6343_v4 = vpop.permute.xlu0 %6342 }
 0x365   :  { %v6567_v17 = vsel %vm4751_vm6, %v9189_v45, %v6103_v42  ;;  %v6613_v45 = vsel %vm4901_vm12, %v6597_v52, %v6343_v4 }
 0x366   :  { %v6583_v28 = vsel %vm4801_vm8, %v6567_v17, %v6239_v40  ;;  %v6630_v39 = vsel %vm6616_vm1, %v6613_v45, %v6389_v32 }
 0x367   :  { %v6599_v25 = vsel %vm4851_vm10, %v6583_v28, %v6285_v62  ;;  %v6647_v51 = vsel %vm6633_vm2, %v6630_v39, %v6435_v41 }
 0x368   :  { %v6345_v19 = vpop.permute.xlu1 %6344  ;;  %v6495_v57 = vpop.permute.xlu0 %6494 }
 0x369   :  { %v6615_v37 = vsel %vm4901_vm12, %v6599_v25, %v6345_v19  ;;  %v6664_v7 = vsel %vm6650_vm3, %v6647_v51, %v6495_v57 }
 0x36a   :  { %v6632_v53 = vsel %vm6616_vm1, %v6615_v37, %v6391_v3 }
 0x36b   :  { %v6649_v14 = vsel %vm6633_vm2, %v6632_v53, %v6437_v13 }
 0x36c   :  { %v6493_v15 = vpop.permute.xlu1 %6492  ;;  %v6541_v8 = vpop.permute.xlu0 %6540 }
 0x36d   :  { %v6662_v38 = vsel %vm6650_vm3, %v6645_v50, %v6493_v15  ;;  %v6681_v60 = vsel %vm6667_vm4, %v6664_v7, %v6541_v8 }
 0x36e   :  { %v6679_v48 = vsel %vm6667_vm4, %v6662_v38, %v6539_v61 }
 0x36f   :  { %v6725_v6 = vcombine.low %v6677_v58, %v6679_v48 }
 0x370   :  { %v6497_v12 = vpop.permute.xlu1 %6496 }
 0x371   :  { %v6666_v2 = vsel %vm6650_vm3, %v6649_v14, %v6497_v12  ;;  %v6733_v56 = vrot.slane %v6725_v6, %v9321_v35 }
 0x374   :  { %v6543_v31 = vpop.permute.xlu1 %6542 }
 0x375   :  { %v6683_v23 = vsel %vm6667_vm4, %v6666_v2, %v6543_v31 }
 0x376   :  { %v6726_v44 = vcombine.low %v6681_v60, %v6683_v23 }
 0x378   :  { %v6740_v59 = vrot.slane %v6726_v44, %v9321_v35 }
 0x37a   :  { %v6741_v46 = vcombine.low %v6733_v56, %v6740_v59 }
 0x37c   :  { %7048 = vmatmul.mubr.msk.bf16.vlgmr.msra.gmra.mrb[0].mxu1 %vm6769_vm5, %v6741_v46 }
 0x44f   :  { %v7049_v55 = vpop.f32.mrb[0].mxu1 }
 0x450   :  { %v6823_v24 = vadd.f32 %v7049_v55, %v6988_v0  ;;  %v6814_v40 = vpop.f32.mrb[1].mxu1 }
 0x451   :  { %v6815_v30 = vadd.f32 %v6988_v0, %v6814_v40  ;;  %v7050_v11 = vpop.f32.mrb[2].mxu1 }
 0x452   :  { %v6831_v16 = vmax.f32 %v6823_v24, 0.0  ;;  %v6826_v47 = vadd.f32 %v7050_v11, %v6988_v0  ;;  %v6817_v49 = vpop.f32.mrb[3].mxu1 }
 0x453   :  { %v6829_v32 = vmax.f32 %v6815_v30, 0.0  ;;  %v6818_v62 = vadd.f32 %v6988_v0, %v6817_v49 }
 0x454   :  { %6835 = vst.msk [vmem:[%s9394_s5 + $0x10] sm:$0xff] %vm4751_vm6, %v6831_v16  ;;  %v6832_v35 = vmax.f32 %v6826_v47, 0.0 }
 0x455   :  { %6833 = vst.msk [vmem:[%s9394_s5] sm:$0xff] %vm4751_vm6, %v6829_v32  ;;  %v6830_v20 = vmax.f32 %v6818_v62, 0.0 }
 0x456   :  { %6836 = vst.msk [vmem:[%s9394_s5 + $0x18] sm:$0xff] %vm4751_vm6, %v6832_v35 }
 0x457   :  { %6834 = vst.msk [vmem:[%s9394_s5 + $0x8] sm:$0xff] %vm4751_vm6, %v6830_v20 }

</bundles_post_ra>
